<compile_context>
chip_gen: v5e
topology: v5e:2x2
jax: 0.10.0
libtpu: 0.0.40
codegen_flags: <defaults>
</compile_context>

<pallas_src>
import functools

import jax
import jax.numpy as jnp
from jax.experimental import pallas as pl
from jax.experimental.pallas import tpu as pltpu

BN_EPS = 1e-5


def _round_up(x, m):
    return (x + m - 1) // m * m


# ------------------------------- kernel ------------------------------------ #

def _conv_block_kernel(x_ref, w1_ref, b1_ref, w2_ref, b2_ref, out_ref, pad2_ref,
                       *, Wp, W):
    # x_ref   : (1, HWp, 9*Cin) bf16   im2col slab for conv1 (pad cols are zero)
    # w1_ref  : (9*Cin, Cout)   bf16   BN scale folded in
    # w2_ref  : (9, Cout, Cout) bf16   BN scale folded in (tap = dy*3+dx, HWIO)
    # b*_ref  : (1, Cout)       f32    conv bias + BN shift folded
    # out_ref : (1, HWp, Cout)  bf16   raw output slab (wrapper un-pads)
    # pad2_ref: ((H+4)*Wp, Cout) bf16  zero-padded conv2 input slab
    HWp = x_ref.shape[1]
    Cout = out_ref.shape[-1]
    base = 2 * Wp

    # ---- conv1 (+folded BN) + bias + ReLU: single im2col matmul, f32 acc ----
    y1 = jnp.dot(x_ref[0], w1_ref[...], preferred_element_type=jnp.float32)
    y1 = jnp.maximum(y1 + b1_ref[...], 0.0)

    # Zero the w >= W pad columns: they serve as left/right zero padding for conv2.
    col = jax.lax.broadcasted_iota(jnp.int32, (HWp, 1), 0) % Wp
    y1 = jnp.where(col < W, y1, 0.0)

    # ---- stage y1 as conv2's zero-padded slab (halo rows zeroed every step) ----
    pad2_ref[0:base, :] = jnp.zeros((base, Cout), pad2_ref.dtype)
    pad2_ref[base + HWp:base + HWp + base, :] = jnp.zeros((base, Cout), pad2_ref.dtype)
    pad2_ref[base:base + HWp, :] = y1.astype(pad2_ref.dtype)

    # ---- conv2: 9 contiguous-tap MXU matmuls, accumulate in vregs ----
    acc = None
    for dy in range(3):
        for dx in range(3):
            t0 = (dy + 1) * Wp + (dx - 1)
            part = jnp.dot(pad2_ref[t0:t0 + HWp, :], w2_ref[dy * 3 + dx],
                           preferred_element_type=jnp.float32)
            acc = part if acc is None else acc + part

    y2 = jnp.maximum(acc + b2_ref[...], 0.0)
    out_ref[0] = y2.astype(out_ref.dtype)          # single dense slab store


# ------------------------------- wrapper ----------------------------------- #

def _fold_bn(conv_bias, bn):
    scale = (bn["gamma"] / jnp.sqrt(bn["var"] + BN_EPS)).astype(jnp.float32)
    bias = (bn["beta"] + scale * (conv_bias - bn["mean"])).astype(jnp.float32)
    return scale, bias.reshape(1, -1)


def conv_block_forward(params, x_nchw):
    """x: (N, ch_in, H, W) f32 -> (N, ch_out, H, W) f32 (eval-mode BN)."""
    N, Cin, H, W = x_nchw.shape
    Cout = params["w1"].shape[-1]
    Wp = _round_up(W + 2, 16)          # bf16 sublane-tile aligned row stride
    HWp = H * Wp
    K1 = 9 * Cin

    s1, b1 = _fold_bn(params["b1"], params["bn1"])
    s2, b2 = _fold_bn(params["b2"], params["bn2"])
    w1 = (params["w1"] * s1).reshape(K1, Cout).astype(jnp.bfloat16)
    w2 = (params["w2"] * s2).reshape(9, Cout, Cout).astype(jnp.bfloat16)

    # Build the conv1 im2col slab in the wrapper (layout plumbing, no FLOPs):
    # row (h*Wp + w) holds [x(h+dy-1, w+dx-1, :) for dy, dx], zeros at pads.
    x = jnp.transpose(x_nchw, (0, 2, 3, 1)).astype(jnp.bfloat16)        # NHWC bf16
    xp = jnp.pad(x, ((0, 0), (1, 1), (1, 1), (0, 0)))
    taps = [xp[:, dy:dy + H, dx:dx + W, :] for dy in range(3) for dx in range(3)]
    im2col = jnp.concatenate(taps, axis=-1)                             # (N,H,W,9Cin)
    im2col = jnp.pad(im2col, ((0, 0), (0, 0), (0, Wp - W), (0, 0)))
    im2col = im2col.reshape(N, HWp, K1)

    flops = N * 2 * H * W * 9 * Cout * (Cin + Cout)
    bytes_accessed = (im2col.size * 2 + w1.size * 2 + w2.size * 2
                      + b1.size * 4 + b2.size * 4 + N * HWp * Cout * 2)

    kernel = functools.partial(_conv_block_kernel, Wp=Wp, W=W)
    out = pl.pallas_call(
        kernel,
        out_shape=jax.ShapeDtypeStruct((N, HWp, Cout), jnp.bfloat16),
        grid=(N,),
        in_specs=[
            pl.BlockSpec((1, HWp, K1), lambda n: (n, 0, 0)),
            pl.BlockSpec((K1, Cout), lambda n: (0, 0)),
            pl.BlockSpec((1, Cout), lambda n: (0, 0)),
            pl.BlockSpec((9, Cout, Cout), lambda n: (0, 0, 0)),
            pl.BlockSpec((1, Cout), lambda n: (0, 0)),
        ],
        out_specs=pl.BlockSpec((1, HWp, Cout), lambda n: (n, 0, 0)),
        scratch_shapes=[
            pltpu.VMEM(((H + 4) * Wp, Cout), jnp.bfloat16),   # conv2 padded slab
        ],
        compiler_params=pltpu.CompilerParams(
            dimension_semantics=("parallel",),
        ),
        cost_estimate=pl.CostEstimate(flops=flops, transcendentals=0,
                                      bytes_accessed=bytes_accessed),
    )(im2col, w1, b1, w2, b2)

    out = out.reshape(N, H, Wp, Cout)[:, :, :W, :]            # drop pad columns
    return jnp.transpose(out, (0, 3, 1, 2)).astype(jnp.float32)   # -> NCHW f32


# -------------------------- params + reference ------------------------------ #

def init_conv_block_params(key, ch_in, ch_out):
    ks = jax.random.split(key, 6)

    def bn(k):
        kg, kb, km, kv = jax.random.split(k, 4)
        return {
            "gamma": 1.0 + 0.1 * jax.random.normal(kg, (ch_out,), jnp.float32),
            "beta": 0.1 * jax.random.normal(kb, (ch_out,), jnp.float32),
            "mean": 0.1 * jax.random.normal(km, (ch_out,), jnp.float32),
            "var": jnp.abs(1.0 + 0.1 * jax.random.normal(kv, (ch_out,), jnp.float32)),
        }

    return {
        "w1": jax.random.normal(ks[0], (3, 3, ch_in, ch_out), jnp.float32) / jnp.sqrt(9.0 * ch_in),
        "b1": 0.05 * jax.random.normal(ks[1], (ch_out,), jnp.float32),
        "bn1": bn(ks[4]),
        "w2": jax.random.normal(ks[2], (3, 3, ch_out, ch_out), jnp.float32) / jnp.sqrt(9.0 * ch_out),
        "b2": 0.05 * jax.random.normal(ks[3], (ch_out,), jnp.float32),
        "bn2": bn(ks[5]),
    }


def conv_block_reference(params, x_nchw):
    # Pure-XLA reference with the same bf16 rounding points as the kernel.
    x = jnp.transpose(x_nchw, (0, 2, 3, 1)).astype(jnp.bfloat16).astype(jnp.float32)

    def cbr(h, w, conv_b, bn):
        scale = bn["gamma"] / jnp.sqrt(bn["var"] + BN_EPS)
        bias = bn["beta"] + scale * (conv_b - bn["mean"])
        wf = (w * scale).astype(jnp.bfloat16).astype(jnp.float32)
        y = jax.lax.conv_general_dilated(
            h, wf, window_strides=(1, 1), padding="SAME",
            dimension_numbers=("NHWC", "HWIO", "NHWC"))
        return jnp.maximum(y + bias, 0.0)

    y1 = cbr(x, params["w1"], params["b1"], params["bn1"])
    y1 = y1.astype(jnp.bfloat16).astype(jnp.float32)
    y2 = cbr(y1, params["w2"], params["b2"], params["bn2"])
    y2 = y2.astype(jnp.bfloat16).astype(jnp.float32)
    return jnp.transpose(y2, (0, 3, 1, 2))


# --------------------------------- main ------------------------------------- #

if __name__ == "__main__":
    N, ch_in, ch_out, H, W = 2, 4, 32, 16, 16

    kp, kx = jax.random.split(jax.random.PRNGKey(0))
    params = init_conv_block_params(kp, ch_in, ch_out)
    x = jax.random.normal(kx, (N, ch_in, H, W), jnp.float32)

    fwd = jax.jit(conv_block_forward)
    y = fwd(params, x)
    jax.block_until_ready(y)

    assert y.shape == (N, ch_out, H, W), y.shape
    assert y.dtype == jnp.float32

    y_ref = conv_block_reference(params, x)
    max_err = float(jnp.max(jnp.abs(y - y_ref)))
    assert max_err < 5e-2, max_err

    print("KERNEL_OK")
</pallas_src>

<mosaic_0001>
module attributes {stable_mosaic.version = 11 : i64} {
  func.func @_conv_block_kernel(%arg0: i32, %arg1: memref<1x512x36xbf16, #tpu.memory_space<vmem>>, %arg2: memref<36x32xbf16, #tpu.memory_space<vmem>>, %arg3: memref<1x32xf32, #tpu.memory_space<vmem>>, %arg4: memref<9x32x32xbf16, #tpu.memory_space<vmem>>, %arg5: memref<1x32xf32, #tpu.memory_space<vmem>>, %arg6: memref<1x512x32xbf16, #tpu.memory_space<vmem>>, %arg7: memref<640x32xbf16, #tpu.memory_space<vmem>>) attributes {dimension_semantics = [#tpu.dimension_semantics<parallel>], iteration_bounds = array<i64: 2>, scalar_prefetch = 0 : i64, scratch_operands = 1 : i64, tpu.core_type = #tpu.core_type<tc>, window_params = [{transform_indices = @transform_0, window_bounds = array<i64: 1, 512, 36>}, {pipeline_mode = #tpu.pipeline_mode<synchronous>, transform_indices = @transform_1, window_bounds = array<i64: 36, 32>}, {pipeline_mode = #tpu.pipeline_mode<synchronous>, transform_indices = @transform_2, window_bounds = array<i64: 1, 32>}, {pipeline_mode = #tpu.pipeline_mode<synchronous>, transform_indices = @transform_3, window_bounds = array<i64: 9, 32, 32>}, {pipeline_mode = #tpu.pipeline_mode<synchronous>, transform_indices = @transform_4, window_bounds = array<i64: 1, 32>}, {transform_indices = @transform_5, window_bounds = array<i64: 1, 512, 32>}]} {
    %c0 = arith.constant 0 : index
    %c0_0 = arith.constant 0 : index
    %c0_1 = arith.constant 0 : index
    %0 = vector.load %arg1[%c0, %c0_0, %c0_1] : memref<1x512x36xbf16, #tpu.memory_space<vmem>>, vector<1x512x36xbf16>
    %1 = vector.shape_cast %0 : vector<1x512x36xbf16> to vector<512x36xbf16>
    %c0_2 = arith.constant 0 : index
    %c0_3 = arith.constant 0 : index
    %2 = vector.load %arg2[%c0_2, %c0_3] : memref<36x32xbf16, #tpu.memory_space<vmem>>, vector<36x32xbf16>
    %cst = arith.constant dense<0.000000e+00> : vector<512x32xf32>
    %3 = tpu.matmul %1, %2, %cst {dimension_numbers = #tpu.dot_dimension_numbers<[1], [0], [0], [1], [0, 0, 1, 1], [], []>} : vector<512x36xbf16>, vector<36x32xbf16>, vector<512x32xf32> -> vector<512x32xf32>
    %c0_4 = arith.constant 0 : index
    %c0_5 = arith.constant 0 : index
    %4 = vector.load %arg3[%c0_4, %c0_5] : memref<1x32xf32, #tpu.memory_space<vmem>>, vector<1x32xf32>
    %5 = vector.broadcast %4 : vector<1x32xf32> to vector<512x32xf32>
    %6 = arith.addf %3, %5 : vector<512x32xf32>
    %cst_6 = arith.constant 0.000000e+00 : f32
    %7 = vector.broadcast %cst_6 : f32 to vector<512x32xf32>
    %8 = arith.maximumf %6, %7 : vector<512x32xf32>
    %9 = tpu.iota {dimensions = array<i32: 0>} : vector<512x1xi32>
    %c32_i32 = arith.constant 32 : i32
    %c0_i32 = arith.constant 0 : i32
    %10 = arith.cmpi eq, %c32_i32, %c0_i32 : i32
    %c1_i32 = arith.constant 1 : i32
    %11 = arith.select %10, %c1_i32, %c32_i32 : i32
    %12 = vector.broadcast %11 : i32 to vector<512x1xi32>
    %13 = arith.remsi %9, %12 : vector<512x1xi32>
    %c0_i32_7 = arith.constant 0 : i32
    %14 = vector.broadcast %c0_i32_7 : i32 to vector<512x1xi32>
    %15 = arith.cmpi ne, %13, %14 : vector<512x1xi32>
    %c0_i32_8 = arith.constant 0 : i32
    %16 = vector.broadcast %c0_i32_8 : i32 to vector<512x1xi32>
    %17 = arith.cmpi slt, %13, %16 : vector<512x1xi32>
    %c0_i32_9 = arith.constant 0 : i32
    %18 = arith.cmpi slt, %11, %c0_i32_9 : i32
    %19 = vector.broadcast %18 : i1 to vector<512x1xi1>
    %20 = vector.broadcast %19 : vector<512x1xi1> to vector<512x1xi1>
    %21 = arith.xori %17, %20 : vector<512x1xi1>
    %22 = arith.andi %21, %15 : vector<512x1xi1>
    %23 = vector.broadcast %11 : i32 to vector<512x1xi32>
    %24 = arith.addi %13, %23 : vector<512x1xi32>
    %25 = arith.select %22, %24, %13 : vector<512x1xi1>, vector<512x1xi32>
    %c16_i32 = arith.constant 16 : i32
    %26 = vector.broadcast %c16_i32 : i32 to vector<512x1xi32>
    %27 = arith.cmpi slt, %25, %26 : vector<512x1xi32>
    %cst_10 = arith.constant 0.000000e+00 : f32
    %28 = vector.shape_cast %27 : vector<512x1xi1> to vector<512x1xi1>
    %29 = vector.broadcast %28 : vector<512x1xi1> to vector<512x32xi1>
    %30 = vector.broadcast %cst_10 : f32 to vector<512x32xf32>
    %31 = arith.select %29, %8, %30 : vector<512x32xi1>, vector<512x32xf32>
    %cst_11 = arith.constant 0.000000e+00 : bf16
    %32 = vector.broadcast %cst_11 : bf16 to vector<64x32xbf16>
    %c0_12 = arith.constant 0 : index
    %c0_13 = arith.constant 0 : index
    %33 = vector.load %arg7[%c0_12, %c0_13] : memref<640x32xbf16, #tpu.memory_space<vmem>>, vector<64x32xbf16>
    tpu.vector_store %arg7[%c0_12, %c0_13], %32 {strides = array<i32>} : memref<640x32xbf16, #tpu.memory_space<vmem>>, vector<64x32xbf16>,
    %cst_14 = arith.constant 0.000000e+00 : bf16
    %34 = vector.broadcast %cst_14 : bf16 to vector<64x32xbf16>
    %c576 = arith.constant 576 : index
    %c0_15 = arith.constant 0 : index
    %35 = vector.load %arg7[%c576, %c0_15] : memref<640x32xbf16, #tpu.memory_space<vmem>>, vector<64x32xbf16>
    tpu.vector_store %arg7[%c576, %c0_15], %34 {strides = array<i32>} : memref<640x32xbf16, #tpu.memory_space<vmem>>, vector<64x32xbf16>,
    %36 = arith.truncf %31 : vector<512x32xf32> to vector<512x32xbf16>
    %c64 = arith.constant 64 : index
    %c0_16 = arith.constant 0 : index
    %37 = vector.load %arg7[%c64, %c0_16] : memref<640x32xbf16, #tpu.memory_space<vmem>>, vector<512x32xbf16>
    tpu.vector_store %arg7[%c64, %c0_16], %36 {strides = array<i32>} : memref<640x32xbf16, #tpu.memory_space<vmem>>, vector<512x32xbf16>,
    %c31 = arith.constant 31 : index
    %c0_17 = arith.constant 0 : index
    %38 = vector.load %arg7[%c31, %c0_17] : memref<640x32xbf16, #tpu.memory_space<vmem>>, vector<512x32xbf16>
    %c0_18 = arith.constant 0 : index
    %c0_19 = arith.constant 0 : index
    %c0_20 = arith.constant 0 : index
    %39 = vector.load %arg4[%c0_18, %c0_19, %c0_20] : memref<9x32x32xbf16, #tpu.memory_space<vmem>>, vector<1x32x32xbf16>
    %40 = vector.shape_cast %39 : vector<1x32x32xbf16> to vector<32x32xbf16>
    %cst_21 = arith.constant dense<0.000000e+00> : vector<512x32xf32>
    %41 = tpu.matmul %38, %40, %cst_21 {dimension_numbers = #tpu.dot_dimension_numbers<[1], [0], [0], [1], [0, 0, 1, 1], [], []>} : vector<512x32xbf16>, vector<32x32xbf16>, vector<512x32xf32> -> vector<512x32xf32>
    %c32 = arith.constant 32 : index
    %c0_22 = arith.constant 0 : index
    %42 = vector.load %arg7[%c32, %c0_22] : memref<640x32xbf16, #tpu.memory_space<vmem>>, vector<512x32xbf16>
    %c1 = arith.constant 1 : index
    %c0_23 = arith.constant 0 : index
    %c0_24 = arith.constant 0 : index
    %43 = vector.load %arg4[%c1, %c0_23, %c0_24] : memref<9x32x32xbf16, #tpu.memory_space<vmem>>, vector<1x32x32xbf16>
    %44 = vector.shape_cast %43 : vector<1x32x32xbf16> to vector<32x32xbf16>
    %cst_25 = arith.constant dense<0.000000e+00> : vector<512x32xf32>
    %45 = tpu.matmul %42, %44, %cst_25 {dimension_numbers = #tpu.dot_dimension_numbers<[1], [0], [0], [1], [0, 0, 1, 1], [], []>} : vector<512x32xbf16>, vector<32x32xbf16>, vector<512x32xf32> -> vector<512x32xf32>
    %46 = arith.addf %41, %45 : vector<512x32xf32>
    %c33 = arith.constant 33 : index
    %c0_26 = arith.constant 0 : index
    %47 = vector.load %arg7[%c33, %c0_26] : memref<640x32xbf16, #tpu.memory_space<vmem>>, vector<512x32xbf16>
    %c2 = arith.constant 2 : index
    %c0_27 = arith.constant 0 : index
    %c0_28 = arith.constant 0 : index
    %48 = vector.load %arg4[%c2, %c0_27, %c0_28] : memref<9x32x32xbf16, #tpu.memory_space<vmem>>, vector<1x32x32xbf16>
    %49 = vector.shape_cast %48 : vector<1x32x32xbf16> to vector<32x32xbf16>
    %cst_29 = arith.constant dense<0.000000e+00> : vector<512x32xf32>
    %50 = tpu.matmul %47, %49, %cst_29 {dimension_numbers = #tpu.dot_dimension_numbers<[1], [0], [0], [1], [0, 0, 1, 1], [], []>} : vector<512x32xbf16>, vector<32x32xbf16>, vector<512x32xf32> -> vector<512x32xf32>
    %51 = arith.addf %46, %50 : vector<512x32xf32>
    %c63 = arith.constant 63 : index
    %c0_30 = arith.constant 0 : index
    %52 = vector.load %arg7[%c63, %c0_30] : memref<640x32xbf16, #tpu.memory_space<vmem>>, vector<512x32xbf16>
    %c3 = arith.constant 3 : index
    %c0_31 = arith.constant 0 : index
    %c0_32 = arith.constant 0 : index
    %53 = vector.load %arg4[%c3, %c0_31, %c0_32] : memref<9x32x32xbf16, #tpu.memory_space<vmem>>, vector<1x32x32xbf16>
    %54 = vector.shape_cast %53 : vector<1x32x32xbf16> to vector<32x32xbf16>
    %cst_33 = arith.constant dense<0.000000e+00> : vector<512x32xf32>
    %55 = tpu.matmul %52, %54, %cst_33 {dimension_numbers = #tpu.dot_dimension_numbers<[1], [0], [0], [1], [0, 0, 1, 1], [], []>} : vector<512x32xbf16>, vector<32x32xbf16>, vector<512x32xf32> -> vector<512x32xf32>
    %56 = arith.addf %51, %55 : vector<512x32xf32>
    %c64_34 = arith.constant 64 : index
    %c0_35 = arith.constant 0 : index
    %57 = vector.load %arg7[%c64_34, %c0_35] : memref<640x32xbf16, #tpu.memory_space<vmem>>, vector<512x32xbf16>
    %c4 = arith.constant 4 : index
    %c0_36 = arith.constant 0 : index
    %c0_37 = arith.constant 0 : index
    %58 = vector.load %arg4[%c4, %c0_36, %c0_37] : memref<9x32x32xbf16, #tpu.memory_space<vmem>>, vector<1x32x32xbf16>
    %59 = vector.shape_cast %58 : vector<1x32x32xbf16> to vector<32x32xbf16>
    %cst_38 = arith.constant dense<0.000000e+00> : vector<512x32xf32>
    %60 = tpu.matmul %57, %59, %cst_38 {dimension_numbers = #tpu.dot_dimension_numbers<[1], [0], [0], [1], [0, 0, 1, 1], [], []>} : vector<512x32xbf16>, vector<32x32xbf16>, vector<512x32xf32> -> vector<512x32xf32>
    %61 = arith.addf %56, %60 : vector<512x32xf32>
    %c65 = arith.constant 65 : index
    %c0_39 = arith.constant 0 : index
    %62 = vector.load %arg7[%c65, %c0_39] : memref<640x32xbf16, #tpu.memory_space<vmem>>, vector<512x32xbf16>
    %c5 = arith.constant 5 : index
    %c0_40 = arith.constant 0 : index
    %c0_41 = arith.constant 0 : index
    %63 = vector.load %arg4[%c5, %c0_40, %c0_41] : memref<9x32x32xbf16, #tpu.memory_space<vmem>>, vector<1x32x32xbf16>
    %64 = vector.shape_cast %63 : vector<1x32x32xbf16> to vector<32x32xbf16>
    %cst_42 = arith.constant dense<0.000000e+00> : vector<512x32xf32>
    %65 = tpu.matmul %62, %64, %cst_42 {dimension_numbers = #tpu.dot_dimension_numbers<[1], [0], [0], [1], [0, 0, 1, 1], [], []>} : vector<512x32xbf16>, vector<32x32xbf16>, vector<512x32xf32> -> vector<512x32xf32>
    %66 = arith.addf %61, %65 : vector<512x32xf32>
    %c95 = arith.constant 95 : index
    %c0_43 = arith.constant 0 : index
    %67 = vector.load %arg7[%c95, %c0_43] : memref<640x32xbf16, #tpu.memory_space<vmem>>, vector<512x32xbf16>
    %c6 = arith.constant 6 : index
    %c0_44 = arith.constant 0 : index
    %c0_45 = arith.constant 0 : index
    %68 = vector.load %arg4[%c6, %c0_44, %c0_45] : memref<9x32x32xbf16, #tpu.memory_space<vmem>>, vector<1x32x32xbf16>
    %69 = vector.shape_cast %68 : vector<1x32x32xbf16> to vector<32x32xbf16>
    %cst_46 = arith.constant dense<0.000000e+00> : vector<512x32xf32>
    %70 = tpu.matmul %67, %69, %cst_46 {dimension_numbers = #tpu.dot_dimension_numbers<[1], [0], [0], [1], [0, 0, 1, 1], [], []>} : vector<512x32xbf16>, vector<32x32xbf16>, vector<512x32xf32> -> vector<512x32xf32>
    %71 = arith.addf %66, %70 : vector<512x32xf32>
    %c96 = arith.constant 96 : index
    %c0_47 = arith.constant 0 : index
    %72 = vector.load %arg7[%c96, %c0_47] : memref<640x32xbf16, #tpu.memory_space<vmem>>, vector<512x32xbf16>
    %c7 = arith.constant 7 : index
    %c0_48 = arith.constant 0 : index
    %c0_49 = arith.constant 0 : index
    %73 = vector.load %arg4[%c7, %c0_48, %c0_49] : memref<9x32x32xbf16, #tpu.memory_space<vmem>>, vector<1x32x32xbf16>
    %74 = vector.shape_cast %73 : vector<1x32x32xbf16> to vector<32x32xbf16>
    %cst_50 = arith.constant dense<0.000000e+00> : vector<512x32xf32>
    %75 = tpu.matmul %72, %74, %cst_50 {dimension_numbers = #tpu.dot_dimension_numbers<[1], [0], [0], [1], [0, 0, 1, 1], [], []>} : vector<512x32xbf16>, vector<32x32xbf16>, vector<512x32xf32> -> vector<512x32xf32>
    %76 = arith.addf %71, %75 : vector<512x32xf32>
    %c97 = arith.constant 97 : index
    %c0_51 = arith.constant 0 : index
    %77 = vector.load %arg7[%c97, %c0_51] : memref<640x32xbf16, #tpu.memory_space<vmem>>, vector<512x32xbf16>
    %c8 = arith.constant 8 : index
    %c0_52 = arith.constant 0 : index
    %c0_53 = arith.constant 0 : index
    %78 = vector.load %arg4[%c8, %c0_52, %c0_53] : memref<9x32x32xbf16, #tpu.memory_space<vmem>>, vector<1x32x32xbf16>
    %79 = vector.shape_cast %78 : vector<1x32x32xbf16> to vector<32x32xbf16>
    %cst_54 = arith.constant dense<0.000000e+00> : vector<512x32xf32>
    %80 = tpu.matmul %77, %79, %cst_54 {dimension_numbers = #tpu.dot_dimension_numbers<[1], [0], [0], [1], [0, 0, 1, 1], [], []>} : vector<512x32xbf16>, vector<32x32xbf16>, vector<512x32xf32> -> vector<512x32xf32>
    %81 = arith.addf %76, %80 : vector<512x32xf32>
    %c0_55 = arith.constant 0 : index
    %c0_56 = arith.constant 0 : index
    %82 = vector.load %arg5[%c0_55, %c0_56] : memref<1x32xf32, #tpu.memory_space<vmem>>, vector<1x32xf32>
    %83 = vector.broadcast %82 : vector<1x32xf32> to vector<512x32xf32>
    %84 = arith.addf %81, %83 : vector<512x32xf32>
    %cst_57 = arith.constant 0.000000e+00 : f32
    %85 = vector.broadcast %cst_57 : f32 to vector<512x32xf32>
    %86 = arith.maximumf %84, %85 : vector<512x32xf32>
    %87 = arith.truncf %86 : vector<512x32xf32> to vector<512x32xbf16>
    %c0_58 = arith.constant 0 : index
    %c0_59 = arith.constant 0 : index
    %c0_60 = arith.constant 0 : index
    %88 = vector.load %arg6[%c0_58, %c0_59, %c0_60] : memref<1x512x32xbf16, #tpu.memory_space<vmem>>, vector<1x512x32xbf16>
    %89 = vector.shape_cast %88 : vector<1x512x32xbf16> to vector<512x32xbf16>
    %90 = vector.shape_cast %87 : vector<512x32xbf16> to vector<1x512x32xbf16>
    tpu.vector_store %arg6[%c0_58, %c0_59, %c0_60], %90 {strides = array<i32>} : memref<1x512x32xbf16, #tpu.memory_space<vmem>>, vector<1x512x32xbf16>,
    return
  }
  func.func @transform_0(%arg0: i32) -> (i32, i32, i32) {
    %c0_i32 = arith.constant 0 : i32
    %c0_i32_0 = arith.constant 0 : i32
    %c0_i32_1 = arith.constant 0 : i32
    return %arg0, %c0_i32, %c0_i32_0 : i32, i32, i32
  }
  func.func @transform_1(%arg0: i32) -> (i32, i32) {
    %c0_i32 = arith.constant 0 : i32
    %c0_i32_0 = arith.constant 0 : i32
    %c0_i32_1 = arith.constant 0 : i32
    return %c0_i32, %c0_i32_0 : i32, i32
  }
  func.func @transform_2(%arg0: i32) -> (i32, i32) {
    %c0_i32 = arith.constant 0 : i32
    %c0_i32_0 = arith.constant 0 : i32
    %c0_i32_1 = arith.constant 0 : i32
    return %c0_i32, %c0_i32_0 : i32, i32
  }
  func.func @transform_3(%arg0: i32) -> (i32, i32, i32) {
    %c0_i32 = arith.constant 0 : i32
    %c0_i32_0 = arith.constant 0 : i32
    %c0_i32_1 = arith.constant 0 : i32
    %c0_i32_2 = arith.constant 0 : i32
    return %c0_i32, %c0_i32_0, %c0_i32_1 : i32, i32, i32
  }
  func.func @transform_4(%arg0: i32) -> (i32, i32) {
    %c0_i32 = arith.constant 0 : i32
    %c0_i32_0 = arith.constant 0 : i32
    %c0_i32_1 = arith.constant 0 : i32
    return %c0_i32, %c0_i32_0 : i32, i32
  }
  func.func @transform_5(%arg0: i32) -> (i32, i32, i32) {
    %c0_i32 = arith.constant 0 : i32
    %c0_i32_0 = arith.constant 0 : i32
    %c0_i32_1 = arith.constant 0 : i32
    return %arg0, %c0_i32, %c0_i32_0 : i32, i32, i32
  }
}

</mosaic_0001>

<bundles_post_ra>
// kernel: conv_block_forward.1
= control target key start
LH: loop header
LB: loop body
LE: loop exit
PB: predicated region body
PF: predicated region fallthrough
CT: control target
= control target key end

     0   :  { %s10788_s18 = smov 0   ;;  %s12742_s0 = inlined_call_operand.vmem [shape: bf16[2,512,36], index: 0, kind: input, shape index: {}]   ;;  %s12743_s1 = inlined_call_operand.vmem [shape: bf16[36,32], index: 1, kind: input, shape index: {}]   ;;  %s12744_s2 = inlined_call_operand.vmem [shape: f32[1,32], index: 2, kind: input, shape index: {}]   ;;  %s12745_s3 = inlined_call_operand.vmem [shape: bf16[9,32,32], index: 3, kind: input, shape index: {}]   ;;  %s12746_s4 = inlined_call_operand.vmem [shape: f32[1,32], index: 4, kind: input, shape index: {}]   ;;  %s12747_s5 = inlined_call_operand.vmem [shape: bf16[2,512,32], index: 5, kind: output, shape index: {}]  }
   0x1 LB: > { %s8477_s19 = sadd.s32 4294967295, %s10754_s18   ;;  %p8481_p0 = scmp.ge.s32.totalorder %s10754_s18, 1  ;;  %s10754_s18 = sphi %s10788_s18, %s15_s18  }
   0x2   : > { %p187_p1 = scmp.lt.s32.totalorder %s10754_s18, 3 }
   0x4   : > { %p188_p2 = pnand %p8481_p0, %p187_p1 }
   0x6   : > { %191 = sbr.rel (%p188_p2) target bundleno = 1828 (0x724), region = 40 }
   0xb   : > { %v294_v0 = vld [vmem:[%s12743_s1 + $0x10] sm:$0x3]  ;;  %p215_p3 = scmp.lt.s32.totalorder %s8477_s19, 1  ;;  %vm571_vm0 = vcmask 1041408   ;;  %v9467_v4 = vld [vmem:[%s12743_s1 + $0x8] sm:$0xff]  ;;  %v9466_v5 = vld [vmem:[%s12743_s1] sm:$0xff] }
   0xc   : > { %v468_v1 = vunpack.c.l.b16 %v294_v0  ;;  %vm474_vm1 = vcmask 293888   ;;  %v9471_v11 = vld [vmem:[%s12745_s3 + $0x18] sm:$0xff]  ;;  %vm1897_vm2 = vcmask 257024   ;;  %v9470_v13 = vld [vmem:[%s12745_s3 + $0x10] sm:$0xff]  ;;  %v10756_v14 = vmov 0  }
   0xd   : > { %s13069_s19 = smov (!%p215_p3, %s8477_s19), 1  ;;  %2391 = vmatpush.bf16.msra.mxu1 %v9471_v11  ;;  %10602 = vmatpush.bf16.msra.mxu3 %v9471_v11  ;;  %1902 = vst.msk [vmem:[#allocation2 + $0x10] sm:$0xf] %vm1897_vm2, %v10756_v14  ;;  %vm2288_vm3 = vcmask 261120   ;;  %v10757_v19 = vmov 0.0|0.0  }
   0xe   : > { %v471_v2 = vpack.c.b16 %v468_v1, %v468_v1  ;;  %s9432_s24 = sshll.u32 %s13069_s19, 8  ;;  %1903 = vst.msk [vmem:[#allocation2 + $0x14] sm:$0xf] %vm1897_vm2, %v10756_v14  ;;  %v10866_v20 = vld [vmem:[%s12744_s2] ss:$0 sm:$0xff] }
   0xf   : > { %s10813_s29 = scalar_lea.vmem %s12742_s0, %s9432_s24  ;;  %1901 = vst.msk [vmem:[#allocation2 + $0xc] sm:$0xf] %vm1897_vm2, %v10756_v14  ;;  %vm2589_vm4 = vsmask.f32 4352  ;;  %vm3396_vm5 = vsmask.f32 7424 }
  0x10   : > { %v573_v3 = vsel %vm571_vm0, %v471_v2, 0  ;;  %v9434_v6 = vld [vmem:[%s10813_s29] sm:$0xff]  ;;  %v9435_v7 = vld [vmem:[%s10813_s29 + $0x8] sm:$0xff]  ;;  %v9436_v8 = vld [vmem:[%s10813_s29 + $0x10] sm:$0xff]  ;;  %1904 = vst.msk [vmem:[#allocation2 + $0x18] sm:$0xf] %vm1897_vm2, %v10756_v14 }
  0x11   : > { %580 = vmatpush.bf16.msra.mxu0 %v573_v3  ;;  %v9437_v9 = vld [vmem:[%s10813_s29 + $0x18] sm:$0xff]  ;;  %v9438_v10 = vld [vmem:[%s10813_s29 + $0x20] sm:$0xff]  ;;  %v9439_v12 = vld [vmem:[%s10813_s29 + $0x28] sm:$0xff]  ;;  %2392 = vmatpush.bf16.msra.mxu1 %v9470_v13  ;;  %1905 = vst.msk [vmem:[#allocation2 + $0x1c] sm:$0xf] %vm1897_vm2, %v10756_v14 }
  0x12   : > { %10603 = vmatpush.bf16.msra.mxu3 %v9470_v13  ;;  %1906 = vst.msk [vmem:[#allocation2 + $0x120] sm:$0xf] %vm1897_vm2, %v10756_v14  ;;  %v9440_v16 = vld [vmem:[%s10813_s29 + $0x30] sm:$0xff]  ;;  %v9441_v18 = vld [vmem:[%s10813_s29 + $0x38] sm:$0xff]  ;;  %v9442_v21 = vld [vmem:[%s10813_s29 + $0x40] sm:$0xff] }
  0x13   : > { %1907 = vst.msk [vmem:[#allocation2 + $0x124] sm:$0xf] %vm1897_vm2, %v10756_v14  ;;  %v9443_v30 = vld [vmem:[%s10813_s29 + $0x48] sm:$0xff]  ;;  %v9444_v34 = vld [vmem:[%s10813_s29 + $0x50] sm:$0xff]  ;;  %v9445_v44 = vld [vmem:[%s10813_s29 + $0x58] sm:$0xff] }
  0x14   : > { %1908 = vst.msk [vmem:[#allocation2 + $0x128] sm:$0xf] %vm1897_vm2, %v10756_v14  ;;  %v9446_v48 = vld [vmem:[%s10813_s29 + $0x60] sm:$0xff]  ;;  %v9447_v58 = vld [vmem:[%s10813_s29 + $0x68] sm:$0xff]  ;;  %v9448_v62 = vld [vmem:[%s10813_s29 + $0x70] sm:$0xff] }
  0x15   : > { %581 = vmatpush.bf16.msra.mxu0 %v9467_v4  ;;  %v9966_v15 = vld [vmem:[#allocation2 + $0x10] sm:$0xff]   ;;  %1909 = vst.msk [vmem:[#allocation2 + $0x12c] sm:$0xf] %vm1897_vm2, %v10756_v14 }
  0x16   : > { %8666 = vmatmul.msk.bf16.vlgmr.msra.gmra.mxu1 %vm2288_vm3, %v9966_v15  ;;  %1910 = vst.msk [vmem:[#allocation2 + $0x130] sm:$0xf] %vm1897_vm2, %v10756_v14  ;;  %v9450_v14 = vld [vmem:[%s10813_s29 + $0x80] sm:$0xff] }
  0x17   : > { %1980 = vst.msk [vmem:[#allocation2 + $0x28] sm:$0xf] %vm1897_vm2, %v10757_v19 }
  0x18   : > { %v9967_v17 = vld [vmem:[#allocation2 + $0x18] sm:$0xff]   ;;  %1981 = vst.msk [vmem:[#allocation2 + $0x2c] sm:$0xf] %vm1897_vm2, %v10757_v19 }
  0x19   : > { %582 = vmatpush.bf16.msra.mxu0 %v9466_v5  ;;  %1984 = vst.msk [vmem:[#allocation2 + $0x38] sm:$0xf] %vm1897_vm2, %v10757_v19 }
  0x1a   : > { %1985 = vst.msk [vmem:[#allocation2 + $0x3c] sm:$0xf] %vm1897_vm2, %v10757_v19 }
  0x1b   : > { %1988 = vst.msk [vmem:[#allocation2 + $0x48] sm:$0xf] %vm1897_vm2, %v10757_v19 }
  0x1c   : > { %8622 = vmatmul.msk.bf16.vlgmr.msra.gmra.mxu0 %vm474_vm1, %v9434_v6  ;;  %1989 = vst.msk [vmem:[#allocation2 + $0x4c] sm:$0xf] %vm1897_vm2, %v10757_v19 }
  0x1d   : > { %1992 = vst.msk [vmem:[#allocation2 + $0x58] sm:$0xf] %vm1897_vm2, %v10757_v19 }
  0x1e   : > { %1993 = vst.msk [vmem:[#allocation2 + $0x5c] sm:$0xf] %vm1897_vm2, %v10757_v19 }
  0x1f   : > { %1996 = vst.msk [vmem:[#allocation2 + $0x68] sm:$0xf] %vm1897_vm2, %v10757_v19  ;;  %v9969_v38 = vld [vmem:[#allocation2 + $0x28] sm:$0xff]  }
  0x20   : > { %1997 = vst.msk [vmem:[#allocation2 + $0x6c] sm:$0xf] %vm1897_vm2, %v10757_v19 }
  0x21   : > { %2000 = vst.msk [vmem:[#allocation2 + $0x78] sm:$0xf] %vm1897_vm2, %v10757_v19  ;;  %v9971_v52 = vld [vmem:[#allocation2 + $0x38] sm:$0xff]  }
  0x22   : > { %2001 = vst.msk [vmem:[#allocation2 + $0x7c] sm:$0xf] %vm1897_vm2, %v10757_v19 }
  0x23   : > { %2004 = vst.msk [vmem:[#allocation2 + $0x88] sm:$0xf] %vm1897_vm2, %v10757_v19  ;;  %v9973_v2 = vld [vmem:[#allocation2 + $0x48] sm:$0xff]  }
  0x24   : > { %2005 = vst.msk [vmem:[#allocation2 + $0x8c] sm:$0xf] %vm1897_vm2, %v10757_v19 }
  0x25   : > { %2008 = vst.msk [vmem:[#allocation2 + $0x98] sm:$0xf] %vm1897_vm2, %v10757_v19 }
  0x26   : > { %8667 = vmatmul.msk.bf16.gmra.mxu1 %vm2288_vm3, %v9967_v17  ;;  %2009 = vst.msk [vmem:[#allocation2 + $0x9c] sm:$0xf] %vm1897_vm2, %v10757_v19 }
  0x27   : > { %2012 = vst.msk [vmem:[#allocation2 + $0xa8] sm:$0xf] %vm1897_vm2, %v10757_v19 }
  0x28   : > { %2013 = vst.msk [vmem:[#allocation2 + $0xac] sm:$0xf] %vm1897_vm2, %v10757_v19 }
  0x29   : > { %2016 = vst.msk [vmem:[#allocation2 + $0xb8] sm:$0xf] %vm1897_vm2, %v10757_v19 }
  0x2a   : > { %2017 = vst.msk [vmem:[#allocation2 + $0xbc] sm:$0xf] %vm1897_vm2, %v10757_v19 }
  0x2b   : > { %2020 = vst.msk [vmem:[#allocation2 + $0xc8] sm:$0xf] %vm1897_vm2, %v10757_v19 }
  0x2c   : > { %8623 = vmatmul.msk.bf16.gmra.mxu0 %vm474_vm1, %v9435_v7  ;;  %2021 = vst.msk [vmem:[#allocation2 + $0xcc] sm:$0xf] %vm1897_vm2, %v10757_v19 }
  0x2d   : > { %2024 = vst.msk [vmem:[#allocation2 + $0xd8] sm:$0xf] %vm1897_vm2, %v10757_v19 }
  0x2e   : > { %2025 = vst.msk [vmem:[#allocation2 + $0xdc] sm:$0xf] %vm1897_vm2, %v10757_v19 }
  0x2f   : > { %2028 = vst.msk [vmem:[#allocation2 + $0xe8] sm:$0xf] %vm1897_vm2, %v10757_v19 }
  0x30   : > { %2029 = vst.msk [vmem:[#allocation2 + $0xec] sm:$0xf] %vm1897_vm2, %v10757_v19 }
  0x31   : > { %2032 = vst.msk [vmem:[#allocation2 + $0xf8] sm:$0xf] %vm1897_vm2, %v10757_v19 }
  0x32   : > { %2033 = vst.msk [vmem:[#allocation2 + $0xfc] sm:$0xf] %vm1897_vm2, %v10757_v19 }
  0x33   : > { %2036 = vst.msk [vmem:[#allocation2 + $0x108] sm:$0xf] %vm1897_vm2, %v10757_v19 }
  0x34   : > { %2037 = vst.msk [vmem:[#allocation2 + $0x10c] sm:$0xf] %vm1897_vm2, %v10757_v19 }
  0x35   : > { %2040 = vst.msk [vmem:[#allocation2 + $0x118] sm:$0xf] %vm1897_vm2, %v10757_v19 }
  0x36   : > { %2041 = vst.msk [vmem:[#allocation2 + $0x11c] sm:$0xf] %vm1897_vm2, %v10757_v19  ;;  %v9975_v19 = vld [vmem:[#allocation2 + $0x58] sm:$0xff]  }
  0x3c   : > { %8624 = vmatmul.msk.bf16.gmra.mxu0 %vm474_vm1, %v9436_v8 }
  0x4c   : > { %8625 = vmatmul.msk.bf16.gmra.mxu0 %vm474_vm1, %v9437_v9  ;;  %v9449_v9 = vld [vmem:[%s10813_s29 + $0x78] sm:$0xff] }
  0x5c   : > { %8626 = vmatmul.msk.bf16.gmra.mxu0 %vm474_vm1, %v9438_v10 }
  0x6c   : > { %8627 = vmatmul.msk.bf16.gmra.mxu0 %vm474_vm1, %v9439_v12 }
  0x7c   : > { %8628 = vmatmul.msk.bf16.gmra.mxu0 %vm474_vm1, %v9440_v16 }
  0x8c   : > { %8629 = vmatmul.msk.bf16.gmra.mxu0 %vm474_vm1, %v9441_v18 }
  0x93   : > { %v10921_v7 = vpop.f32.mrf.mxu1 }
  0x99   : > { %v584_v22 = vpop.f32.mrf.mxu0 }
  0x9a   : > { %v585_v23 = vadd.f32 %v10866_v20, %v584_v22 }
  0x9b   : > { %v10926_v12 = vpop.f32.mrf.mxu1 }
  0x9c   : > { %v744_v24 = vmax.f32 %v585_v23, 0.0  ;;  %8630 = vmatmul.msk.bf16.gmra.mxu0 %vm474_vm1, %v9442_v21 }
  0x9e   : > { %v1914_v25 = vpack.c.bf16 %v744_v24, %v744_v24 }
  0xa0   : > { %1978 = vst.msk [vmem:[#allocation2 + $0x20] sm:$0xf] %vm1897_vm2, %v1914_v25 }
  0xa1   : > { %v586_v26 = vpop.f32.mrf.mxu0 }
  0xa2   : > { %v587_v27 = vadd.f32 %v10866_v20, %v586_v26 }
  0xa3   : > { %v10930_v16 = vpop.f32.mrf.mxu1 }
  0xa4   : > { %v745_v28 = vmax.f32 %v587_v27, 0.0  ;;  %v9451_v27 = vld [vmem:[%s10813_s29 + $0x88] sm:$0xff] }
  0xa6   : > { %v1915_v29 = vpack.c.bf16 %v745_v28, %v745_v28 }
  0xa8   : > { %1979 = vst.msk [vmem:[#allocation2 + $0x24] sm:$0xf] %vm1897_vm2, %v1915_v29 }
  0xa9   : > { %v589_v31 = vpop.f32.mrf.mxu0 }
  0xab   : > { %v10937_v24 = vpop.f32.mrf.mxu1 }
  0xac   : > { %8631 = vmatmul.msk.bf16.gmra.mxu0 %vm474_vm1, %v9443_v30 }
  0xaf   : > { %v9968_v32 = vld [vmem:[#allocation2 + $0x20] sm:$0xff]  }
  0xb0   : > { %8668 = vmatmul.msk.bf16.gmra.mxu1 %vm2288_vm3, %v9968_v32 }
  0xb1   : > { %v591_v33 = vpop.f32.mrf.mxu0 }
  0xb2   : > { %v9452_v33 = vld [vmem:[%s10813_s29 + $0x90] sm:$0xff] }
  0xb9   : > { %v594_v35 = vpop.f32.mrf.mxu0 }
  0xba   : > { %v595_v36 = vadd.f32 %v10866_v20, %v594_v35 }
  0xbc   : > { %v748_v37 = vmax.f32 %v595_v36, 0.0  ;;  %8632 = vmatmul.msk.bf16.gmra.mxu0 %vm474_vm1, %v9444_v34 }
  0xbe   : > { %v1918_v39 = vpack.c.bf16 %v748_v37, %v748_v37 }
  0xc0   : > { %1982 = vst.msk [vmem:[#allocation2 + $0x30] sm:$0xf] %vm1897_vm2, %v1918_v39  ;;  %8669 = vmatmul.msk.bf16.gmra.mxu1 %vm2288_vm3, %v9969_v38  ;;  %v9977_v38 = vld [vmem:[#allocation2 + $0x68] sm:$0xff]  }
  0xc1   : > { %v596_v40 = vpop.f32.mrf.mxu0 }
  0xc2   : > { %v597_v41 = vadd.f32 %v10866_v20, %v596_v40 }
  0xc4   : > { %v749_v42 = vmax.f32 %v597_v41, 0.0 }
  0xc6   : > { %v1919_v43 = vpack.c.bf16 %v749_v42, %v749_v42 }
  0xc8   : > { %1983 = vst.msk [vmem:[#allocation2 + $0x34] sm:$0xf] %vm1897_vm2, %v1919_v43 }
  0xc9   : > { %v599_v45 = vpop.f32.mrf.mxu0 }
  0xca   : > { %v9453_v45 = vld [vmem:[%s10813_s29 + $0x98] sm:$0xff] }
  0xcc   : > { %8633 = vmatmul.msk.bf16.gmra.mxu0 %vm474_vm1, %v9445_v44 }
  0xcf   : > { %v9970_v46 = vld [vmem:[#allocation2 + $0x30] sm:$0xff]  }
  0xd0   : > { %8670 = vmatmul.msk.bf16.gmra.mxu1 %vm2288_vm3, %v9970_v46 }
  0xd1   : > { %v601_v47 = vpop.f32.mrf.mxu0 }
  0xd9   : > { %v604_v49 = vpop.f32.mrf.mxu0 }
  0xda   : > { %v605_v50 = vadd.f32 %v10866_v20, %v604_v49 }
  0xdc   : > { %v752_v51 = vmax.f32 %v605_v50, 0.0  ;;  %8634 = vmatmul.msk.bf16.gmra.mxu0 %vm474_vm1, %v9446_v48 }
  0xde   : > { %v1922_v53 = vpack.c.bf16 %v752_v51, %v752_v51  ;;  %v9454_v51 = vld [vmem:[%s10813_s29 + $0xa0] sm:$0xff] }
  0xe0   : > { %1986 = vst.msk [vmem:[#allocation2 + $0x40] sm:$0xf] %vm1897_vm2, %v1922_v53  ;;  %8671 = vmatmul.msk.bf16.gmra.mxu1 %vm2288_vm3, %v9971_v52 }
  0xe1   : > { %v606_v54 = vpop.f32.mrf.mxu0 }
  0xe2   : > { %v607_v55 = vadd.f32 %v10866_v20, %v606_v54 }
  0xe4   : > { %v753_v56 = vmax.f32 %v607_v55, 0.0 }
  0xe6   : > { %v1923_v57 = vpack.c.bf16 %v753_v56, %v753_v56  ;;  %v9979_v56 = vld [vmem:[#allocation2 + $0x78] sm:$0xff]  }
  0xe8   : > { %1987 = vst.msk [vmem:[#allocation2 + $0x44] sm:$0xf] %vm1897_vm2, %v1923_v57 }
  0xe9   : > { %v609_v59 = vpop.f32.mrf.mxu0 }
  0xec   : > { %8635 = vmatmul.msk.bf16.gmra.mxu0 %vm474_vm1, %v9447_v58 }
  0xef   : > { %v9972_v60 = vld [vmem:[#allocation2 + $0x40] sm:$0xff]  }
  0xf0   : > { %8672 = vmatmul.msk.bf16.gmra.mxu1 %vm2288_vm3, %v9972_v60 }
  0xf1   : > { %v611_v61 = vpop.f32.mrf.mxu0 }
  0xf9   : > { %v614_v63 = vpop.f32.mrf.mxu0 }
  0xfa   : > { %v615_v0 = vadd.f32 %v10866_v20, %v614_v63  ;;  %v9469_v63 = vld [vmem:[%s12745_s3 + $0x8] sm:$0xff] }
  0xfb   : > { %10604 = vmatpush.bf16.msra.mxu2 %v9469_v63  ;;  %3000 = vmatpush.bf16.msrb.mxu0 %v9469_v63 }
  0xfc   : > { %v756_v1 = vmax.f32 %v615_v0, 0.0  ;;  %8636 = vmatmul.msk.bf16.gmra.mxu0 %vm474_vm1, %v9448_v62  ;;  %v9455_v0 = vld [vmem:[%s10813_s29 + $0xa8] sm:$0xff] }
  0xfe   : > { %v1926_v3 = vpack.c.bf16 %v756_v1, %v756_v1 }
 0x100   : > { %1990 = vst.msk [vmem:[#allocation2 + $0x50] sm:$0xf] %vm1897_vm2, %v1926_v3  ;;  %8673 = vmatmul.msk.bf16.gmra.mxu1 %vm2288_vm3, %v9973_v2  ;;  %v9468_v2 = vld [vmem:[%s12745_s3] sm:$0xff] }
 0x101   : > { %v616_v4 = vpop.f32.mrf.mxu0  ;;  %10605 = vmatpush.bf16.msra.mxu2 %v9468_v2  ;;  %3001 = vmatpush.bf16.msrb.mxu0 %v9468_v2 }
 0x102   : > { %v617_v5 = vadd.f32 %v10866_v20, %v616_v4 }
 0x104   : > { %v757_v6 = vmax.f32 %v617_v5, 0.0 }
 0x106   : > { %v1927_v8 = vpack.c.bf16 %v757_v6, %v757_v6  ;;  %v9509_v6 = vld [vmem:[%s12745_s3 + $0x48] sm:$0xff] }
 0x107   : > { %5019 = vmatpush.bf16.msrb.mxu2 %v9509_v6 }
 0x108   : > { %1991 = vst.msk [vmem:[#allocation2 + $0x54] sm:$0xf] %vm1897_vm2, %v1927_v8 }
 0x109   : > { %v619_v10 = vpop.f32.mrf.mxu0 }
 0x10a   : > { %v9456_v10 = vld [vmem:[%s10813_s29 + $0xb0] sm:$0xff] }
 0x10c   : > { %8637 = vmatmul.msk.bf16.gmra.mxu0 %vm474_vm1, %v9449_v9  ;;  %v9507_v9 = vld [vmem:[%s12745_s3 + $0x38] sm:$0xff] }
 0x10d   : > { %4641 = vmatpush.bf16.msrb.mxu1 %v9507_v9 }
 0x10f   : > { %v9974_v11 = vld [vmem:[#allocation2 + $0x50] sm:$0xff]  }
 0x110   : > { %8674 = vmatmul.msk.bf16.gmra.mxu1 %vm2288_vm3, %v9974_v11 }
 0x111   : > { %v621_v13 = vpop.f32.mrf.mxu0 }
 0x119   : > { %v624_v15 = vpop.f32.mrf.mxu0 }
 0x11a   : > { %v625_v17 = vadd.f32 %v10866_v20, %v624_v15 }
 0x11c   : > { %v760_v18 = vmax.f32 %v625_v17, 0.0  ;;  %8638 = vmatmul.msk.bf16.gmra.mxu0 %vm474_vm1, %v9450_v14  ;;  %v9506_v14 = vld [vmem:[%s12745_s3 + $0x30] sm:$0xff] }
 0x11d   : > { %4642 = vmatpush.bf16.msrb.mxu1 %v9506_v14 }
 0x11e   : > { %v1930_v21 = vpack.c.bf16 %v760_v18, %v760_v18  ;;  %v9981_v18 = vld [vmem:[#allocation2 + $0x88] sm:$0xff]  }
 0x120   : > { %1994 = vst.msk [vmem:[#allocation2 + $0x60] sm:$0xf] %vm1897_vm2, %v1930_v21  ;;  %8675 = vmatmul.msk.bf16.gmra.mxu1 %vm2288_vm3, %v9975_v19  ;;  %v9983_v21 = vld [vmem:[#allocation2 + $0x98] sm:$0xff]  }
 0x121   : > { %v626_v22 = vpop.f32.mrf.mxu0  ;;  %8683 = vmatmul.msk.bf16.vlgmr.msra.gmra.mxu3 %vm2288_vm3, %v9983_v21 }
 0x122   : > { %v627_v23 = vadd.f32 %v10866_v20, %v626_v22 }
 0x124   : > { %v761_v25 = vmax.f32 %v627_v23, 0.0 }
 0x126   : > { %v1931_v26 = vpack.c.bf16 %v761_v25, %v761_v25 }
 0x128   : > { %1995 = vst.msk [vmem:[#allocation2 + $0x64] sm:$0xf] %vm1897_vm2, %v1931_v26 }
 0x129   : > { %v629_v28 = vpop.f32.mrf.mxu0 }
 0x12c   : > { %8639 = vmatmul.msk.bf16.gmra.mxu0 %vm474_vm1, %v9451_v27 }
 0x12d   : > { %v10942_v29 = vpop.f32.mrf.mxu1 }
 0x12f   : > { %v9976_v30 = vld [vmem:[#allocation2 + $0x60] sm:$0xff]  }
 0x130   : > { %8676 = vmatmul.msk.bf16.gmra.mxu1 %vm2288_vm3, %v9976_v30 }
 0x131   : > { %v631_v31 = vpop.f32.mrf.mxu0 }
 0x135   : > { %v10945_v32 = vpop.f32.mrf.mxu1 }
 0x139   : > { %v634_v34 = vpop.f32.mrf.mxu0 }
 0x13a   : > { %v635_v35 = vadd.f32 %v10866_v20, %v634_v34  ;;  %v9457_v34 = vld [vmem:[%s10813_s29 + $0xb8] sm:$0xff] }
 0x13c   : > { %v764_v36 = vmax.f32 %v635_v35, 0.0  ;;  %8640 = vmatmul.msk.bf16.gmra.mxu0 %vm474_vm1, %v9452_v33 }
 0x13d   : > { %v10950_v37 = vpop.f32.mrf.mxu1 }
 0x13e   : > { %v1934_v39 = vpack.c.bf16 %v764_v36, %v764_v36 }
 0x140   : > { %1998 = vst.msk [vmem:[#allocation2 + $0x70] sm:$0xf] %vm1897_vm2, %v1934_v39  ;;  %8677 = vmatmul.msk.bf16.gmra.mxu1 %vm2288_vm3, %v9977_v38 }
 0x141   : > { %v636_v40 = vpop.f32.mrf.mxu0 }
 0x142   : > { %v637_v41 = vadd.f32 %v10866_v20, %v636_v40 }
 0x144   : > { %v765_v42 = vmax.f32 %v637_v41, 0.0  ;;  %v9505_v41 = vld [vmem:[%s12745_s3 + $0x28] sm:$0xff] }
 0x145   : > { %v10955_v43 = vpop.f32.mrf.mxu1  ;;  %3771 = vmatpush.bf16.msrb.mxu3 %v9505_v41 }
 0x146   : > { %v1935_v44 = vpack.c.bf16 %v765_v42, %v765_v42 }
 0x148   : > { %1999 = vst.msk [vmem:[#allocation2 + $0x74] sm:$0xf] %vm1897_vm2, %v1935_v44 }
 0x149   : > { %v639_v46 = vpop.f32.mrf.mxu0 }
 0x14c   : > { %8641 = vmatmul.msk.bf16.gmra.mxu0 %vm474_vm1, %v9453_v45 }
 0x14d   : > { %v10960_v47 = vpop.f32.mrf.mxu1 }
 0x14f   : > { %v9978_v48 = vld [vmem:[#allocation2 + $0x70] sm:$0xff]  }
 0x150   : > { %8678 = vmatmul.msk.bf16.gmra.mxu1 %vm2288_vm3, %v9978_v48 }
 0x151   : > { %v641_v49 = vpop.f32.mrf.mxu0 }
 0x152   : > { %v10286_v49 = vld [vmem:[#allocation2 + $0x1c] sm:$0x8] }
 0x155   : > { %v10963_v50 = vpop.f32.mrf.mxu1 }
 0x159   : > { %v644_v52 = vpop.f32.mrf.mxu0 }
 0x15a   : > { %v645_v53 = vadd.f32 %v10866_v20, %v644_v52 }
 0x15c   : > { %v768_v54 = vmax.f32 %v645_v53, 0.0  ;;  %8642 = vmatmul.msk.bf16.gmra.mxu0 %vm474_vm1, %v9454_v51  ;;  %v10607_v51 = vld [vmem:[#allocation2 + $0x1c] sm:$0xf0]  }
 0x15d   : > { %v10968_v55 = vpop.f32.mrf.mxu1 }
 0x15e   : > { %v1938_v57 = vpack.c.bf16 %v768_v54, %v768_v54  ;;  %v10609_v54 = vld [vmem:[#allocation2 + $0x24] sm:$0xff]  }
 0x160   : > { %2002 = vst.msk [vmem:[#allocation2 + $0x80] sm:$0xf] %vm1897_vm2, %v1938_v57  ;;  %8679 = vmatmul.msk.bf16.gmra.mxu1 %vm2288_vm3, %v9979_v56 }
 0x161   : > { %v646_v58 = vpop.f32.mrf.mxu0 }
 0x162   : > { %v647_v59 = vadd.f32 %v10866_v20, %v646_v58  ;;  %v10287_v58 = vor.u32 %v10607_v51, %v10286_v49 }
 0x164   : > { %v769_v60 = vmax.f32 %v647_v59, 0.0  ;;  %v4240_v59 = vshrl.u32 %v10609_v54, 16  ;;  %v4235_v2 = vshll.u32 %v10287_v58, 16 }
 0x165   : > { %v10973_v61 = vpop.f32.mrf.mxu1 }
 0x166   : > { %v1939_v62 = vpack.c.bf16 %v769_v60, %v769_v60  ;;  %v4243_v60 = vshll.u32 %v10609_v54, 16  ;;  %v4237_v14 = vrot.slane %v4235_v2, 4 }
 0x168   : > { %2003 = vst.msk [vmem:[#allocation2 + $0x84] sm:$0xf] %vm1897_vm2, %v1939_v62 }
 0x169   : > { %v649_v1 = vpop.f32.mrf.mxu0 }
 0x16a   : > { %v4232_v1 = vshrl.u32 %v10287_v58, 16 }
 0x16c   : > { %8643 = vmatmul.msk.bf16.gmra.mxu0 %vm474_vm1, %v9455_v0 }
 0x16d   : > { %v10984_v3 = vpop.f32.mrf.mxu1 }
 0x16e   : > { %12748 = vst [vmem:[#allocation3_spill] sm:$0xff] %v10984_v3 }
 0x16f   : > { %v9980_v4 = vld [vmem:[#allocation2 + $0x80] sm:$0xff]  }
 0x170   : > { %8680 = vmatmul.msk.bf16.gmra.mxu1 %vm2288_vm3, %v9980_v4  ;;  %v10252_v23 = vld [vmem:[#allocation2 + $0x84] sm:$0xff]   ;;  %v4242_v4 = vrot.slane %v4240_v59, 3 }
 0x171   : > { %v651_v5 = vpop.f32.mrf.mxu0  ;;  %v2725_v28 = vshrl.u32 %v10252_v23, 16  ;;  %v2728_v30 = vshll.u32 %v10252_v23, 16 }
 0x172   : > { %v4245_v5 = vrot.slane %v4243_v60, 4 }
 0x173   : > { %v2727_v36 = vrot.slane %v2725_v28, 3  ;;  %v2730_v38 = vrot.slane %v2728_v30, 4  ;;  %v10611_v30 = vld [vmem:[#allocation2 + $0x2c] sm:$0xff]  }
 0x175   : > { %v10990_v8 = vpop.f32.mrf.mxu1  ;;  %v11017_v46 = vor.u32 %v2730_v38, %v2727_v36 }
 0x176   : > { %12749 = vst [vmem:[#allocation4_spill] sm:$0xff] %v10990_v8 }
 0x179   : > { %v654_v11 = vpop.f32.mrf.mxu0 }
 0x17a   : > { %v655_v13 = vadd.f32 %v10866_v20, %v654_v11 }
 0x17c   : > { %v772_v15 = vmax.f32 %v655_v13, 0.0  ;;  %8644 = vmatmul.msk.bf16.gmra.mxu0 %vm474_vm1, %v9456_v10  ;;  %v9458_v10 = vld [vmem:[%s10813_s29 + $0xc0] sm:$0xff]  ;;  %v4234_v13 = vrot.slane %v4232_v1, 3 }
 0x17d   : > { %v11001_v17 = vpop.f32.mrf.mxu1 }
 0x17e   : > { %12750 = vst [vmem:[#allocation5_spill] sm:$0xff] %v11001_v17  ;;  %v1942_v19 = vpack.c.bf16 %v772_v15, %v772_v15  ;;  %v4238_v23 = vor.u32 %v4237_v14, %v4234_v13  ;;  %v9460_v13 = vld [vmem:[%s10813_s29 + $0xd0] sm:$0xff] }
 0x180   : > { %2006 = vst.msk [vmem:[#allocation2 + $0x90] sm:$0xf] %vm1897_vm2, %v1942_v19  ;;  %8681 = vmatmul.msk.bf16.gmra.mxu1 %vm2288_vm3, %v9981_v18  ;;  %v4246_v18 = vor.u32 %v4245_v5, %v4242_v4 }
 0x181   : > { %v656_v22 = vpop.f32.mrf.mxu0 }
 0x182   : > { %v657_v25 = vadd.f32 %v10866_v20, %v656_v22 }
 0x184   : > { %v773_v26 = vmax.f32 %v657_v25, 0.0 }
 0x185   : > { %v11007_v27 = vpop.f32.mrf.mxu1 }
 0x186   : > { %12751 = vst [vmem:[#allocation6_spill] sm:$0xff] %v11007_v27  ;;  %v1943_v31 = vpack.c.bf16 %v773_v26, %v773_v26  ;;  %v4247_v26 = vsel %vm2589_vm4, %v4238_v23, %v4246_v18 }
 0x187   : > { %v10254_v33 = vld [vmem:[#allocation2 + $0x8c] sm:$0xff]  }
 0x188   : > { %2007 = vst.msk [vmem:[#allocation2 + $0x94] sm:$0xf] %vm1897_vm2, %v1943_v31  ;;  %v2734_v39 = vshrl.u32 %v10254_v33, 16  ;;  %v2737_v40 = vshll.u32 %v10254_v33, 16 }
 0x189   : > { %v659_v35 = vpop.f32.mrf.mxu0 }
 0x18a   : > { %v2736_v42 = vrot.slane %v2734_v39, 3  ;;  %v2739_v44 = vrot.slane %v2737_v40, 4  ;;  %v4252_v35 = vshll.u32 %v10611_v30, 16 }
 0x18c   : > { %8645 = vmatmul.msk.bf16.gmra.mxu0 %vm474_vm1, %v9457_v34  ;;  %v2740_v48 = vor.u32 %v2739_v44, %v2736_v42  ;;  %v4249_v34 = vshrl.u32 %v10611_v30, 16  ;;  %v4254_v41 = vrot.slane %v4252_v35, 4  ;;  %v9459_v44 = vld [vmem:[%s10813_s29 + $0xc8] sm:$0xff] }
 0x18d   : > { %v11015_v45 = vpop.f32.mrf.mxu1 }
 0x18e   : > { %12752 = vst [vmem:[#allocation7_spill] sm:$0xff] %v11015_v45  ;;  %v2741_v53 = vsel %vm2589_vm4, %v11017_v46, %v2740_v48  ;;  %v4251_v40 = vrot.slane %v4249_v34, 3 }
 0x18f   : > { %v9982_v52 = vld [vmem:[#allocation2 + $0x90] sm:$0xff]   ;;  %8721 = vmatmul.msk.bf16.vlgmr.msra.gmra.mxu2 %vm2288_vm3, %v2741_v53 }
 0x190   : > { %v10256_v56 = vld [vmem:[#allocation2 + $0x94] sm:$0xff]   ;;  %8682 = vmatmul.msk.bf16.gmra.mxu1 %vm2288_vm3, %v9982_v52  ;;  %v4255_v52 = vor.u32 %v4254_v41, %v4251_v40 }
 0x191   : > { %v661_v57 = vpop.f32.mrf.mxu0  ;;  %v2743_v62 = vshrl.u32 %v10256_v56, 16  ;;  %v2746_v63 = vshll.u32 %v10256_v56, 16 }
 0x192   : > { %v4256_v59 = vsel %vm2589_vm4, %v4246_v18, %v4255_v52 }
 0x193   : > { %v2745_v6 = vrot.slane %v2743_v62, 3  ;;  %v2748_v9 = vrot.slane %v2746_v63, 4  ;;  %v10613_v62 = vld [vmem:[#allocation2 + $0x34] sm:$0xff]  }
 0x194   : > { %v4258_v2 = vshrl.u32 %v10613_v62, 16  ;;  %v4261_v4 = vshll.u32 %v10613_v62, 16 }
 0x195   : > { %v11023_v0 = vpop.f32.mrf.mxu1  ;;  %v2749_v19 = vor.u32 %v2748_v9, %v2745_v6 }
 0x196   : > { %12753 = vst [vmem:[#allocation8_spill] sm:$0xff] %v11023_v0 }
 0x197   : > { %v2750_v28 = vsel %vm2589_vm4, %v2740_v48, %v2749_v19 }
 0x199   : > { %v664_v11 = vpop.f32.mrf.mxu0 }
 0x19a   : > { %v665_v15 = vadd.f32 %v10866_v20, %v664_v11  ;;  %v4263_v11 = vrot.slane %v4261_v4, 4 }
 0x19c   : > { %v776_v21 = vmax.f32 %v665_v15, 0.0  ;;  %8646 = vmatmul.msk.bf16.gmra.mxu0 %vm474_vm1, %v9458_v10  ;;  %v4260_v10 = vrot.slane %v4258_v2, 3 }
 0x19d   : > { %v11028_v22 = vpop.f32.mrf.mxu1 }
 0x19e   : > { %12754 = vst [vmem:[#allocation9_spill] sm:$0xff] %v11028_v22  ;;  %v1946_v25 = vpack.c.bf16 %v776_v21, %v776_v21  ;;  %v4264_v21 = vor.u32 %v4263_v11, %v4260_v10 }
 0x19f   : > { %8722 = vmatmul.msk.bf16.gmra.mxu2 %vm2288_vm3, %v2750_v28  ;;  %v9985_v28 = vld [vmem:[#allocation2 + $0xa8] sm:$0xff]  }
 0x1a0   : > { %2010 = vst.msk [vmem:[#allocation2 + $0xa0] sm:$0xf] %vm1897_vm2, %v1946_v25  ;;  %8922 = vmatmul.msk.bf16.vlgmr.msrb.gmra.mxu1 %vm2288_vm3, %v4247_v26 }
 0x1a1   : > { %v666_v31 = vpop.f32.mrf.mxu0 }
 0x1a2   : > { %v667_v33 = vadd.f32 %v10866_v20, %v666_v31  ;;  %v4265_v31 = vsel %vm2589_vm4, %v4255_v52, %v4264_v21  ;;  %v9461_v52 = vld [vmem:[%s10813_s29 + $0xd8] sm:$0xff] }
 0x1a4   : > { %v777_v36 = vmax.f32 %v667_v33, 0.0  ;;  %v10615_v33 = vld [vmem:[#allocation2 + $0x3c] sm:$0xff]  }
 0x1a5   : > { %v11036_v38 = vpop.f32.mrf.mxu1  ;;  %v4270_v40 = vshll.u32 %v10615_v33, 16 }
 0x1a6   : > { %12755 = vst [vmem:[#allocation10_spill] sm:$0xff] %v11036_v38  ;;  %v1947_v39 = vpack.c.bf16 %v777_v36, %v777_v36  ;;  %v10240_v38 = vld [vmem:[#allocation2 + $0x54] sm:$0xff]  }
 0x1a7   : > { %v10258_v42 = vld [vmem:[#allocation2 + $0x9c] sm:$0xff]  }
 0x1a8   : > { %2011 = vst.msk [vmem:[#allocation2 + $0xa4] sm:$0xf] %vm1897_vm2, %v1947_v39  ;;  %v2752_v49 = vshrl.u32 %v10258_v42, 16  ;;  %v2755_v51 = vshll.u32 %v10258_v42, 16  ;;  %v4267_v39 = vshrl.u32 %v10615_v33, 16 }
 0x1a9   : > { %v669_v48 = vpop.f32.mrf.mxu0 }
 0x1aa   : > { %v2754_v53 = vrot.slane %v2752_v49, 3  ;;  %v2757_v54 = vrot.slane %v2755_v51, 4  ;;  %v4269_v48 = vrot.slane %v4267_v39, 3  ;;  %v4272_v49 = vrot.slane %v4270_v40, 4  ;;  %v9987_v39 = vld [vmem:[#allocation2 + $0xb8] sm:$0xff]  }
 0x1ac   : > { %8647 = vmatmul.msk.bf16.gmra.mxu0 %vm474_vm1, %v9459_v44  ;;  %v2758_v57 = vor.u32 %v2757_v54, %v2754_v53 }
 0x1ad   : > { %v11041_v56 = vpop.f32.mrf.mxu1 }
 0x1ae   : > { %12756 = vst [vmem:[#allocation11_spill] sm:$0xff] %v11041_v56  ;;  %v2759_v60 = vsel %vm2589_vm4, %v2749_v19, %v2758_v57 }
 0x1af   : > { %v9984_v58 = vld [vmem:[#allocation2 + $0xa0] sm:$0xff]   ;;  %8723 = vmatmul.msk.bf16.gmra.mxu2 %vm2288_vm3, %v2759_v60 }
 0x1b0   : > { %8684 = vmatmul.msk.bf16.gmra.mxu3 %vm2288_vm3, %v9984_v58  ;;  %8923 = vmatmul.msk.bf16.gmra.mxu1 %vm2288_vm3, %v4256_v59  ;;  %v10260_v63 = vld [vmem:[#allocation2 + $0xa4] sm:$0xff]   ;;  %v4273_v58 = vor.u32 %v4272_v49, %v4269_v48 }
 0x1b1   : > { %v671_v1 = vpop.f32.mrf.mxu0  ;;  %v2761_v5 = vshrl.u32 %v10260_v63, 16  ;;  %v2764_v6 = vshll.u32 %v10260_v63, 16 }
 0x1b2   : > { %v4274_v2 = vsel %vm2589_vm4, %v4264_v21, %v4273_v58  ;;  %v9462_v21 = vld [vmem:[%s10813_s29 + $0xe0] sm:$0xff] }
 0x1b3   : > { %v2763_v14 = vrot.slane %v2761_v5, 3  ;;  %v2766_v15 = vrot.slane %v2764_v6, 4  ;;  %v10617_v5 = vld [vmem:[#allocation2 + $0x44] sm:$0xff]  }
 0x1b4   : > { %v4276_v11 = vshrl.u32 %v10617_v5, 16 }
 0x1b5   : > { %v11048_v9 = vpop.f32.mrf.mxu1  ;;  %v2767_v25 = vor.u32 %v2766_v15, %v2763_v14 }
 0x1b6   : > { %12757 = vst [vmem:[#allocation12_spill] sm:$0xff] %v11048_v9 }
 0x1b7   : > { %v2768_v34 = vsel %vm2589_vm4, %v2758_v57, %v2767_v25 }
 0x1b9   : > { %v674_v18 = vpop.f32.mrf.mxu0 }
 0x1ba   : > { %v675_v19 = vadd.f32 %v10866_v20, %v674_v18 }
 0x1bc   : > { %v780_v23 = vmax.f32 %v675_v19, 0.0  ;;  %8648 = vmatmul.msk.bf16.gmra.mxu0 %vm474_vm1, %v9460_v13  ;;  %v4279_v13 = vshll.u32 %v10617_v5, 16  ;;  %v4278_v19 = vrot.slane %v4276_v11, 3 }
 0x1bd   : > { %v11053_v26 = vpop.f32.mrf.mxu1 }
 0x1be   : > { %12758 = vst [vmem:[#allocation13_spill] sm:$0xff] %v11053_v26  ;;  %v1950_v30 = vpack.c.bf16 %v780_v23, %v780_v23  ;;  %v4281_v23 = vrot.slane %v4279_v13, 4 }
 0x1bf   : > { %8724 = vmatmul.msk.bf16.gmra.mxu2 %vm2288_vm3, %v2768_v34 }
 0x1c0   : > { %2014 = vst.msk [vmem:[#allocation2 + $0xb0] sm:$0xf] %vm1897_vm2, %v1950_v30  ;;  %8685 = vmatmul.msk.bf16.gmra.mxu3 %vm2288_vm3, %v9985_v28  ;;  %8924 = vmatmul.msk.bf16.gmra.mxu1 %vm2288_vm3, %v4265_v31  ;;  %v4282_v33 = vor.u32 %v4281_v23, %v4278_v19 }
 0x1c1   : > { %v676_v35 = vpop.f32.mrf.mxu0 }
 0x1c2   : > { %v677_v36 = vadd.f32 %v10866_v20, %v676_v35 }
 0x1c4   : > { %v781_v41 = vmax.f32 %v677_v36, 0.0 }
 0x1c5   : > { %v11062_v42 = vpop.f32.mrf.mxu1 }
 0x1c6   : > { %12759 = vst [vmem:[#allocation14_spill] sm:$0xff] %v11062_v42  ;;  %v1951_v44 = vpack.c.bf16 %v781_v41, %v781_v41  ;;  %v4283_v41 = vsel %vm2589_vm4, %v4273_v58, %v4282_v33 }
 0x1c7   : > { %v10262_v51 = vld [vmem:[#allocation2 + $0xac] sm:$0xff]  }
 0x1c8   : > { %2015 = vst.msk [vmem:[#allocation2 + $0xb4] sm:$0xf] %vm1897_vm2, %v1951_v44  ;;  %v2770_v54 = vshrl.u32 %v10262_v51, 16  ;;  %v2773_v57 = vshll.u32 %v10262_v51, 16  ;;  %v10619_v44 = vld [vmem:[#allocation2 + $0x4c] sm:$0xff]  }
 0x1c9   : > { %v679_v53 = vpop.f32.mrf.mxu0 }
 0x1ca   : > { %v2772_v59 = vrot.slane %v2770_v54, 3  ;;  %v2775_v60 = vrot.slane %v2773_v57, 4  ;;  %v4288_v53 = vshll.u32 %v10619_v44, 16 }
 0x1cc   : > { %8649 = vmatmul.msk.bf16.gmra.mxu0 %vm474_vm1, %v9461_v52  ;;  %v2776_v63 = vor.u32 %v2775_v60, %v2772_v59  ;;  %v4285_v52 = vshrl.u32 %v10619_v44, 16  ;;  %v4290_v60 = vrot.slane %v4288_v53, 4 }
 0x1cd   : > { %v11067_v62 = vpop.f32.mrf.mxu1 }
 0x1ce   : > { %12760 = vst [vmem:[#allocation15_spill] sm:$0xff] %v11067_v62  ;;  %v2777_v4 = vsel %vm2589_vm4, %v2767_v25, %v2776_v63  ;;  %v4287_v59 = vrot.slane %v4285_v52, 3  ;;  %v10639_v62 = vld [vmem:[#allocation2 + $0x9c] sm:$0xff]  }
 0x1cf   : > { %v9986_v1 = vld [vmem:[#allocation2 + $0xb0] sm:$0xff]   ;;  %8725 = vmatmul.msk.bf16.gmra.mxu2 %vm2288_vm3, %v2777_v4 }
 0x1d0   : > { %8686 = vmatmul.msk.bf16.gmra.mxu3 %vm2288_vm3, %v9986_v1  ;;  %8925 = vmatmul.msk.bf16.gmra.mxu1 %vm2288_vm3, %v4274_v2  ;;  %v10264_v6 = vld [vmem:[#allocation2 + $0xb4] sm:$0xff]   ;;  %v9463_v2 = vld [vmem:[%s10813_s29 + $0xe8] sm:$0xff] }
 0x1d1   : > { %v681_v10 = vpop.f32.mrf.mxu0  ;;  %v2779_v14 = vshrl.u32 %v10264_v6, 16  ;;  %v2782_v15 = vshll.u32 %v10264_v6, 16  ;;  %v4291_v6 = vor.u32 %v4290_v60, %v4287_v59  ;;  %v9989_v59 = vld [vmem:[#allocation2 + $0xc8] sm:$0xff]  }
 0x1d3   : > { %v2781_v28 = vrot.slane %v2779_v14, 3  ;;  %v2784_v25 = vrot.slane %v2782_v15, 4  ;;  %v4292_v19 = vsel %vm2589_vm4, %v4282_v33, %v4291_v6  ;;  %v9464_v33 = vld [vmem:[%s10813_s29 + $0xf0] sm:$0xff] }
 0x1d5   : > { %v11074_v18 = vpop.f32.mrf.mxu1  ;;  %v2785_v35 = vor.u32 %v2784_v25, %v2781_v28 }
 0x1d6   : > { %12761 = vst [vmem:[#allocation16_spill] sm:$0xff] %v11074_v18 }
 0x1d7   : > { %v2786_v48 = vsel %vm2589_vm4, %v2776_v63, %v2785_v35 }
 0x1d9   : > { %v684_v30 = vpop.f32.mrf.mxu0 }
 0x1da   : > { %v685_v31 = vadd.f32 %v10866_v20, %v684_v30 }
 0x1dc   : > { %v784_v34 = vmax.f32 %v685_v31, 0.0  ;;  %8650 = vmatmul.msk.bf16.gmra.mxu0 %vm474_vm1, %v9462_v21  ;;  %v10621_v21 = vld [vmem:[#allocation2 + $0x54] sm:$0xff]  }
 0x1dd   : > { %v11079_v36 = vpop.f32.mrf.mxu1  ;;  %v4294_v30 = vshrl.u32 %v10621_v21, 16  ;;  %v4297_v31 = vshll.u32 %v10621_v21, 16  ;;  %v10000_v21 = vld [vmem:[#allocation2 + $0xc] sm:$0x8] }
 0x1de   : > { %12762 = vst [vmem:[#allocation17_spill] sm:$0xff] %v11079_v36  ;;  %v1954_v40 = vpack.c.bf16 %v784_v34, %v784_v34 }
 0x1df   : > { %8726 = vmatmul.msk.bf16.gmra.mxu2 %vm2288_vm3, %v2786_v48  ;;  %v4299_v44 = vrot.slane %v4297_v31, 4  ;;  %v9465_v31 = vld [vmem:[%s10813_s29 + $0xf8] sm:$0xff]  ;;  %s12207_s29 = scalar_lea.vmem %s12747_s5, %s9432_s24 }
 0x1e0   : > { %2018 = vst.msk [vmem:[#allocation2 + $0xc0] sm:$0xf] %vm1897_vm2, %v1954_v40  ;;  %8687 = vmatmul.msk.bf16.gmra.mxu3 %vm2288_vm3, %v9987_v39  ;;  %8926 = vmatmul.msk.bf16.gmra.mxu1 %vm2288_vm3, %v4283_v41  ;;  %v4296_v41 = vrot.slane %v4294_v30, 3 }
 0x1e1   : > { %v686_v49 = vpop.f32.mrf.mxu0 }
 0x1e2   : > { %v687_v51 = vadd.f32 %v10866_v20, %v686_v49  ;;  %v4300_v52 = vor.u32 %v4299_v44, %v4296_v41 }
 0x1e4   : > { %v785_v54 = vmax.f32 %v687_v51, 0.0 }
 0x1e5   : > { %v11088_v57 = vpop.f32.mrf.mxu1 }
 0x1e6   : > { %12763 = vst [vmem:[#allocation18_spill] sm:$0xff] %v11088_v57  ;;  %v1955_v58 = vpack.c.bf16 %v785_v54, %v785_v54 }
 0x1e7   : > { %v10266_v1 = vld [vmem:[#allocation2 + $0xbc] sm:$0xff]  }
 0x1e8   : > { %2019 = vst.msk [vmem:[#allocation2 + $0xc4] sm:$0xf] %vm1897_vm2, %v1955_v58  ;;  %v2788_v5 = vshrl.u32 %v10266_v1, 16  ;;  %v2791_v63 = vshll.u32 %v10266_v1, 16  ;;  %v4301_v1 = vsel %vm2589_vm4, %v4291_v6, %v4300_v52 }
 0x1e9   : > { %v689_v4 = vpop.f32.mrf.mxu0 }
 0x1ea   : > { %v2790_v10 = vrot.slane %v2788_v5, 3  ;;  %v2793_v11 = vrot.slane %v2791_v63, 4  ;;  %v9508_v5 = vld [vmem:[%s12745_s3 + $0x40] sm:$0xff] }
 0x1eb   : > { %5020 = vmatpush.bf16.msrb.mxu2 %v9508_v5 }
 0x1ec   : > { %8651 = vmatmul.msk.bf16.gmra.mxu0 %vm474_vm1, %v9463_v2  ;;  %v2794_v14 = vor.u32 %v2793_v11, %v2790_v10  ;;  %v10623_v2 = vld [vmem:[#allocation2 + $0x5c] sm:$0xff]  }
 0x1ed   : > { %v11093_v13 = vpop.f32.mrf.mxu1  ;;  %v4303_v6 = vshrl.u32 %v10623_v2, 16  ;;  %v4306_v11 = vshll.u32 %v10623_v2, 16 }
 0x1ee   : > { %12764 = vst [vmem:[#allocation19_spill] sm:$0xff] %v11093_v13  ;;  %v2795_v23 = vsel %vm2589_vm4, %v2785_v35, %v2794_v14 }
 0x1ef   : > { %v9988_v15 = vld [vmem:[#allocation2 + $0xc0] sm:$0xff]   ;;  %8727 = vmatmul.msk.bf16.gmra.mxu2 %vm2288_vm3, %v2795_v23 }
 0x1f0   : > { %8688 = vmatmul.msk.bf16.gmra.mxu3 %vm2288_vm3, %v9988_v15  ;;  %8927 = vmatmul.msk.bf16.gmra.mxu1 %vm2288_vm3, %v4292_v19  ;;  %v10268_v28 = vld [vmem:[#allocation2 + $0xc4] sm:$0xff]  }
 0x1f1   : > { %v691_v25 = vpop.f32.mrf.mxu0  ;;  %v2797_v34 = vshrl.u32 %v10268_v28, 16  ;;  %v2800_v39 = vshll.u32 %v10268_v28, 16  ;;  %v10222_v28 = vld [vmem:[#allocation2 + $0xc] sm:$0xf0]  }
 0x1f2   : > { %v4305_v25 = vrot.slane %v4303_v6, 3  ;;  %v10625_v6 = vld [vmem:[#allocation2 + $0x64] sm:$0xff]  }
 0x1f3   : > { %v2799_v48 = vrot.slane %v2797_v34, 3  ;;  %v2802_v35 = vrot.slane %v2800_v39, 4  ;;  %v9504_v34 = vld [vmem:[%s12745_s3 + $0x20] sm:$0xff] }
 0x1f4   : > { %3772 = vmatpush.bf16.msrb.mxu3 %v9504_v34 }
 0x1f5   : > { %v11100_v40 = vpop.f32.mrf.mxu1  ;;  %v2803_v54 = vor.u32 %v2802_v35, %v2799_v48 }
 0x1f6   : > { %12765 = vst [vmem:[#allocation20_spill] sm:$0xff] %v11100_v40 }
 0x1f7   : > { %v2804_v4 = vsel %vm2589_vm4, %v2794_v14, %v2803_v54  ;;  %v4308_v14 = vrot.slane %v4306_v11, 4 }
 0x1f9   : > { %v694_v49 = vpop.f32.mrf.mxu0  ;;  %v4309_v48 = vor.u32 %v4308_v14, %v4305_v25 }
 0x1fa   : > { %v695_v51 = vadd.f32 %v10866_v20, %v694_v49 }
 0x1fc   : > { %v788_v53 = vmax.f32 %v695_v51, 0.0  ;;  %8652 = vmatmul.msk.bf16.gmra.mxu0 %vm474_vm1, %v9464_v33  ;;  %v10001_v33 = vor.u32 %v10222_v28, %v10000_v21  ;;  %v10224_v51 = vld [vmem:[#allocation2 + $0x14] sm:$0xff]  }
 0x1fd   : > { %v2469_v58 = vpop.f32.mrf.mxu1 }
 0x1fe   : > { %v1958_v60 = vpack.c.bf16 %v788_v53, %v788_v53 }
 0x1ff   : > { %8728 = vmatmul.msk.bf16.gmra.mxu2 %vm2288_vm3, %v2804_v4  ;;  %v4310_v4 = vsel %vm2589_vm4, %v4300_v52, %v4309_v48  ;;  %v4315_v52 = vshll.u32 %v10625_v6, 16 }
 0x200   : > { %2022 = vst.msk [vmem:[#allocation2 + $0xd0] sm:$0xf] %vm1897_vm2, %v1958_v60  ;;  %8689 = vmatmul.msk.bf16.gmra.mxu3 %vm2288_vm3, %v9989_v59  ;;  %8928 = vmatmul.msk.bf16.gmra.mxu1 %vm2288_vm3, %v4301_v1  ;;  %v2591_v60 = vshrl.u32 %v10001_v33, 16  ;;  %v2594_v1 = vshll.u32 %v10001_v33, 16 }
 0x201   : > { %v696_v63 = vpop.f32.mrf.mxu0 }
 0x202   : > { %v697_v10 = vadd.f32 %v10866_v20, %v696_v63  ;;  %v2599_v63 = vshrl.u32 %v10224_v51, 16  ;;  %v2596_v21 = vrot.slane %v2594_v1, 4 }
 0x204   : > { %v789_v15 = vmax.f32 %v697_v10, 0.0  ;;  %v2602_v10 = vshll.u32 %v10224_v51, 16  ;;  %v2601_v25 = vrot.slane %v2599_v63, 3  ;;  %v10226_v63 = vld [vmem:[#allocation2 + $0x1c] sm:$0xff]  }
 0x205   : > { %v2471_v19 = vpop.f32.mrf.mxu1 }
 0x206   : > { %v1959_v23 = vpack.c.bf16 %v789_v15, %v789_v15  ;;  %v2604_v14 = vrot.slane %v2602_v10, 4 }
 0x207   : > { %v10270_v30 = vld [vmem:[#allocation2 + $0xcc] sm:$0xff]  }
 0x208   : > { %2023 = vst.msk [vmem:[#allocation2 + $0xd4] sm:$0xf] %vm1897_vm2, %v1959_v23  ;;  %v2806_v41 = vshrl.u32 %v10270_v30, 16  ;;  %v2809_v44 = vshll.u32 %v10270_v30, 16  ;;  %v2593_v23 = vrot.slane %v2591_v60, 3  ;;  %v4312_v30 = vshrl.u32 %v10625_v6, 16 }
 0x209   : > { %v699_v39 = vpop.f32.mrf.mxu0 }
 0x20a   : > { %v2808_v35 = vrot.slane %v2806_v41, 3  ;;  %v2811_v49 = vrot.slane %v2809_v44, 4  ;;  %v2597_v41 = vor.u32 %v2596_v21, %v2593_v23  ;;  %v2605_v44 = vor.u32 %v2604_v14, %v2601_v25 }
 0x20b   : > { %v4314_v33 = vrot.slane %v4312_v30, 3  ;;  %v2608_v25 = vshrl.u32 %v10226_v63, 16  ;;  %v2611_v14 = vshll.u32 %v10226_v63, 16  ;;  %v10627_v30 = vld [vmem:[#allocation2 + $0x6c] sm:$0xff]  }
 0x20c   : > { %8653 = vmatmul.msk.bf16.gmra.mxu0 %vm474_vm1, %v9465_v31  ;;  %v2812_v59 = vor.u32 %v2811_v49, %v2808_v35  ;;  %v4317_v35 = vrot.slane %v4315_v52, 4  ;;  %v2606_v60 = vsel %vm2589_vm4, %v2597_v41, %v2605_v44 }
 0x20d   : > { %v11121_v53 = vpop.f32.mrf.mxu1  ;;  %v2610_v41 = vrot.slane %v2608_v25, 3 }
 0x20e   : > { %v2813_v5 = vsel %vm2589_vm4, %v2803_v54, %v2812_v59 }
 0x20f   : > { %v9990_v2 = vld [vmem:[#allocation2 + $0xd0] sm:$0xff]   ;;  %8729 = vmatmul.msk.bf16.gmra.mxu2 %vm2288_vm3, %v2813_v5  ;;  %v4318_v5 = vor.u32 %v4317_v35, %v4314_v33  ;;  %v4321_v33 = vshrl.u32 %v10627_v30, 16  ;;  %v4324_v35 = vshll.u32 %v10627_v30, 16 }
 0x210   : > { %8690 = vmatmul.msk.bf16.gmra.mxu3 %vm2288_vm3, %v9990_v2  ;;  %8929 = vmatmul.msk.bf16.gmra.mxu1 %vm2288_vm3, %v4310_v4  ;;  %v10272_v11 = vld [vmem:[#allocation2 + $0xd4] sm:$0xff]  }
 0x211   : > { %v701_v15 = vpop.f32.mrf.mxu0  ;;  %v2815_v54 = vshrl.u32 %v10272_v11, 16  ;;  %v2818_v34 = vshll.u32 %v10272_v11, 16  ;;  %v4319_v21 = vsel %vm2589_vm4, %v4309_v48, %v4318_v5  ;;  %v2613_v48 = vrot.slane %v2611_v14, 4 }
 0x212   : > { %v3078_v28 = vpop.f32.mrf.mxu2  ;;  %v9991_v15 = vld [vmem:[#allocation2 + $0xd8] sm:$0xff]  }
 0x213   : > { %v11128_v31 = vadd.f32 %v3078_v28, %v2469_v58  ;;  %v2817_v49 = vrot.slane %v2815_v54, 3  ;;  %v2820_v51 = vrot.slane %v2818_v34, 4  ;;  %v2479_v28 = vpop.f32.mrf.mxu3 }
 0x215   : > { %12766 = vst [vmem:[#allocation21_spill] sm:$0xff] %v11128_v31  ;;  %v2476_v39 = vpop.f32.mrf.mxu1  ;;  %v2821_v6 = vor.u32 %v2820_v51, %v2817_v49 }
 0x219   : > { %v704_v2 = vpop.f32.mrf.mxu0 }
 0x21a   : > { %v705_v1 = vadd.f32 %v10866_v20, %v704_v2  ;;  %v3080_v4 = vpop.f32.mrf.mxu2 }
 0x21b   : > { %v11133_v58 = vadd.f32 %v3080_v4, %v2471_v19  ;;  %v2822_v19 = vsel %vm2589_vm4, %v2812_v59, %v2821_v6  ;;  %v4323_v4 = vrot.slane %v4321_v33, 3  ;;  %v4326_v59 = vrot.slane %v4324_v35, 4 }
 0x21c   : > { %v792_v10 = vmax.f32 %v705_v1, 0.0  ;;  %8706 = vmatmul.msk.bf16.vlgmr.msrb.gmra.mxu0 %vm2288_vm3, %v2606_v60  ;;  %v2614_v1 = vor.u32 %v2613_v48, %v2610_v41 }
 0x21d   : > { %12767 = vst [vmem:[#allocation22_spill] sm:$0xff] %v11133_v58  ;;  %v11135_v11 = vpop.f32.mrf.mxu1  ;;  %v4327_v14 = vor.u32 %v4326_v59, %v4323_v4 }
 0x21e   : > { %v1962_v23 = vpack.c.bf16 %v792_v10, %v792_v10 }
 0x21f   : > { %8730 = vmatmul.msk.bf16.gmra.mxu2 %vm2288_vm3, %v2822_v19  ;;  %v10228_v19 = vld [vmem:[#allocation2 + $0x24] sm:$0xff]   ;;  %v4328_v48 = vsel %vm2589_vm4, %v4318_v5, %v4327_v14 }
 0x220   : > { %2026 = vst.msk [vmem:[#allocation2 + $0xe0] sm:$0xf] %vm1897_vm2, %v1962_v23  ;;  %8691 = vmatmul.msk.bf16.gmra.mxu3 %vm2288_vm3, %v9991_v15  ;;  %8930 = vmatmul.msk.bf16.gmra.mxu1 %vm2288_vm3, %v4319_v21  ;;  %v2615_v21 = vsel %vm2589_vm4, %v2605_v44, %v2614_v1  ;;  %v2617_v35 = vshrl.u32 %v10228_v19, 16  ;;  %v10629_v44 = vld [vmem:[#allocation2 + $0x74] sm:$0xff]  }
 0x221   : > { %v706_v52 = vpop.f32.mrf.mxu0 }
 0x222   : > { %v707_v54 = vadd.f32 %v10866_v20, %v706_v52  ;;  %v3083_v34 = vpop.f32.mrf.mxu2  ;;  %v2481_v20 = vpop.f32.mrf.mxu3  ;;  %v2619_v59 = vrot.slane %v2617_v35, 3 }
 0x223   : > { %v11145_v51 = vadd.f32 %v3083_v34, %v11121_v53 }
 0x224   : > { %v793_v49 = vmax.f32 %v707_v54, 0.0 }
 0x225   : > { %12768 = vst [vmem:[#allocation23_spill] sm:$0xff] %v11145_v51  ;;  %v11147_v2 = vpop.f32.mrf.mxu1  ;;  %v10631_v51 = vld [vmem:[#allocation2 + $0x7c] sm:$0xff]  }
 0x226   : > { %v1963_v60 = vpack.c.bf16 %v793_v49, %v793_v49  ;;  %v2620_v49 = vshll.u32 %v10228_v19, 16 }
 0x227   : > { %v10274_v63 = vld [vmem:[#allocation2 + $0xdc] sm:$0xff]  }
 0x228   : > { %2027 = vst.msk [vmem:[#allocation2 + $0xe4] sm:$0xf] %vm1897_vm2, %v1963_v60  ;;  %v2824_v15 = vshrl.u32 %v10274_v63, 16  ;;  %v2827_v23 = vshll.u32 %v10274_v63, 16  ;;  %v2622_v63 = vrot.slane %v2620_v49, 4 }
 0x229   : > { %v709_v10 = vpop.f32.mrf.mxu0 }
 0x22a   : > { %v3085_v25 = vpop.f32.mrf.mxu2  ;;  %v2826_v30 = vrot.slane %v2824_v15, 3  ;;  %v2829_v53 = vrot.slane %v2827_v23, 4  ;;  %v4330_v10 = vshrl.u32 %v10629_v44, 16  ;;  %v4333_v15 = vshll.u32 %v10629_v44, 16 }
 0x22b   : > { %v11152_v52 = vadd.f32 %v3085_v25, %v2476_v39 }
 0x22c   : > { %8707 = vmatmul.msk.bf16.gmra.mxu0 %vm2288_vm3, %v2615_v21  ;;  %v2830_v34 = vor.u32 %v2829_v53, %v2826_v30  ;;  %v2623_v30 = vor.u32 %v2622_v63, %v2619_v59  ;;  %v4332_v53 = vrot.slane %v4330_v10, 3  ;;  %v4335_v19 = vrot.slane %v4333_v15, 4 }
 0x22d   : > { %12769 = vst [vmem:[#allocation24_spill] sm:$0xff] %v11152_v52  ;;  %v11154_v54 = vpop.f32.mrf.mxu1 }
 0x22e   : > { %v2831_v33 = vsel %vm2589_vm4, %v2821_v6, %v2830_v34  ;;  %v2624_v44 = vsel %vm2589_vm4, %v2614_v1, %v2623_v30 }
 0x22f   : > { %v9992_v41 = vld [vmem:[#allocation2 + $0xe0] sm:$0xff]   ;;  %8731 = vmatmul.msk.bf16.gmra.mxu2 %vm2288_vm3, %v2831_v33 }
 0x230   : > { %8692 = vmatmul.msk.bf16.gmra.mxu3 %vm2288_vm3, %v9992_v41  ;;  %8931 = vmatmul.msk.bf16.gmra.mxu1 %vm2288_vm3, %v4328_v48  ;;  %v10276_v60 = vld [vmem:[#allocation2 + $0xe4] sm:$0xff]   ;;  %v11168_v33 = vld [vmem:[%s12744_s2] ss:$0 sm:$0xff] }
 0x231   : > { %v711_v4 = vpop.f32.mrf.mxu0  ;;  %v2833_v5 = vshrl.u32 %v10276_v60, 16  ;;  %v2836_v21 = vshll.u32 %v10276_v60, 16  ;;  %v10230_v60 = vld [vmem:[#allocation2 + $0x2c] sm:$0xff]  }
 0x232   : > { %v3088_v23 = vpop.f32.mrf.mxu2  ;;  %v2626_v52 = vshrl.u32 %v10230_v60, 16 }
 0x233   : > { %v2484_v39 = vpop.f32.mrf.mxu3  ;;  %v11161_v6 = vadd.f32 %v3088_v23, %v2479_v28  ;;  %v2835_v41 = vrot.slane %v2833_v5, 3  ;;  %v2838_v48 = vrot.slane %v2836_v21, 4  ;;  %v4336_v28 = vor.u32 %v4335_v19, %v4332_v53  ;;  %v9993_v5 = vld [vmem:[#allocation2 + $0xe8] sm:$0xff]  }
 0x235   : > { %12770 = vst [vmem:[#allocation25_spill] sm:$0xff] %v11161_v6  ;;  %v11163_v25 = vpop.f32.mrf.mxu1  ;;  %v2839_v63 = vor.u32 %v2838_v48, %v2835_v41  ;;  %v4337_v6 = vsel %vm2589_vm4, %v4327_v14, %v4336_v28  ;;  %v2628_v41 = vrot.slane %v2626_v52, 3  ;;  %v4339_v14 = vshrl.u32 %v10631_v51, 16 }
 0x237   : > { %v2840_v1 = vsel %vm2589_vm4, %v2830_v34, %v2839_v63 }
 0x239   : > { %v714_v4 = vpop.f32.mrf.mxu0 }
 0x23a   : > { %v715_v35 = vadd.f32 %v11168_v33, %v714_v4  ;;  %v3090_v59 = vpop.f32.mrf.mxu2  ;;  %v2629_v4 = vshll.u32 %v10230_v60, 16 }
 0x23b   : > { %v2486_v49 = vpop.f32.mrf.mxu3  ;;  %v11173_v10 = vadd.f32 %v3090_v59, %v2481_v20 }
 0x23c   : > { %v796_v23 = vmax.f32 %v715_v35, 0.0  ;;  %8708 = vmatmul.msk.bf16.gmra.mxu0 %vm2288_vm3, %v2624_v44  ;;  %v2631_v48 = vrot.slane %v2629_v4, 4  ;;  %v4342_v35 = vshll.u32 %v10631_v51, 16 }
 0x23d   : > { %12771 = vst [vmem:[#allocation26_spill] sm:$0xff] %v11173_v10  ;;  %v11175_v15 = vpop.f32.mrf.mxu1 }
 0x23e   : > { %v1966_v21 = vpack.c.bf16 %v796_v23, %v796_v23  ;;  %v4344_v34 = vrot.slane %v4342_v35, 4 }
 0x23f   : > { %8732 = vmatmul.msk.bf16.gmra.mxu2 %vm2288_vm3, %v2840_v1 }
 0x240   : > { %2030 = vst.msk [vmem:[#allocation2 + $0xf0] sm:$0xf] %vm1897_vm2, %v1966_v21  ;;  %8693 = vmatmul.msk.bf16.gmra.mxu3 %vm2288_vm3, %v9993_v5  ;;  %8932 = vmatmul.msk.bf16.gmra.mxu1 %vm2288_vm3, %v4337_v6  ;;  %v2632_v6 = vor.u32 %v2631_v48, %v2628_v41  ;;  %v4341_v21 = vrot.slane %v4339_v14, 3 }
 0x241   : > { %v716_v53 = vpop.f32.mrf.mxu0 }
 0x242   : > { %v717_v20 = vadd.f32 %v11168_v33, %v716_v53  ;;  %v3093_v60 = vpop.f32.mrf.mxu2  ;;  %v2633_v4 = vsel %vm2589_vm4, %v2623_v30, %v2632_v6  ;;  %v4345_v51 = vor.u32 %v4344_v34, %v4341_v21  ;;  %v10633_v30 = vld [vmem:[#allocation2 + $0x84] sm:$0xff]  }
 0x243   : > { %v2489_v19 = vpop.f32.mrf.mxu3  ;;  %v11184_v23 = vadd.f32 %v3093_v60, %v2484_v39  ;;  %v10232_v39 = vld [vmem:[#allocation2 + $0x34] sm:$0xff]  }
 0x244   : > { %v797_v44 = vmax.f32 %v717_v20, 0.0  ;;  %v4346_v35 = vsel %vm2589_vm4, %v4336_v28, %v4345_v51 }
 0x245   : > { %12772 = vst [vmem:[#allocation27_spill] sm:$0xff] %v11184_v23  ;;  %v11186_v59 = vpop.f32.mrf.mxu1 }
 0x246   : > { %v1967_v5 = vpack.c.bf16 %v797_v44, %v797_v44 }
 0x247   : > { %v10278_v10 = vld [vmem:[#allocation2 + $0xec] sm:$0xff]  }
 0x248   : > { %2031 = vst.msk [vmem:[#allocation2 + $0xf4] sm:$0xf] %vm1897_vm2, %v1967_v5  ;;  %v2842_v53 = vshrl.u32 %v10278_v10, 16  ;;  %v2845_v58 = vshll.u32 %v10278_v10, 16  ;;  %v2635_v5 = vshrl.u32 %v10232_v39, 16 }
 0x249   : > { %v719_v1 = vpop.f32.mrf.mxu0 }
 0x24a   : > { %v2844_v20 = vrot.slane %v2842_v53, 3  ;;  %v2847_v31 = vrot.slane %v2845_v58, 4  ;;  %v3095_v60 = vpop.f32.mrf.mxu2  ;;  %v2638_v1 = vshll.u32 %v10232_v39, 16  ;;  %v2637_v34 = vrot.slane %v2635_v5, 3 }
 0x24b   : > { %v2491_v52 = vpop.f32.mrf.mxu3  ;;  %v11191_v44 = vadd.f32 %v3095_v60, %v2486_v49 }
 0x24c   : > { %8709 = vmatmul.msk.bf16.gmra.mxu0 %vm2288_vm3, %v2633_v4  ;;  %v2848_v48 = vor.u32 %v2847_v31, %v2844_v20  ;;  %v2640_v53 = vrot.slane %v2638_v1, 4  ;;  %v4348_v31 = vshrl.u32 %v10633_v30, 16  ;;  %v4351_v4 = vshll.u32 %v10633_v30, 16  ;;  %v10234_v30 = vld [vmem:[#allocation2 + $0x3c] sm:$0xff]  }
 0x24d   : > { %12773 = vst [vmem:[#allocation28_spill] sm:$0xff] %v11191_v44  ;;  %v11193_v41 = vpop.f32.mrf.mxu1 }
 0x24e   : > { %v2849_v10 = vsel %vm2589_vm4, %v2839_v63, %v2848_v48  ;;  %v2641_v44 = vor.u32 %v2640_v53, %v2637_v34  ;;  %v4353_v23 = vrot.slane %v4351_v4, 4  ;;  %v9995_v53 = vld [vmem:[#allocation2 + $0xf8] sm:$0xff]  }
 0x24f   : > { %v9994_v14 = vld [vmem:[#allocation2 + $0xf0] sm:$0xff]   ;;  %8733 = vmatmul.msk.bf16.gmra.mxu2 %vm2288_vm3, %v2849_v10 }
 0x250   : > { %8694 = vmatmul.msk.bf16.gmra.mxu3 %vm2288_vm3, %v9994_v14  ;;  %8933 = vmatmul.msk.bf16.gmra.mxu1 %vm2288_vm3, %v4346_v35  ;;  %v10280_v58 = vld [vmem:[#allocation2 + $0xf4] sm:$0xff]   ;;  %v4350_v14 = vrot.slane %v4348_v31, 3  ;;  %v2642_v5 = vsel %vm2589_vm4, %v2632_v6, %v2641_v44 }
 0x251   : > { %v721_v21 = vpop.f32.mrf.mxu0  ;;  %v2851_v28 = vshrl.u32 %v10280_v58, 16  ;;  %v2854_v60 = vshll.u32 %v10280_v58, 16 }
 0x252   : > { %v3098_v20 = vpop.f32.mrf.mxu2  ;;  %v4354_v1 = vor.u32 %v4353_v23, %v4350_v14 }
 0x253   : > { %v2494_v49 = vpop.f32.mrf.mxu3  ;;  %v11200_v63 = vadd.f32 %v3098_v20, %v2489_v19  ;;  %v2853_v35 = vrot.slane %v2851_v28, 3  ;;  %v2856_v40 = vrot.slane %v2854_v60, 4  ;;  %v2644_v28 = vshrl.u32 %v10234_v30, 16 }
 0x254   : > { %v4355_v4 = vsel %vm2589_vm4, %v4345_v51, %v4354_v1  ;;  %v2647_v60 = vshll.u32 %v10234_v30, 16 }
 0x255   : > { %12774 = vst [vmem:[#allocation29_spill] sm:$0xff] %v11200_v63  ;;  %v11202_v39 = vpop.f32.mrf.mxu1  ;;  %v2857_v58 = vor.u32 %v2856_v40, %v2853_v35 }
 0x256   : > { %v2649_v14 = vrot.slane %v2647_v60, 4 }
 0x257   : > { %v2858_v23 = vsel %vm2589_vm4, %v2848_v48, %v2857_v58 }
 0x259   : > { %v724_v21 = vpop.f32.mrf.mxu0 }
 0x25a   : > { %v725_v10 = vadd.f32 %v11168_v33, %v724_v21  ;;  %v3100_v19 = vpop.f32.mrf.mxu2  ;;  %v10635_v21 = vld [vmem:[#allocation2 + $0x8c] sm:$0xff]  }
 0x25b   : > { %v2496_v13 = vpop.f32.mrf.mxu3  ;;  %v11207_v20 = vadd.f32 %v3100_v19, %v2491_v52  ;;  %v4357_v51 = vshrl.u32 %v10635_v21, 16  ;;  %v4360_v35 = vshll.u32 %v10635_v21, 16 }
 0x25c   : > { %v800_v57 = vmax.f32 %v725_v10, 0.0  ;;  %8710 = vmatmul.msk.bf16.gmra.mxu0 %vm2288_vm3, %v2642_v5 }
 0x25d   : > { %12775 = vst [vmem:[#allocation30_spill] sm:$0xff] %v11207_v20  ;;  %v11209_v34 = vpop.f32.mrf.mxu1  ;;  %v4362_v48 = vrot.slane %v4360_v35, 4 }
 0x25e   : > { %v1970_v31 = vpack.c.bf16 %v800_v57, %v800_v57  ;;  %v2646_v57 = vrot.slane %v2644_v28, 3 }
 0x25f   : > { %8734 = vmatmul.msk.bf16.gmra.mxu2 %vm2288_vm3, %v2858_v23 }
 0x260   : > { %2034 = vst.msk [vmem:[#allocation2 + $0x100] sm:$0xf] %vm1897_vm2, %v1970_v31  ;;  %8695 = vmatmul.msk.bf16.gmra.mxu3 %vm2288_vm3, %v9995_v53  ;;  %8934 = vmatmul.msk.bf16.gmra.mxu1 %vm2288_vm3, %v4355_v4  ;;  %v2650_v31 = vor.u32 %v2649_v14, %v2646_v57  ;;  %v4359_v4 = vrot.slane %v4357_v51, 3 }
 0x261   : > { %v726_v40 = vpop.f32.mrf.mxu0 }
 0x262   : > { %v727_v6 = vadd.f32 %v11168_v33, %v726_v40  ;;  %v3103_v5 = vpop.f32.mrf.mxu2  ;;  %v2651_v60 = vsel %vm2589_vm4, %v2641_v44, %v2650_v31  ;;  %v4363_v21 = vor.u32 %v4362_v48, %v4359_v4  ;;  %v10637_v44 = vld [vmem:[#allocation2 + $0x94] sm:$0xff]  }
 0x263   : > { %v2499_v52 = vpop.f32.mrf.mxu3  ;;  %v11218_v30 = vadd.f32 %v3103_v5, %v2494_v49  ;;  %v10236_v49 = vld [vmem:[#allocation2 + $0x44] sm:$0xff]  }
 0x264   : > { %v801_v10 = vmax.f32 %v727_v6, 0.0  ;;  %v4364_v35 = vsel %vm2589_vm4, %v4354_v1, %v4363_v21 }
 0x265   : > { %12776 = vst [vmem:[#allocation31_spill] sm:$0xff] %v11218_v30  ;;  %v11220_v19 = vpop.f32.mrf.mxu1 }
 0x266   : > { %v1971_v53 = vpack.c.bf16 %v801_v10, %v801_v10 }
 0x267   : > { %v10282_v20 = vld [vmem:[#allocation2 + $0xfc] sm:$0xff]  }
 0x268   : > { %2035 = vst.msk [vmem:[#allocation2 + $0x104] sm:$0xf] %vm1897_vm2, %v1971_v53  ;;  %v2860_v40 = vshrl.u32 %v10282_v20, 16  ;;  %v2863_v63 = vshll.u32 %v10282_v20, 16  ;;  %v2653_v53 = vshrl.u32 %v10236_v49, 16 }
 0x269   : > { %v729_v23 = vpop.f32.mrf.mxu0 }
 0x26a   : > { %v2862_v6 = vrot.slane %v2860_v40, 3  ;;  %v2865_v36 = vrot.slane %v2863_v63, 4  ;;  %v3105_v5 = vpop.f32.mrf.mxu2  ;;  %v2656_v23 = vshll.u32 %v10236_v49, 16  ;;  %v2655_v48 = vrot.slane %v2653_v53, 3 }
 0x26b   : > { %v2501_v28 = vpop.f32.mrf.mxu3  ;;  %v11225_v10 = vadd.f32 %v3105_v5, %v2496_v13 }
 0x26c   : > { %8711 = vmatmul.msk.bf16.gmra.mxu0 %vm2288_vm3, %v2651_v60  ;;  %v2866_v14 = vor.u32 %v2865_v36, %v2862_v6  ;;  %v2658_v40 = vrot.slane %v2656_v23, 4  ;;  %v4366_v36 = vshrl.u32 %v10637_v44, 16  ;;  %v4369_v60 = vshll.u32 %v10637_v44, 16 }
 0x26d   : > { %12777 = vst [vmem:[#allocation32_spill] sm:$0xff] %v11225_v10  ;;  %v11227_v57 = vpop.f32.mrf.mxu1 }
 0x26e   : > { %12778 = vst [vmem:[#allocation33_spill] sm:$0xff] %v11227_v57  ;;  %v2867_v20 = vsel %vm2589_vm4, %v2857_v58, %v2866_v14  ;;  %v11238_v10 = vor.u32 %v2658_v40, %v2655_v48  ;;  %v9543_v48 = vld [vmem:[%s12745_s3 + $0x58] sm:$0xff] }
 0x26f   : > { %v9996_v51 = vld [vmem:[#allocation2 + $0x100] sm:$0xff]   ;;  %8735 = vmatmul.msk.bf16.gmra.mxu2 %vm2288_vm3, %v2867_v20  ;;  %v9997_v20 = vld [vmem:[#allocation2 + $0x108] sm:$0xff]   ;;  %5853 = vmatpush.bf16.msra.mxu3 %v9543_v48 }
 0x270   : > { %8696 = vmatmul.msk.bf16.gmra.mxu3 %vm2288_vm3, %v9996_v51  ;;  %8935 = vmatmul.msk.bf16.gmra.mxu1 %vm2288_vm3, %v4364_v35  ;;  %v10283_v63 = vld [vmem:[#allocation2 + $0x104] sm:$0xff]   ;;  %v4368_v51 = vrot.slane %v4366_v36, 3  ;;  %v4371_v35 = vrot.slane %v4369_v60, 4  ;;  %v2660_v44 = vsel %vm2589_vm4, %v2650_v31, %v11238_v10  ;;  %v9709_v60 = vunpack.c.h.b16 %v9997_v20  ;;  %v10655_v57 = vld [vmem:[#allocation2 + $0xdc] sm:$0xff]  }
 0x271   : > { %v731_v4 = vpop.f32.mrf.mxu0  ;;  %v2869_v1 = vshrl.u32 %v10283_v63, 16  ;;  %v2872_v5 = vshll.u32 %v10283_v63, 16 }
 0x272   : > { %v3108_v6 = vpop.f32.mrf.mxu2  ;;  %v11245_v63 = vor.u32 %v4371_v35, %v4368_v51 }
 0x273   : > { %v2504_v13 = vpop.f32.mrf.mxu3  ;;  %v11234_v58 = vadd.f32 %v3108_v6, %v2499_v52  ;;  %v2871_v30 = vrot.slane %v2869_v1, 3  ;;  %v2874_v4 = vrot.slane %v2872_v5, 4  ;;  %v10238_v52 = vld [vmem:[#allocation2 + $0x4c] sm:$0xff]  }
 0x274   : > { %v9472_v5 = vld [vmem:[#allocation2 + $0x10] sm:$0xff]  ;;  %v4373_v51 = vsel %vm2589_vm4, %v4363_v21, %v11245_v63  ;;  %v2662_v35 = vshrl.u32 %v10238_v52, 16  ;;  %v9581_v21 = vld [vmem:[%s12745_s3 + $0x88] sm:$0xff] }
 0x275   : > { %12779 = vst [vmem:[#allocation34_spill] sm:$0xff] %v11234_v58  ;;  %v11236_v49 = vpop.f32.mrf.mxu1  ;;  %v11251_v6 = vor.u32 %v2874_v4, %v2871_v30  ;;  %v2665_v58 = vshll.u32 %v10238_v52, 16  ;;  %v3400_v4 = vshll.u32 %v9472_v5, 16  ;;  %7935 = vmatpush.bf16.msra.mxu2 %v9581_v21 }
 0x276   : > { %12780 = vst [vmem:[#allocation35_spill] sm:$0xff] %v11236_v49  ;;  %v2664_v48 = vrot.slane %v2662_v35, 3  ;;  %v9547_v35 = vld [vmem:[%s12745_s3 + $0x78] sm:$0xff] }
 0x277   : > { %v2876_v30 = vsel %vm2589_vm4, %v2866_v14, %v11251_v6  ;;  %7101 = vmatpush.bf16.msra.mxu1 %v9547_v35  ;;  %v10672_v49 = vld [vmem:[#allocation2 + $0x34] sm:$0xff]  }
 0x278   : > { %v6325_v8 = vshll.u32 %v10672_v49, 16 }
 0x279   : > { %v734_v18 = vpop.f32.mrf.mxu0 }
 0x27a   : > { %v735_v53 = vadd.f32 %v11168_v33, %v734_v18  ;;  %v3110_v36 = vpop.f32.mrf.mxu2 }
 0x27b   : > { %v11241_v23 = vpop.f32.mrf.mxu3  ;;  %v11253_v18 = vadd.f32 %v3110_v36, %v2501_v28  ;;  %v4375_v36 = vshrl.u32 %v10639_v62, 16 }
 0x27c   : > { %v804_v40 = vmax.f32 %v735_v53, 0.0  ;;  %8712 = vmatmul.msk.bf16.gmra.mxu0 %vm2288_vm3, %v2660_v44  ;;  %v2588_v53 = vpack.c.b16 %v9709_v60, %v9709_v60  ;;  %v4378_v60 = vshll.u32 %v10639_v62, 16 }
 0x27d   : > { %12781 = vst [vmem:[#allocation36_spill] sm:$0xff] %v11253_v18  ;;  %v11255_v1 = vpop.f32.mrf.mxu1  ;;  %v4377_v62 = vrot.slane %v4375_v36, 3 }
 0x27e   : > { %12782 = vst [vmem:[#allocation37_spill] sm:$0xff] %v11255_v1  ;;  %v1974_v31 = vpack.c.bf16 %v804_v40, %v804_v40  ;;  %v2667_v40 = vrot.slane %v2665_v58, 4  ;;  %v4380_v56 = vrot.slane %v4378_v60, 4  ;;  %v10250_v1 = vld [vmem:[#allocation2 + $0x7c] sm:$0xff]  }
 0x27f   : > { %8736 = vmatmul.msk.bf16.gmra.mxu2 %vm2288_vm3, %v2876_v30 }
 0x280   : > { %2038 = vst.msk [vmem:[#allocation2 + $0x110] sm:$0xf] %vm1897_vm2, %v1974_v31  ;;  %8697 = vmatmul.msk.bf16.gmra.mxu3 %vm2288_vm3, %v9997_v20  ;;  %8936 = vmatmul.msk.bf16.gmra.mxu1 %vm2288_vm3, %v4373_v51  ;;  %v11269_v20 = vld [vmem:[#allocation2 + $0x18] sm:$0xff]  ;;  %v2878_v31 = vshrl.u32 %v2588_v53, 16  ;;  %v2881_v51 = vshll.u32 %v2588_v53, 16  ;;  %v2668_v26 = vor.u32 %v2667_v40, %v2664_v48 }
 0x281   : > { %v736_v28 = vpop.f32.mrf.mxu0  ;;  %v3405_v9 = vshll.u32 %v11269_v20, 16 }
 0x282   : > { %v737_v44 = vadd.f32 %v11168_v33, %v736_v28  ;;  %v3113_v18 = vpop.f32.mrf.mxu2  ;;  %v3398_v33 = vshrl.u32 %v9472_v5, 16  ;;  %v3402_v28 = vrot.slane %v3400_v4, 1  ;;  %v2880_v53 = vrot.slane %v2878_v31, 3 }
 0x283   : > { %v2509_v52 = vpop.f32.mrf.mxu3  ;;  %v11271_v30 = vadd.f32 %v3113_v18, %v2504_v13  ;;  %v2669_v5 = vsel %vm2589_vm4, %v11238_v10, %v2668_v26  ;;  %v3407_v4 = vrot.slane %v3405_v9, 1  ;;  %v2674_v10 = vshll.u32 %v10240_v38, 16  ;;  %v10641_v9 = vld [vmem:[#allocation2 + $0xa4] sm:$0xff]  }
 0x284   : > { %v805_v14 = vmax.f32 %v737_v44, 0.0  ;;  %v2883_v44 = vrot.slane %v2881_v51, 4  ;;  %v3403_v18 = vor.u32 %v3402_v28, %v3398_v33 }
 0x285   : > { %12783 = vst [vmem:[#allocation38_spill] sm:$0xff] %v11271_v30  ;;  %v11273_v42 = vpop.f32.mrf.mxu1  ;;  %v4381_v30 = vor.u32 %v4380_v56, %v4377_v62  ;;  %v2676_v35 = vrot.slane %v2674_v10, 4  ;;  %v4384_v62 = vshrl.u32 %v10641_v9, 16 }
 0x286   : > { %12784 = vst [vmem:[#allocation39_spill] sm:$0xff] %v11273_v42  ;;  %v1975_v58 = vpack.c.bf16 %v805_v14, %v805_v14  ;;  %v2884_v40 = vor.u32 %v2883_v44, %v2880_v53  ;;  %v3408_v31 = vsel %vm3396_vm5, %v3403_v18, %v3407_v4  ;;  %v2671_v14 = vshrl.u32 %v10240_v38, 16  ;;  %v10248_v42 = vld [vmem:[#allocation2 + $0x74] sm:$0xff]  }
 0x287   : > { %v4382_v51 = vsel %vm2589_vm4, %v11245_v63, %v4381_v30  ;;  %v4387_v53 = vshll.u32 %v10641_v9, 16  ;;  %v10242_v9 = vld [vmem:[#allocation2 + $0x5c] sm:$0xff]  }
 0x288   : > { %2039 = vst.msk [vmem:[#allocation2 + $0x114] sm:$0xf] %vm1897_vm2, %v1975_v58  ;;  %v2885_v56 = vsel %vm2589_vm4, %v11251_v6, %v2884_v40  ;;  %v2673_v28 = vrot.slane %v2671_v14, 3  ;;  %v9474_v58 = vld [vmem:[#allocation2 + $0x20] sm:$0xff] }
 0x289   : > { %v739_v13 = vpop.f32.mrf.mxu0  ;;  %v4389_v6 = vrot.slane %v4387_v53, 4  ;;  %v10643_v53 = vld [vmem:[#allocation2 + $0xac] sm:$0xff]  }
 0x28a   : > { %v3115_v48 = vpop.f32.mrf.mxu2  ;;  %v3409_v13 = vshrl.u32 %v11269_v20, 16  ;;  %v2677_v18 = vor.u32 %v2676_v35, %v2673_v28  ;;  %v2680_v35 = vshrl.u32 %v10242_v9, 16 }
 0x28b   : > { %v2511_v21 = vpop.f32.mrf.mxu3  ;;  %v11284_v36 = vadd.f32 %v3115_v48, %v11241_v23  ;;  %v4386_v48 = vrot.slane %v4384_v62, 3  ;;  %v2683_v62 = vshll.u32 %v10242_v9, 16 }
 0x28c   : > { %8713 = vmatmul.msk.bf16.gmra.mxu0 %vm2288_vm3, %v2669_v5  ;;  %v3413_v5 = vshll.u32 %v9474_v58, 16  ;;  %v3411_v14 = vor.u32 %v3409_v13, %v3407_v4  ;;  %v2682_v13 = vrot.slane %v2680_v35, 3 }
 0x28d   : > { %12785 = vst [vmem:[#allocation40_spill] sm:$0xff] %v11284_v36  ;;  %v11286_v60 = vpop.f32.mrf.mxu1  ;;  %v3417_v36 = vshrl.u32 %v9474_v58, 16 }
 0x28e   : > { %12786 = vst [vmem:[#allocation41_spill] sm:$0xff] %v11286_v60  ;;  %v3415_v10 = vrot.slane %v3413_v5, 1  ;;  %v2685_v5 = vrot.slane %v2683_v62, 4  ;;  %v10246_v60 = vld [vmem:[#allocation2 + $0x6c] sm:$0xff]  }
 0x28f   : > { %8737 = vmatmul.msk.bf16.gmra.mxu2 %vm2288_vm3, %v2885_v56  ;;  %v4390_v56 = vor.u32 %v4389_v6, %v4386_v48  ;;  %v9475_v48 = vld [vmem:[#allocation2 + $0x28] sm:$0xff]  ;;  %v4393_v6 = vshrl.u32 %v10643_v53, 16 }
 0x290   : > { %8878 = vmatmul.msk.bf16.vlgmr.msrb.gmra.mxu3 %vm2288_vm3, %v3408_v31  ;;  %8937 = vmatmul.msk.bf16.gmra.mxu1 %vm2288_vm3, %v4382_v51  ;;  %v2678_v51 = vsel %vm2589_vm4, %v2668_v26, %v2677_v18  ;;  %v3416_v20 = vsel %vm3396_vm5, %v3411_v14, %v3415_v10  ;;  %v10157_v26 = vld [vmem:[#allocation2 + $0x20] sm:$0xff]   ;;  %v3419_v35 = vor.u32 %v3417_v36, %v3415_v10 }
 0x291   : > { %v741_v33 = vpop.f32.mrf.mxu0  ;;  %v4391_v28 = vsel %vm2589_vm4, %v4381_v30, %v4390_v56 }
 0x292   : > { %v3118_v63 = vpop.f32.mrf.mxu2 }
 0x293   : > { %v2514_v23 = vpop.f32.mrf.mxu3  ;;  %v11296_v44 = vadd.f32 %v3118_v63, %v2509_v52 }
 0x295   : > { %12787 = vst [vmem:[#allocation42_spill] sm:$0xff] %v11296_v44  ;;  %v11298_v38 = vpop.f32.mrf.mxu1 }
 0x296   : > { %12788 = vst [vmem:[#allocation43_spill] sm:$0xff] %v11298_v38  ;;  %v10244_v38 = vld [vmem:[#allocation2 + $0x64] sm:$0xff]  }
 0x297   : > { %v2689_v58 = vshrl.u32 %v10244_v38, 16 }
 0x299   : > { %v11301_v40 = vpop.f32.mrf.mxu0 }
 0x29a   : > { %v3120_v52 = vpop.f32.mrf.mxu2 }
 0x29b   : > { %v2516_v31 = vpop.f32.mrf.mxu3  ;;  %v11305_v33 = vadd.f32 %v3120_v52, %v2511_v21  ;;  %v2686_v52 = vor.u32 %v2685_v5, %v2682_v13  ;;  %v10158_v13 = vld [vmem:[#allocation2 + $0x28] sm:$0xff]  }
 0x29c   : > { %8714 = vmatmul.msk.bf16.gmra.mxu0 %vm2288_vm3, %v2678_v51  ;;  %v4396_v51 = vshll.u32 %v10643_v53, 16 }
 0x29d   : > { %12789 = vst [vmem:[#allocation44_spill] sm:$0xff] %v11305_v33  ;;  %v11307_v63 = vpop.f32.mrf.mxu1  ;;  %v4395_v33 = vrot.slane %v4393_v6, 3 }
 0x29e   : > { %12790 = vst [vmem:[#allocation45_spill] sm:$0xff] %v11307_v63 }
 0x29f   : > { %8966 = vmatmul.msk.bf16.vlgmr.msrb.gmra.mxu2 %vm2288_vm3, %v10157_v26  ;;  %v2687_v26 = vsel %vm2589_vm4, %v2677_v18, %v2686_v52 }
 0x2a0   : > { %8879 = vmatmul.msk.bf16.gmra.mxu3 %vm2288_vm3, %v3416_v20  ;;  %8938 = vmatmul.msk.bf16.gmra.mxu1 %vm2288_vm3, %v4391_v28  ;;  %v3421_v20 = vshll.u32 %v9475_v48, 16  ;;  %v4398_v28 = vrot.slane %v4396_v51, 4  ;;  %v2692_v51 = vshll.u32 %v10244_v38, 16  ;;  %v3425_v38 = vshrl.u32 %v9475_v48, 16 }
 0x2a1   : > { %v11313_v4 = vpop.f32.mrf.mxu0 }
 0x2a2   : > { %v3123_v14 = vpop.f32.mrf.mxu2  ;;  %v3423_v62 = vrot.slane %v3421_v20, 1  ;;  %v4399_v22 = vor.u32 %v4398_v28, %v4395_v33  ;;  %v2694_v10 = vrot.slane %v2692_v51, 4  ;;  %v9476_v33 = vld [vmem:[#allocation2 + $0x30] sm:$0xff] }
 0x2a3   : > { %v2519_v21 = vpop.f32.mrf.mxu3  ;;  %v11316_v30 = vadd.f32 %v3123_v14, %v2514_v23 }
 0x2a4   : > { %v3424_v5 = vsel %vm3396_vm5, %v3419_v35, %v3423_v62  ;;  %v4400_v6 = vsel %vm2589_vm4, %v4390_v56, %v4399_v22 }
 0x2a5   : > { %12791 = vst [vmem:[#allocation46_spill] sm:$0xff] %v11316_v30  ;;  %v11318_v9 = vpop.f32.mrf.mxu1  ;;  %v10645_v30 = vld [vmem:[#allocation2 + $0xb4] sm:$0xff]  }
 0x2a6   : > { %12792 = vst [vmem:[#allocation47_spill] sm:$0xff] %v11318_v9  ;;  %v4402_v20 = vshrl.u32 %v10645_v30, 16  ;;  %v4405_v28 = vshll.u32 %v10645_v30, 16 }
 0x2a9   : > { %v11320_v44 = vpop.f32.mrf.mxu0 }
 0x2aa   : > { %v3125_v23 = vpop.f32.mrf.mxu2 }
 0x2ab   : > { %v2521_v63 = vpop.f32.mrf.mxu3  ;;  %v11324_v53 = vadd.f32 %v3125_v23, %v2516_v31  ;;  %v2691_v31 = vrot.slane %v2689_v58, 3  ;;  %v3427_v58 = vor.u32 %v3425_v38, %v3423_v62 }
 0x2ac   : > { %8715 = vmatmul.msk.bf16.gmra.mxu0 %vm2288_vm3, %v2687_v26 }
 0x2ad   : > { %12793 = vst [vmem:[#allocation48_spill] sm:$0xff] %v11324_v53  ;;  %v11326_v14 = vpop.f32.mrf.mxu1  ;;  %v2695_v23 = vor.u32 %v2694_v10, %v2691_v31  ;;  %v4404_v53 = vrot.slane %v4402_v20, 3  ;;  %v2698_v10 = vshrl.u32 %v10246_v60, 16  ;;  %v2701_v20 = vshll.u32 %v10246_v60, 16 }
 0x2ae   : > { %12794 = vst [vmem:[#allocation49_spill] sm:$0xff] %v11326_v14 }
 0x2af   : > { %8967 = vmatmul.msk.bf16.gmra.mxu2 %vm2288_vm3, %v10158_v13  ;;  %v2696_v13 = vsel %vm2589_vm4, %v2686_v52, %v2695_v23  ;;  %v10159_v52 = vld [vmem:[#allocation2 + $0x30] sm:$0xff]   ;;  %v2703_v38 = vrot.slane %v2701_v20, 4 }
 0x2b0   : > { %8880 = vmatmul.msk.bf16.gmra.mxu3 %vm2288_vm3, %v3424_v5  ;;  %8939 = vmatmul.msk.bf16.gmra.mxu1 %vm2288_vm3, %v4400_v6  ;;  %v3429_v5 = vshll.u32 %v9476_v33, 16  ;;  %v4407_v6 = vrot.slane %v4405_v28, 4  ;;  %v10647_v28 = vld [vmem:[#allocation2 + $0xbc] sm:$0xff]  }
 0x2b1   : > { %v11332_v36 = vpop.f32.mrf.mxu0 }
 0x2b2   : > { %v3128_v26 = vpop.f32.mrf.mxu2  ;;  %v3431_v51 = vrot.slane %v3429_v5, 1  ;;  %v4408_v0 = vor.u32 %v4407_v6, %v4404_v53  ;;  %v2700_v53 = vrot.slane %v2698_v10, 3  ;;  %v9477_v5 = vld [vmem:[#allocation2 + $0x38] sm:$0xff]  ;;  %v4411_v6 = vshrl.u32 %v10647_v28, 16 }
 0x2b3   : > { %v2524_v18 = vpop.f32.mrf.mxu3  ;;  %v11335_v35 = vadd.f32 %v3128_v26, %v2519_v21 }
 0x2b4   : > { %v3432_v48 = vsel %vm3396_vm5, %v3427_v58, %v3431_v51  ;;  %v4409_v31 = vsel %vm2589_vm4, %v4399_v22, %v4408_v0 }
 0x2b5   : > { %12795 = vst [vmem:[#allocation50_spill] sm:$0xff] %v11335_v35  ;;  %v11337_v56 = vpop.f32.mrf.mxu1 }
 0x2b6   : > { %12796 = vst [vmem:[#allocation51_spill] sm:$0xff] %v11337_v56 }
 0x2b9   : > { %v11339_v14 = vpop.f32.mrf.mxu0 }
 0x2ba   : > { %v3130_v21 = vpop.f32.mrf.mxu2 }
 0x2bb   : > { %v2526_v9 = vpop.f32.mrf.mxu3  ;;  %v11343_v30 = vadd.f32 %v3130_v21, %v2521_v63  ;;  %v2704_v21 = vor.u32 %v2703_v38, %v2700_v53  ;;  %v10160_v53 = vld [vmem:[#allocation2 + $0x38] sm:$0xff]  }
 0x2bc   : > { %8716 = vmatmul.msk.bf16.gmra.mxu0 %vm2288_vm3, %v2696_v13  ;;  %v4414_v13 = vshll.u32 %v10647_v28, 16 }
 0x2bd   : > { %12797 = vst [vmem:[#allocation52_spill] sm:$0xff] %v11343_v30  ;;  %v11345_v26 = vpop.f32.mrf.mxu1  ;;  %v4413_v30 = vrot.slane %v4411_v6, 3 }
 0x2be   : > { %12798 = vst [vmem:[#allocation53_spill] sm:$0xff] %v11345_v26  ;;  %v3433_v26 = vshrl.u32 %v9476_v33, 16  ;;  %v2707_v33 = vshrl.u32 %v10248_v42, 16 }
 0x2bf   : > { %8968 = vmatmul.msk.bf16.gmra.mxu2 %vm2288_vm3, %v10159_v52  ;;  %v2705_v52 = vsel %vm2589_vm4, %v2695_v23, %v2704_v21 }
 0x2c0   : > { %8881 = vmatmul.msk.bf16.gmra.mxu3 %vm2288_vm3, %v3432_v48  ;;  %8940 = vmatmul.msk.bf16.gmra.mxu1 %vm2288_vm3, %v4409_v31  ;;  %v3437_v48 = vshll.u32 %v9477_v5, 16  ;;  %v4416_v31 = vrot.slane %v4414_v13, 4  ;;  %v3435_v10 = vor.u32 %v3433_v26, %v3431_v51  ;;  %v2710_v13 = vshll.u32 %v10248_v42, 16  ;;  %v9478_v26 = vld [vmem:[#allocation2 + $0x40] sm:$0xff] }
 0x2c1   : > { %v11351_v62 = vpop.f32.mrf.mxu0  ;;  %v2709_v51 = vrot.slane %v2707_v33, 3  ;;  %v3441_v42 = vshrl.u32 %v9477_v5, 16 }
 0x2c2   : > { %v3133_v58 = vpop.f32.mrf.mxu2  ;;  %v3439_v20 = vrot.slane %v3437_v48, 1  ;;  %v4417_v45 = vor.u32 %v4416_v31, %v4413_v30  ;;  %v2712_v30 = vrot.slane %v2710_v13, 4 }
 0x2c3   : > { %v2529_v63 = vpop.f32.mrf.mxu3  ;;  %v11354_v22 = vadd.f32 %v3133_v58, %v2524_v18 }
 0x2c4   : > { %v3440_v38 = vsel %vm3396_vm5, %v3435_v10, %v3439_v20  ;;  %v4418_v6 = vsel %vm2589_vm4, %v4408_v0, %v4417_v45  ;;  %v3443_v33 = vor.u32 %v3441_v42, %v3439_v20 }
 0x2c5   : > { %12799 = vst [vmem:[#allocation54_spill] sm:$0xff] %v11354_v22  ;;  %v11356_v60 = vpop.f32.mrf.mxu1  ;;  %v10649_v22 = vld [vmem:[#allocation2 + $0xc4] sm:$0xff]  }
 0x2c6   : > { %12800 = vst [vmem:[#allocation55_spill] sm:$0xff] %v11356_v60  ;;  %v4420_v48 = vshrl.u32 %v10649_v22, 16  ;;  %v4423_v31 = vshll.u32 %v10649_v22, 16 }
 0x2c9   : > { %v11358_v35 = vpop.f32.mrf.mxu0 }
 0x2ca   : > { %v3135_v18 = vpop.f32.mrf.mxu2 }
 0x2cb   : > { %v2531_v56 = vpop.f32.mrf.mxu3  ;;  %v11362_v28 = vadd.f32 %v3135_v18, %v2526_v9  ;;  %v2713_v18 = vor.u32 %v2712_v30, %v2709_v51  ;;  %v2716_v30 = vshrl.u32 %v10250_v1, 16 }
 0x2cc   : > { %8717 = vmatmul.msk.bf16.gmra.mxu0 %vm2288_vm3, %v2705_v52 }
 0x2cd   : > { %12801 = vst [vmem:[#allocation56_spill] sm:$0xff] %v11362_v28  ;;  %v11364_v58 = vpop.f32.mrf.mxu1  ;;  %v4422_v28 = vrot.slane %v4420_v48, 3  ;;  %v2719_v48 = vshll.u32 %v10250_v1, 16 }
 0x2ce   : > { %12802 = vst [vmem:[#allocation57_spill] sm:$0xff] %v11364_v58 }
 0x2cf   : > { %8969 = vmatmul.msk.bf16.gmra.mxu2 %vm2288_vm3, %v10160_v53  ;;  %v2714_v53 = vsel %vm2589_vm4, %v2704_v21, %v2713_v18  ;;  %v10161_v21 = vld [vmem:[#allocation2 + $0x40] sm:$0xff]   ;;  %v2721_v42 = vrot.slane %v2719_v48, 4 }
 0x2d0   : > { %8882 = vmatmul.msk.bf16.gmra.mxu3 %vm2288_vm3, %v3440_v38  ;;  %8941 = vmatmul.msk.bf16.gmra.mxu1 %vm2288_vm3, %v4418_v6  ;;  %v3445_v38 = vshll.u32 %v9478_v26, 16  ;;  %v4425_v6 = vrot.slane %v4423_v31, 4  ;;  %v10651_v31 = vld [vmem:[#allocation2 + $0xcc] sm:$0xff]  }
 0x2d1   : > { %v11370_v23 = vpop.f32.mrf.mxu0 }
 0x2d2   : > { %v3138_v52 = vpop.f32.mrf.mxu2  ;;  %v3447_v13 = vrot.slane %v3445_v38, 1  ;;  %v4426_v27 = vor.u32 %v4425_v6, %v4422_v28  ;;  %v2718_v28 = vrot.slane %v2716_v30, 3  ;;  %v9479_v38 = vld [vmem:[#allocation2 + $0x48] sm:$0xff]  ;;  %v4429_v6 = vshrl.u32 %v10651_v31, 16  ;;  %v9544_v30 = vld [vmem:[%s12745_s3 + $0x60] sm:$0xff] }
 0x2d3   : > { %v2534_v9 = vpop.f32.mrf.mxu3  ;;  %v11373_v10 = vadd.f32 %v3138_v52, %v2529_v63 }
 0x2d4   : > { %v3448_v5 = vsel %vm3396_vm5, %v3443_v33, %v3447_v13  ;;  %v4427_v51 = vsel %vm2589_vm4, %v4417_v45, %v4426_v27  ;;  %v9545_v45 = vld [vmem:[%s12745_s3 + $0x68] sm:$0xff] }
 0x2d5   : > { %12803 = vst [vmem:[#allocation58_spill] sm:$0xff] %v11373_v10  ;;  %v11375_v0 = vpop.f32.mrf.mxu1  ;;  %6723 = vmatpush.bf16.msra.mxu0 %v9545_v45 }
 0x2d6   : > { %12804 = vst [vmem:[#allocation59_spill] sm:$0xff] %v11375_v0 }
 0x2d9   : > { %v11377_v58 = vpop.f32.mrf.mxu0  ;;  %6724 = vmatpush.bf16.msra.mxu0 %v9544_v30 }
 0x2da   : > { %v3140_v63 = vpop.f32.mrf.mxu2 }
 0x2db   : > { %v2536_v60 = vpop.f32.mrf.mxu3  ;;  %v11381_v22 = vadd.f32 %v3140_v63, %v2531_v56 }
 0x2dc   : > { %8718 = vmatmul.msk.bf16.gmra.mxu0 %vm2288_vm3, %v2714_v53  ;;  %v4432_v53 = vshll.u32 %v10651_v31, 16  ;;  %v3449_v31 = vshrl.u32 %v9478_v26, 16  ;;  %v10653_v26 = vld [vmem:[#allocation2 + $0xd4] sm:$0xff]  }
 0x2dd   : > { %12805 = vst [vmem:[#allocation60_spill] sm:$0xff] %v11381_v22  ;;  %v11383_v52 = vpop.f32.mrf.mxu1  ;;  %v4431_v22 = vrot.slane %v4429_v6, 3 }
 0x2de   : > { %12806 = vst [vmem:[#allocation61_spill] sm:$0xff] %v11383_v52 }
 0x2df   : > { %8970 = vmatmul.msk.bf16.gmra.mxu2 %vm2288_vm3, %v10161_v21  ;;  %v4434_v21 = vrot.slane %v4432_v53, 4  ;;  %v10162_v53 = vld [vmem:[#allocation2 + $0x48] sm:$0xff]  }
 0x2e0   : > { %8883 = vmatmul.msk.bf16.gmra.mxu3 %vm2288_vm3, %v3448_v5  ;;  %8942 = vmatmul.msk.bf16.gmra.mxu1 %vm2288_vm3, %v4427_v51  ;;  %v2722_v5 = vor.u32 %v2721_v42, %v2718_v28  ;;  %v3453_v51 = vshll.u32 %v9479_v38, 16 }
 0x2e1   : > { %v11389_v20 = vpop.f32.mrf.mxu0 }
 0x2e2   : > { %v3143_v33 = vpop.f32.mrf.mxu2  ;;  %v2723_v52 = vsel %vm2589_vm4, %v2713_v18, %v2722_v5 }
 0x2e3   : > { %v2539_v56 = vpop.f32.mrf.mxu3  ;;  %v11395_v1 = vadd.f32 %v3143_v33, %v2534_v9  ;;  %v3451_v9 = vor.u32 %v3449_v31, %v3447_v13  ;;  %v3455_v33 = vrot.slane %v3453_v51, 1  ;;  %v3457_v31 = vshrl.u32 %v9479_v38, 16 }
 0x2e5   : > { %12807 = vst [vmem:[#allocation62_spill] sm:$0xff] %v11395_v1  ;;  %v11397_v63 = vpop.f32.mrf.mxu1  ;;  %v4435_v1 = vor.u32 %v4434_v21, %v4431_v22  ;;  %v3456_v45 = vsel %vm3396_vm5, %v3451_v9, %v3455_v33  ;;  %v9480_v22 = vld [vmem:[#allocation2 + $0x50] sm:$0xff]  ;;  %v3459_v0 = vor.u32 %v3457_v31, %v3455_v33 }
 0x2e6   : > { %12808 = vst [vmem:[#allocation63_spill] sm:$0xff] %v11397_v63 }
 0x2e7   : > { %v4436_v63 = vsel %vm2589_vm4, %v4426_v27, %v4435_v1  ;;  %v3461_v27 = vshll.u32 %v9480_v22, 16 }
 0x2e9   : > { %v11402_v48 = vpop.f32.mrf.mxu0  ;;  %v3463_v17 = vrot.slane %v3461_v27, 1  ;;  %v6327_v27 = vrot.slane %v6325_v8, 4 }
 0x2ea   : > { %v3145_v28 = vpop.f32.mrf.mxu2 }
 0x2eb   : > { %v2541_v10 = vpop.f32.mrf.mxu3  ;;  %v11406_v42 = vadd.f32 %v3145_v28, %v2536_v60  ;;  %v4438_v60 = vshrl.u32 %v10653_v26, 16 }
 0x2ec   : > { %8719 = vmatmul.msk.bf16.gmra.mxu0 %vm2288_vm3, %v2723_v52  ;;  %v4441_v52 = vshll.u32 %v10653_v26, 16 }
 0x2ed   : > { %12809 = vst [vmem:[#allocation64_spill] sm:$0xff] %v11406_v42  ;;  %v11408_v6 = vpop.f32.mrf.mxu1  ;;  %v4440_v9 = vrot.slane %v4438_v60, 3  ;;  %v10670_v42 = vld [vmem:[#allocation2 + $0x2c] sm:$0xf0]  }
 0x2ee   : > { %12810 = vst [vmem:[#allocation65_spill] sm:$0xff] %v11408_v6  ;;  %v4443_v28 = vrot.slane %v4441_v52, 4  ;;  %v3464_v52 = vsel %vm3396_vm5, %v3459_v0, %v3463_v17  ;;  %v9481_v0 = vld [vmem:[#allocation2 + $0x58] sm:$0xff] }
 0x2ef   : > { %8971 = vmatmul.msk.bf16.gmra.mxu2 %vm2288_vm3, %v10162_v53  ;;  %v2732_v53 = vsel %vm2589_vm4, %v2722_v5, %v11017_v46  ;;  %v10163_v46 = vld [vmem:[#allocation2 + $0x50] sm:$0xff]  }
 0x2f0   : > { %8884 = vmatmul.msk.bf16.gmra.mxu3 %vm2288_vm3, %v3456_v45  ;;  %8943 = vmatmul.msk.bf16.gmra.mxu1 %vm2288_vm3, %v4436_v63  ;;  %v10445_v63 = vld [vmem:[#allocation2 + $0x2c] sm:$0x8]  ;;  %v4444_v26 = vor.u32 %v4443_v28, %v4440_v9  ;;  %v4447_v9 = vshrl.u32 %v10655_v57, 16 }
 0x2f1   : > { %v11414_v18 = vpop.f32.mrf.mxu0  ;;  %v10446_v60 = vor.u32 %v10670_v42, %v10445_v63 }
 0x2f2   : > { %v3148_v51 = vpop.f32.mrf.mxu2 }
 0x2f3   : > { %v2544_v13 = vpop.f32.mrf.mxu3  ;;  %v11417_v21 = vadd.f32 %v3148_v51, %v2539_v56  ;;  %v6317_v33 = vshll.u32 %v10446_v60, 16 }
 0x2f5   : > { %12811 = vst [vmem:[#allocation66_spill] sm:$0xff] %v11417_v21  ;;  %v11419_v30 = vpop.f32.mrf.mxu1  ;;  %v4445_v21 = vsel %vm2589_vm4, %v4435_v1, %v4444_v26  ;;  %v4450_v1 = vshll.u32 %v10655_v57, 16 }
 0x2f6   : > { %12812 = vst [vmem:[#allocation67_spill] sm:$0xff] %v11419_v30  ;;  %v6322_v30 = vshrl.u32 %v10672_v49, 16 }
 0x2f8   : > { %v6324_v42 = vrot.slane %v6322_v30, 3  ;;  %v10674_v30 = vld [vmem:[#allocation2 + $0x3c] sm:$0xff]  }
 0x2f9   : > { %v11421_v45 = vpop.f32.mrf.mxu0 }
 0x2fa   : > { %12813 = vst [vmem:[#allocation68_spill] sm:$0xff] %v11421_v45  ;;  %v3150_v56 = vpop.f32.mrf.mxu2 }
 0x2fb   : > { %v2546_v6 = vpop.f32.mrf.mxu3  ;;  %v11426_v51 = vadd.f32 %v3150_v56, %v2541_v10  ;;  %v6314_v10 = vshrl.u32 %v10446_v60, 16  ;;  %v6328_v56 = vor.u32 %v6327_v27, %v6324_v42  ;;  %v10164_v42 = vld [vmem:[#allocation2 + $0x58] sm:$0xff]   ;;  %v6331_v27 = vshrl.u32 %v10674_v30, 16 }
 0x2fc   : > { %8720 = vmatmul.msk.bf16.gmra.mxu0 %vm2288_vm3, %v2732_v53 }
 0x2fd   : > { %12814 = vst [vmem:[#allocation69_spill] sm:$0xff] %v11426_v51  ;;  %v11428_v38 = vpop.f32.mrf.mxu1  ;;  %v6316_v53 = vrot.slane %v6314_v10, 3  ;;  %v4449_v51 = vrot.slane %v4447_v9, 3  ;;  %v6334_v9 = vshll.u32 %v10674_v30, 16 }
 0x2fe   : > { %12815 = vst [vmem:[#allocation70_spill] sm:$0xff] %v11428_v38  ;;  %v4452_v38 = vrot.slane %v4450_v1, 4 }
 0x2ff   : > { %8972 = vmatmul.msk.bf16.gmra.mxu2 %vm2288_vm3, %v10163_v46 }
 0x300   : > { %8885 = vmatmul.msk.bf16.gmra.mxu3 %vm2288_vm3, %v3464_v52  ;;  %8944 = vmatmul.msk.bf16.gmra.mxu1 %vm2288_vm3, %v4445_v21  ;;  %v6319_v21 = vrot.slane %v6317_v33, 4  ;;  %v3469_v52 = vshll.u32 %v9481_v0, 16 }
 0x301   : > { %v11434_v5 = vpop.f32.mrf.mxu0 }
 0x302   : > { %12816 = vst [vmem:[#allocation71_spill] sm:$0xff] %v11434_v5  ;;  %v3153_v28 = vpop.f32.mrf.mxu2  ;;  %v6320_v60 = vor.u32 %v6319_v21, %v6316_v53  ;;  %v3465_v5 = vshrl.u32 %v9480_v22, 16  ;;  %v3471_v3 = vrot.slane %v3469_v52, 1  ;;  %v10657_v53 = vld [vmem:[#allocation2 + $0xe4] sm:$0xff]  }
 0x303   : > { %v2549_v31 = vpop.f32.mrf.mxu3  ;;  %v11437_v49 = vadd.f32 %v3153_v28, %v2544_v13  ;;  %v4453_v13 = vor.u32 %v4452_v38, %v4449_v51  ;;  %v6336_v51 = vrot.slane %v6334_v9, 4  ;;  %v4456_v21 = vshrl.u32 %v10657_v53, 16 }
 0x304   : > { %v6329_v45 = vsel %vm2589_vm4, %v6320_v60, %v6328_v56  ;;  %v3467_v57 = vor.u32 %v3465_v5, %v3463_v17  ;;  %v9482_v5 = vld [vmem:[#allocation2 + $0x60] sm:$0xff]  ;;  %v4459_v52 = vshll.u32 %v10657_v53, 16 }
 0x305   : > { %12817 = vst [vmem:[#allocation72_spill] sm:$0xff] %v11437_v49  ;;  %v11439_v63 = vpop.f32.mrf.mxu1  ;;  %v4454_v22 = vsel %vm2589_vm4, %v4444_v26, %v4453_v13 }
 0x306   : > { %v3472_v1 = vsel %vm3396_vm5, %v3467_v57, %v3471_v3 }
 0x309   : > { %v11441_v46 = vpop.f32.mrf.mxu0 }
 0x30a   : > { %v3155_v28 = vpop.f32.mrf.mxu2 }
 0x30b   : > { %v2551_v8 = vpop.f32.mrf.mxu3  ;;  %v11445_v10 = vadd.f32 %v3155_v28, %v2546_v6  ;;  %v3004_v6 = vadd.f32 %v11301_v40, %v10921_v7  ;;  %v3006_v7 = vadd.f32 %v11313_v4, %v10926_v12  ;;  %v10676_v40 = vld [vmem:[#allocation2 + $0x44] sm:$0xff]   ;;  %v10659_v4 = vld [vmem:[#allocation2 + $0xec] sm:$0xff]  }
 0x30c   : > { %9182 = vmatmul.msk.bf16.vlgmr.msra.gmra.mxu0 %vm2288_vm3, %v6329_v45  ;;  %v6333_v45 = vrot.slane %v6331_v27, 3 }
 0x30d   : > { %12818 = vst [vmem:[#allocation73_spill] sm:$0xff] %v11445_v10  ;;  %v11447_v33 = vpop.f32.mrf.mxu1  ;;  %v4458_v10 = vrot.slane %v4456_v21, 3  ;;  %v6343_v21 = vshll.u32 %v10676_v40, 16 }
 0x30e   : > { %v6337_v28 = vor.u32 %v6336_v51, %v6333_v45  ;;  %v6340_v51 = vshrl.u32 %v10676_v40, 16  ;;  %v4468_v40 = vshll.u32 %v10659_v4, 16 }
 0x30f   : > { %8973 = vmatmul.msk.bf16.gmra.mxu2 %vm2288_vm3, %v10164_v42  ;;  %v4461_v42 = vrot.slane %v4459_v52, 4 }
 0x310   : > { %8886 = vmatmul.msk.bf16.gmra.mxu3 %vm2288_vm3, %v3472_v1  ;;  %8945 = vmatmul.msk.bf16.gmra.mxu1 %vm2288_vm3, %v4454_v22  ;;  %v3473_v1 = vshrl.u32 %v9481_v0, 16  ;;  %v3477_v22 = vshll.u32 %v9482_v5, 16  ;;  %v6338_v9 = vsel %vm2589_vm4, %v6328_v56, %v6337_v28 }
 0x311   : > { %v11453_v17 = vpop.f32.mrf.mxu0 }
 0x312   : > { %v3158_v26 = vpop.f32.mrf.mxu2  ;;  %v3475_v53 = vor.u32 %v3473_v1, %v3471_v3  ;;  %v10165_v3 = vld [vmem:[#allocation2 + $0x60] sm:$0xff]   ;;  %v6345_v1 = vrot.slane %v6343_v21, 4 }
 0x313   : > { %v3774_v38 = vpop.f32.mrf.mxu3  ;;  %v11458_v30 = vadd.f32 %v3158_v26, %v2549_v31  ;;  %v4462_v31 = vor.u32 %v4461_v42, %v4458_v10  ;;  %v6342_v10 = vrot.slane %v6340_v51, 3 }
 0x314   : > { %v3934_v60 = vadd.f32 %v3774_v38, %v3004_v6  ;;  %v3479_v6 = vrot.slane %v3477_v22, 1 }
 0x315   : > { %12819 = vst [vmem:[#allocation74_spill] sm:$0xff] %v11458_v30  ;;  %v11460_v57 = vpop.f32.mrf.mxu1  ;;  %v4463_v12 = vsel %vm2589_vm4, %v4453_v13, %v4462_v31  ;;  %v4465_v13 = vshrl.u32 %v10659_v4, 16 }
 0x316   : > { %v3480_v52 = vsel %vm3396_vm5, %v3475_v53, %v3479_v6  ;;  %v4804_v42 = vadd.f32 %v11135_v11, %v3934_v60  ;;  %v10678_v60 = vld [vmem:[#allocation2 + $0x4c] sm:$0xff]  }
 0x319   : > { %v11462_v49 = vpop.f32.mrf.mxu0 }
 0x31a   : > { %v3160_v26 = vpop.f32.mrf.mxu2 }
 0x31b   : > { %v3776_v27 = vpop.f32.mrf.mxu3  ;;  %v11468_v0 = vadd.f32 %v3160_v26, %v2551_v8  ;;  %v3009_v8 = vadd.f32 %v11320_v44, %v10930_v16  ;;  %v3481_v16 = vshrl.u32 %v9482_v5, 16  ;;  %v3011_v44 = vadd.f32 %v11332_v36, %v10937_v24  ;;  %v10166_v5 = vld [vmem:[#allocation2 + $0x68] sm:$0xff]  }
 0x31c   : > { %v3935_v38 = vadd.f32 %v3776_v27, %v3006_v7  ;;  %9183 = vmatmul.msk.bf16.gmra.mxu0 %vm2288_vm3, %v6338_v9  ;;  %v9483_v7 = vld [vmem:[#allocation2 + $0x68] sm:$0xff]  ;;  %v6352_v24 = vshll.u32 %v10678_v60, 16 }
 0x31d   : > { %12820 = vst [vmem:[#allocation75_spill] sm:$0xff] %v11468_v0  ;;  %v11470_v45 = vpop.f32.mrf.mxu1  ;;  %v4470_v0 = vrot.slane %v4468_v40, 4  ;;  %v3483_v4 = vor.u32 %v3481_v16, %v3479_v6  ;;  %v6349_v40 = vshrl.u32 %v10678_v60, 16  ;;  %v3014_v6 = vadd.f32 %v11339_v14, %v10942_v29  ;;  %v9484_v16 = vld [vmem:[#allocation2 + $0x70] sm:$0xff] }
 0x31e   : > { %v4805_v21 = vadd.f32 %v11147_v2, %v3935_v38  ;;  %v3016_v14 = vadd.f32 %v11351_v62, %v10945_v32 }
 0x31f   : > { %8974 = vmatmul.msk.bf16.gmra.mxu2 %vm2288_vm3, %v10165_v3  ;;  %v4467_v3 = vrot.slane %v4465_v13, 3  ;;  %v6351_v38 = vrot.slane %v6349_v40, 3 }
 0x320   : > { %8887 = vmatmul.msk.bf16.gmra.mxu3 %vm2288_vm3, %v3480_v52  ;;  %8946 = vmatmul.msk.bf16.gmra.mxu1 %vm2288_vm3, %v4463_v12  ;;  %v6346_v52 = vor.u32 %v6345_v1, %v6342_v10  ;;  %v3485_v12 = vshll.u32 %v9483_v7, 16 }
 0x321   : > { %v11476_v56 = vpop.f32.mrf.mxu0 }
 0x322   : > { %v5022_v9 = vpop.f32.mrf.mxu2  ;;  %v6347_v11 = vsel %vm2589_vm4, %v6337_v28, %v6346_v52 }
 0x323   : > { %v3779_v22 = vpop.f32.mrf.mxu3  ;;  %v11482_v53 = vadd.f32 %v5022_v9, %v4804_v42  ;;  %v10661_v9 = vld [vmem:[#allocation2 + $0xf4] sm:$0xff]  }
 0x324   : > { %v3936_v27 = vadd.f32 %v3779_v22, %v3009_v8  ;;  %v3487_v8 = vrot.slane %v3485_v12, 1  ;;  %v4471_v22 = vor.u32 %v4470_v0, %v4467_v3  ;;  %v6354_v0 = vrot.slane %v6352_v24, 4 }
 0x325   : > { %v11484_v26 = vpop.f32.mrf.mxu1 }
 0x326   : > { %v3488_v36 = vsel %vm3396_vm5, %v3483_v4, %v3487_v8  ;;  %v4472_v28 = vsel %vm2589_vm4, %v4462_v31, %v4471_v22  ;;  %v4806_v3 = vadd.f32 %v11154_v54, %v3936_v27  ;;  %v4477_v31 = vshll.u32 %v10661_v9, 16  ;;  %v10680_v27 = vld [vmem:[#allocation2 + $0x54] sm:$0xff]  }
 0x327   : > { %v6355_v4 = vor.u32 %v6354_v0, %v6351_v38 }
 0x329   : > { %v11486_v30 = vpop.f32.mrf.mxu0  ;;  %v6356_v54 = vsel %vm2589_vm4, %v6346_v52, %v6355_v4  ;;  %v10663_v52 = vld [vmem:[#allocation2 + $0xfc] sm:$0xff]  }
 0x32a   : > { %v5024_v10 = vpop.f32.mrf.mxu2 }
 0x32b   : > { %v3781_v51 = vpop.f32.mrf.mxu3  ;;  %v11493_v1 = vadd.f32 %v5024_v10, %v4805_v21  ;;  %v3489_v10 = vshrl.u32 %v9483_v7, 16 }
 0x32c   : > { %v3937_v42 = vadd.f32 %v3781_v51, %v3011_v44  ;;  %9184 = vmatmul.msk.bf16.gmra.mxu0 %vm2288_vm3, %v6347_v11  ;;  %v4474_v44 = vshrl.u32 %v10661_v9, 16 }
 0x32d   : > { %v11495_v13 = vpop.f32.mrf.mxu1  ;;  %v3491_v9 = vor.u32 %v3489_v10, %v3487_v8 }
 0x32e   : > { %v4807_v24 = vadd.f32 %v11163_v25, %v3937_v42  ;;  %v10167_v25 = vld [vmem:[#allocation2 + $0x70] sm:$0xff]   ;;  %v3019_v42 = vadd.f32 %v11358_v35, %v10950_v37  ;;  %v3497_v37 = vshrl.u32 %v9484_v16, 16  ;;  %v3021_v35 = vadd.f32 %v11370_v23, %v10955_v43 }
 0x32f   : > { %8975 = vmatmul.msk.bf16.gmra.mxu2 %vm2288_vm3, %v10166_v5  ;;  %v3493_v5 = vshll.u32 %v9484_v16, 16  ;;  %v10168_v16 = vld [vmem:[#allocation2 + $0x78] sm:$0xff]  }
 0x330   : > { %8888 = vmatmul.msk.bf16.gmra.mxu3 %vm2288_vm3, %v3488_v36  ;;  %8947 = vmatmul.msk.bf16.gmra.mxu1 %vm2288_vm3, %v4472_v28  ;;  %v4476_v36 = vrot.slane %v4474_v44, 3  ;;  %v4479_v28 = vrot.slane %v4477_v31, 4  ;;  %v6358_v44 = vshrl.u32 %v10680_v27, 16  ;;  %v6361_v31 = vshll.u32 %v10680_v27, 16 }
 0x331   : > { %v11501_v2 = vpop.f32.mrf.mxu0 }
 0x332   : > { %v5027_v60 = vpop.f32.mrf.mxu2  ;;  %v6363_v10 = vrot.slane %v6361_v31, 4 }
 0x333   : > { %v3784_v12 = vpop.f32.mrf.mxu3  ;;  %v11507_v51 = vadd.f32 %v5027_v60, %v4806_v3  ;;  %v6360_v60 = vrot.slane %v6358_v44, 3 }
 0x334   : > { %v3938_v11 = vadd.f32 %v3784_v12, %v3014_v6  ;;  %v3495_v6 = vrot.slane %v3493_v5, 1  ;;  %v4480_v12 = vor.u32 %v4479_v28, %v4476_v36  ;;  %v9485_v28 = vld [vmem:[#allocation2 + $0x78] sm:$0xff] }
 0x335   : > { %v11509_v21 = vpop.f32.mrf.mxu1 }
 0x336   : > { %v3496_v32 = vsel %vm3396_vm5, %v3491_v9, %v3495_v6  ;;  %v4481_v62 = vsel %vm2589_vm4, %v4471_v22, %v4480_v12  ;;  %v4808_v36 = vadd.f32 %v11175_v15, %v3938_v11  ;;  %v4483_v22 = vshrl.u32 %v10663_v52, 16  ;;  %v10682_v11 = vld [vmem:[#allocation2 + $0x5c] sm:$0xff]  }
 0x337   : > { %v6364_v9 = vor.u32 %v6363_v10, %v6360_v60  ;;  %v6370_v43 = vshll.u32 %v10682_v11, 16 }
 0x339   : > { %v11511_v29 = vpop.f32.mrf.mxu0  ;;  %v6365_v15 = vsel %vm2589_vm4, %v6355_v4, %v6364_v9 }
 0x33a   : > { %v5029_v38 = vpop.f32.mrf.mxu2 }
 0x33b   : > { %v3786_v40 = vpop.f32.mrf.mxu3  ;;  %v11518_v7 = vadd.f32 %v5029_v38, %v4807_v24  ;;  %v3501_v38 = vshll.u32 %v9485_v28, 16 }
 0x33c   : > { %v3939_v3 = vadd.f32 %v3786_v40, %v3016_v14  ;;  %9185 = vmatmul.msk.bf16.gmra.mxu0 %vm2288_vm3, %v6356_v54  ;;  %v4486_v14 = vshll.u32 %v10663_v52, 16  ;;  %v3499_v52 = vor.u32 %v3497_v37, %v3495_v6  ;;  %v3024_v6 = vadd.f32 %v11377_v58, %v10960_v47  ;;  %v9486_v37 = vld [vmem:[#allocation2 + $0x80] sm:$0xff] }
 0x33d   : > { %12821 = vst [vmem:[#allocation76_spill] sm:$0xff] %v11518_v7  ;;  %v11520_v0 = vpop.f32.mrf.mxu1  ;;  %v3026_v58 = vadd.f32 %v11389_v20, %v10963_v50 }
 0x33e   : > { %v4809_v31 = vadd.f32 %v11186_v59, %v3939_v3 }
 0x33f   : > { %8976 = vmatmul.msk.bf16.gmra.mxu2 %vm2288_vm3, %v10167_v25 }
 0x340   : > { %8889 = vmatmul.msk.bf16.gmra.mxu3 %vm2288_vm3, %v3496_v32  ;;  %8948 = vmatmul.msk.bf16.gmra.mxu1 %vm2288_vm3, %v4481_v62  ;;  %v4485_v32 = vrot.slane %v4483_v22, 3  ;;  %v4488_v62 = vrot.slane %v4486_v14, 4  ;;  %v6367_v14 = vshrl.u32 %v10682_v11, 16 }
 0x341   : > { %v11526_v8 = vpop.f32.mrf.mxu0 }
 0x342   : > { %v5032_v27 = vpop.f32.mrf.mxu2  ;;  %v6369_v3 = vrot.slane %v6367_v14, 3 }
 0x343   : > { %v3789_v5 = vpop.f32.mrf.mxu3  ;;  %v11532_v40 = vadd.f32 %v5032_v27, %v4808_v36  ;;  %v10665_v27 = vld [vmem:[#allocation2 + $0x104] sm:$0xff]  }
 0x344   : > { %v3940_v54 = vadd.f32 %v3789_v5, %v3019_v42  ;;  %v3503_v42 = vrot.slane %v3501_v38, 1  ;;  %v4489_v5 = vor.u32 %v4488_v62, %v4485_v32  ;;  %v6372_v38 = vrot.slane %v6370_v43, 4 }
 0x345   : > { %12822 = vst [vmem:[#allocation77_spill] sm:$0xff] %v11532_v40  ;;  %v11534_v24 = vpop.f32.mrf.mxu1 }
 0x346   : > { %v3504_v23 = vsel %vm3396_vm5, %v3499_v52, %v3503_v42  ;;  %v4490_v4 = vsel %vm2589_vm4, %v4480_v12, %v4489_v5  ;;  %v4810_v62 = vadd.f32 %v11193_v41, %v3940_v54  ;;  %v4495_v12 = vshll.u32 %v10665_v27, 16  ;;  %v10684_v54 = vld [vmem:[#allocation2 + $0x64] sm:$0xff]  }
 0x347   : > { %v6373_v52 = vor.u32 %v6372_v38, %v6369_v3 }
 0x349   : > { %v11536_v25 = vpop.f32.mrf.mxu0  ;;  %v6374_v41 = vsel %vm2589_vm4, %v6364_v9, %v6373_v52  ;;  %v10667_v9 = vld [vmem:[#allocation2 + $0x10c] sm:$0xff]  }
 0x34a   : > { %v5034_v60 = vpop.f32.mrf.mxu2 }
 0x34b   : > { %v3791_v44 = vpop.f32.mrf.mxu3  ;;  %v11543_v10 = vadd.f32 %v5034_v60, %v4809_v31  ;;  %v3505_v60 = vshrl.u32 %v9485_v28, 16 }
 0x34c   : > { %v3941_v36 = vadd.f32 %v3791_v44, %v3021_v35  ;;  %9186 = vmatmul.msk.bf16.gmra.mxu0 %vm2288_vm3, %v6365_v15  ;;  %v4492_v35 = vshrl.u32 %v10665_v27, 16 }
 0x34d   : > { %12823 = vst [vmem:[#allocation78_spill] sm:$0xff] %v11543_v10  ;;  %v11545_v22 = vpop.f32.mrf.mxu1  ;;  %v3507_v27 = vor.u32 %v3505_v60, %v3503_v42 }
 0x34e   : > { %v4811_v43 = vadd.f32 %v11202_v39, %v3941_v36  ;;  %v10169_v39 = vld [vmem:[#allocation2 + $0x80] sm:$0xff]   ;;  %v3029_v36 = vadd.f32 %v11402_v48, %v10968_v55  ;;  %v3513_v55 = vshrl.u32 %v9486_v37, 16  ;;  %v3031_v48 = vadd.f32 %v11414_v18, %v10973_v61 }
 0x34f   : > { %8977 = vmatmul.msk.bf16.gmra.mxu2 %vm2288_vm3, %v10168_v16  ;;  %v3509_v16 = vshll.u32 %v9486_v37, 16  ;;  %v10668_v37 = vld [vmem:[#allocation2 + $0x114] sm:$0xff]  }
 0x350   : > { %8890 = vmatmul.msk.bf16.gmra.mxu3 %vm2288_vm3, %v3504_v23  ;;  %8949 = vmatmul.msk.bf16.gmra.mxu1 %vm2288_vm3, %v4490_v4  ;;  %v4494_v23 = vrot.slane %v4492_v35, 3  ;;  %v4497_v4 = vrot.slane %v4495_v12, 4  ;;  %v6376_v35 = vshrl.u32 %v10684_v54, 16  ;;  %v6379_v12 = vshll.u32 %v10684_v54, 16 }
 0x351   : > { %v11551_v59 = vpop.f32.mrf.mxu0 }
 0x352   : > { %v5037_v11 = vpop.f32.mrf.mxu2  ;;  %v6381_v60 = vrot.slane %v6379_v12, 4 }
 0x353   : > { %v3794_v32 = vpop.f32.mrf.mxu3  ;;  %v11557_v44 = vadd.f32 %v5037_v11, %v4810_v62  ;;  %v6378_v11 = vrot.slane %v6376_v35, 3 }
 0x354   : > { %v3942_v15 = vadd.f32 %v3794_v32, %v3024_v6  ;;  %v3511_v6 = vrot.slane %v3509_v16, 1  ;;  %v4498_v32 = vor.u32 %v4497_v4, %v4494_v23  ;;  %v9487_v4 = vld [vmem:[#allocation2 + $0x88] sm:$0xff] }
 0x355   : > { %12824 = vst [vmem:[#allocation79_spill] sm:$0xff] %v11557_v44  ;;  %v11559_v31 = vpop.f32.mrf.mxu1 }
 0x356   : > { %v3512_v50 = vsel %vm3396_vm5, %v3507_v27, %v3511_v6  ;;  %v4499_v20 = vsel %vm2589_vm4, %v4489_v5, %v4498_v32  ;;  %v4812_v23 = vadd.f32 %v11209_v34, %v3942_v15  ;;  %v4501_v5 = vshrl.u32 %v10667_v9, 16 }
 0x357   : > { %v6382_v27 = vor.u32 %v6381_v60, %v6378_v11  ;;  %v3515_v12 = vor.u32 %v3513_v55, %v3511_v6 }
 0x359   : > { %v11561_v47 = vpop.f32.mrf.mxu0  ;;  %v6383_v34 = vsel %vm2589_vm4, %v6373_v52, %v6382_v27 }
 0x35a   : > { %v5039_v3 = vpop.f32.mrf.mxu2 }
 0x35b   : > { %v3796_v14 = vpop.f32.mrf.mxu3  ;;  %v11568_v28 = vadd.f32 %v5039_v3, %v4811_v43  ;;  %v3517_v3 = vshll.u32 %v9487_v4, 16 }
 0x35c   : > { %v3943_v62 = vadd.f32 %v3796_v14, %v3026_v58  ;;  %9187 = vmatmul.msk.bf16.gmra.mxu0 %vm2288_vm3, %v6374_v41  ;;  %v4504_v58 = vshll.u32 %v10667_v9, 16 }
 0x35d   : > { %12825 = vst [vmem:[#allocation80_spill] sm:$0xff] %v11568_v28  ;;  %v11570_v38 = vpop.f32.mrf.mxu1  ;;  %v3519_v9 = vrot.slane %v3517_v3, 1  ;;  %v12828_v3 = vld [vmem:[#allocation3_spill] sm:$0xff] }
 0x35e   : > { %v4813_v35 = vadd.f32 %v11220_v19, %v3943_v62  ;;  %v4510_v62 = vshrl.u32 %v10668_v37, 16 }
 0x35f   : > { %8978 = vmatmul.msk.bf16.gmra.mxu2 %vm2288_vm3, %v10169_v39  ;;  %v3520_v61 = vsel %vm3396_vm5, %v3515_v12, %v3519_v9 }
 0x360   : > { %8891 = vmatmul.msk.bf16.gmra.mxu3 %vm2288_vm3, %v3512_v50  ;;  %8950 = vmatmul.msk.bf16.gmra.mxu1 %vm2288_vm3, %v4499_v20  ;;  %v4503_v50 = vrot.slane %v4501_v5, 3  ;;  %v4506_v20 = vrot.slane %v4504_v58, 4  ;;  %v10170_v58 = vld [vmem:[#allocation2 + $0x88] sm:$0xff]  }
 0x361   : > { %v11576_v42 = vpop.f32.mrf.mxu0 }
 0x362   : > { %v5042_v54 = vpop.f32.mrf.mxu2 }
 0x363   : > { %v3799_v16 = vpop.f32.mrf.mxu3  ;;  %v11582_v14 = vadd.f32 %v5042_v54, %v4812_v23  ;;  %v4513_v54 = vshll.u32 %v10668_v37, 16 }
 0x364   : > { %v3944_v41 = vadd.f32 %v3799_v16, %v3029_v36  ;;  %v4507_v36 = vor.u32 %v4506_v20, %v4503_v50  ;;  %v10686_v16 = vld [vmem:[#allocation2 + $0x6c] sm:$0xff]  }
 0x365   : > { %12826 = vst [vmem:[#allocation81_spill] sm:$0xff] %v11582_v14  ;;  %v11584_v43 = vpop.f32.mrf.mxu1  ;;  %v6385_v52 = vshrl.u32 %v10686_v16, 16  ;;  %v6388_v19 = vshll.u32 %v10686_v16, 16  ;;  %v12829_v50 = vld [vmem:[#allocation68_spill] sm:$0xff]  ;;  %v3521_v14 = vshrl.u32 %v9487_v4, 16  ;;  %v9542_v4 = vld [vmem:[%s12745_s3 + $0x50] sm:$0xff] }
 0x366   : > { %v4508_v18 = vsel %vm2589_vm4, %v4498_v32, %v4507_v36  ;;  %v3034_v20 = vadd.f32 %v12829_v50, %v12828_v3  ;;  %5854 = vmatpush.bf16.msra.mxu3 %v9542_v4 }
 0x367   : > { %v6390_v32 = vrot.slane %v6388_v19, 4  ;;  %v12832_v19 = vld [vmem:[#allocation4_spill] sm:$0xff] }
 0x369   : > { %v11586_v39 = vpop.f32.mrf.mxu0 }
 0x36a   : > { %v5044_v11 = vpop.f32.mrf.mxu2 }
 0x36b   : > { %v3801_v15 = vpop.f32.mrf.mxu3  ;;  %v11593_v60 = vadd.f32 %v5044_v11, %v4813_v35  ;;  %v11607_v35 = vld [vmem:[#allocation2 + $0x90] sm:$0xff] }
 0x36c   : > { %v3945_v23 = vadd.f32 %v3801_v15, %v3031_v48  ;;  %9188 = vmatmul.msk.bf16.gmra.mxu0 %vm2288_vm3, %v6383_v34  ;;  %v12830_v48 = vld [vmem:[#allocation33_spill] sm:$0xff]  ;;  %v6387_v15 = vrot.slane %v6385_v52, 3  ;;  %v3525_v3 = vshll.u32 %v11607_v35, 16 }
 0x36d   : > { %12827 = vst [vmem:[#allocation82_spill] sm:$0xff] %v11593_v60  ;;  %v11595_v5 = vpop.f32.mrf.mxu1  ;;  %v4814_v34 = vadd.f32 %v12830_v48, %v3944_v41  ;;  %v10188_v60 = vld [vmem:[#allocation2 + $0x118] sm:$0xff]   ;;  %v12833_v48 = vld [vmem:[#allocation71_spill] sm:$0xff] }
 0x36e   : > { %v6391_v37 = vor.u32 %v6390_v32, %v6387_v15  ;;  %v9837_v52 = vunpack.c.h.b16 %v10188_v60  ;;  %v3036_v28 = vadd.f32 %v12833_v48, %v12832_v19  ;;  %v9580_v19 = vld [vmem:[%s12745_s3 + $0x80] sm:$0xff]  ;;  %v12836_v48 = vld [vmem:[#allocation5_spill] sm:$0xff] }
 0x36f   : > { %8979 = vmatmul.msk.bf16.gmra.mxu2 %vm2288_vm3, %v10170_v58  ;;  %v4515_v58 = vrot.slane %v4513_v54, 4  ;;  %v10688_v54 = vld [vmem:[#allocation2 + $0x74] sm:$0xff]  }
 0x370   : > { %8892 = vmatmul.msk.bf16.gmra.mxu3 %vm2288_vm3, %v3520_v61  ;;  %8951 = vmatmul.msk.bf16.gmra.mxu1 %vm2288_vm3, %v4508_v18  ;;  %v4512_v18 = vrot.slane %v4510_v62, 3  ;;  %v3527_v62 = vrot.slane %v3525_v3, 1 }
 0x371   : > { %v11601_v6 = vpop.f32.mrf.mxu0  ;;  %7936 = vmatpush.bf16.msra.mxu2 %v9580_v19  ;;  %v12840_v19 = vld [vmem:[#allocation39_spill] sm:$0xff] }
 0x372   : > { %v5047_v16 = vpop.f32.mrf.mxu2  ;;  %v4516_v41 = vor.u32 %v4515_v58, %v4512_v18  ;;  %v10171_v58 = vld [vmem:[#allocation2 + $0x90] sm:$0xff]  }
 0x373   : > { %v3804_v55 = vpop.f32.mrf.mxu3  ;;  %v11609_v11 = vadd.f32 %v5047_v16, %v4814_v34  ;;  %v6392_v16 = vsel %vm2589_vm4, %v6382_v27, %v6391_v37  ;;  %v6394_v27 = vshrl.u32 %v10688_v54, 16 }
 0x374   : > { %v3946_v12 = vadd.f32 %v3804_v55, %v3034_v20  ;;  %v12834_v55 = vld [vmem:[#allocation35_spill] sm:$0xff]  ;;  %v4517_v18 = vsel %vm2589_vm4, %v4507_v36, %v4516_v41 }
 0x375   : > { %12831 = vst [vmem:[#allocation3_spill] sm:$0xff] %v11609_v11  ;;  %v11611_v61 = vpop.f32.mrf.mxu1  ;;  %v4815_v34 = vadd.f32 %v12834_v55, %v3945_v23  ;;  %v3523_v11 = vor.u32 %v3521_v14, %v3519_v9  ;;  %v4230_v23 = vpack.c.b16 %v9837_v52, %v9837_v52  ;;  %v9546_v14 = vld [vmem:[%s12745_s3 + $0x70] sm:$0xff]  ;;  %v6397_v9 = vshll.u32 %v10688_v54, 16 }
 0x376   : > { %7102 = vmatpush.bf16.msra.mxu1 %v9546_v14  ;;  %v12837_v55 = vld [vmem:[#allocation37_spill] sm:$0xff] }
 0x377   : > { %v4519_v36 = vshrl.u32 %v4230_v23, 16  ;;  %v4522_v52 = vshll.u32 %v4230_v23, 16  ;;  %v6399_v54 = vrot.slane %v6397_v9, 4 }
 0x379   : > { %v11614_v50 = vpop.f32.mrf.mxu0  ;;  %v4521_v23 = vrot.slane %v4519_v36, 3 }
 0x37a   : > { %v5049_v15 = vpop.f32.mrf.mxu2 }
 0x37b   : > { %v3806_v20 = vpop.f32.mrf.mxu3  ;;  %v11624_v60 = vadd.f32 %v5049_v15, %v4815_v34  ;;  %v4816_v34 = vadd.f32 %v12837_v55, %v3946_v12  ;;  %v9489_v15 = vld [vmem:[#allocation2 + $0x98] sm:$0xff] }
 0x37c   : > { %v3947_v44 = vadd.f32 %v3806_v20, %v3036_v28  ;;  %9189 = vmatmul.msk.bf16.gmra.mxu0 %vm2288_vm3, %v6392_v16  ;;  %v3528_v28 = vsel %vm3396_vm5, %v3523_v11, %v3527_v62  ;;  %v3039_v11 = vadd.f32 %v11441_v46, %v12836_v48  ;;  %v6396_v16 = vrot.slane %v6394_v27, 3  ;;  %v12839_v12 = vld [vmem:[#allocation6_spill] sm:$0xff] }
 0x37d   : > { %12835 = vst [vmem:[#allocation68_spill] sm:$0xff] %v11624_v60  ;;  %v11626_v32 = vpop.f32.mrf.mxu1  ;;  %v3533_v10 = vshll.u32 %v9489_v15, 16  ;;  %v3529_v46 = vshrl.u32 %v11607_v35, 16  ;;  %v3041_v27 = vadd.f32 %v11453_v17, %v12839_v12  ;;  %v12843_v12 = vld [vmem:[#allocation41_spill] sm:$0xff] }
 0x37e   : > { %v6400_v60 = vor.u32 %v6399_v54, %v6396_v16 }
 0x37f   : > { %8980 = vmatmul.msk.bf16.gmra.mxu2 %vm2288_vm3, %v10171_v58  ;;  %v4524_v58 = vrot.slane %v4522_v52, 4  ;;  %v3531_v55 = vor.u32 %v3529_v46, %v3527_v62 }
 0x380   : > { %8893 = vmatmul.msk.bf16.gmra.mxu3 %vm2288_vm3, %v3528_v28  ;;  %8952 = vmatmul.msk.bf16.gmra.mxu1 %vm2288_vm3, %v4517_v18 }
 0x381   : > { %v11635_v3 = vpop.f32.mrf.mxu0  ;;  %v4525_v48 = vor.u32 %v4524_v58, %v4521_v23  ;;  %v10172_v23 = vld [vmem:[#allocation2 + $0x98] sm:$0xff]  }
 0x382   : > { %v5052_v18 = vpop.f32.mrf.mxu2 }
 0x383   : > { %v3809_v20 = vpop.f32.mrf.mxu3  ;;  %v11644_v14 = vadd.f32 %v5052_v18, %v4816_v34  ;;  %v3535_v34 = vrot.slane %v3533_v10, 1  ;;  %v10690_v18 = vld [vmem:[#allocation2 + $0x7c] sm:$0xff]   ;;  %v4526_v35 = vsel %vm2589_vm4, %v4516_v41, %v4525_v48 }
 0x384   : > { %v3948_v4 = vadd.f32 %v3809_v20, %v3039_v11  ;;  %v4817_v11 = vadd.f32 %v12840_v19, %v3947_v44  ;;  %v6401_v20 = vsel %vm2589_vm4, %v6391_v37, %v6400_v60  ;;  %v6403_v58 = vshrl.u32 %v10690_v18, 16  ;;  %v12842_v37 = vld [vmem:[#allocation7_spill] sm:$0xff] }
 0x385   : > { %12838 = vst [vmem:[#allocation33_spill] sm:$0xff] %v11644_v14  ;;  %v11646_v28 = vpop.f32.mrf.mxu1  ;;  %v3536_v17 = vsel %vm3396_vm5, %v3531_v55, %v3535_v34  ;;  %v6406_v44 = vshll.u32 %v10690_v18, 16  ;;  %v3044_v62 = vadd.f32 %v11462_v49, %v12842_v37  ;;  %v12853_v14 = vld [vmem:[#allocation10_spill] sm:$0xff] }
 0x386   : > { %v6405_v41 = vrot.slane %v6403_v58, 3 }
 0x387   : > { %v6408_v48 = vrot.slane %v6406_v44, 4 }
 0x389   : > { %v11648_v40 = vpop.f32.mrf.mxu0  ;;  %v6409_v18 = vor.u32 %v6408_v48, %v6405_v41 }
 0x38a   : > { %v5054_v52 = vpop.f32.mrf.mxu2 }
 0x38b   : > { %v3811_v9 = vpop.f32.mrf.mxu3  ;;  %v11656_v16 = vadd.f32 %v5054_v52, %v4817_v11  ;;  %v3537_v52 = vshrl.u32 %v9489_v15, 16  ;;  %v6410_v58 = vsel %vm2589_vm4, %v6400_v60, %v6409_v18  ;;  %v10173_v60 = vld [vmem:[#allocation2 + $0xa0] sm:$0xff]  }
 0x38c   : > { %v3949_v36 = vadd.f32 %v3811_v9, %v3041_v27  ;;  %9190 = vmatmul.msk.bf16.gmra.mxu0 %vm2288_vm3, %v6401_v20  ;;  %v4818_v27 = vadd.f32 %v12843_v12, %v3948_v4  ;;  %v9490_v9 = vld [vmem:[#allocation2 + $0xa0] sm:$0xff] }
 0x38d   : > { %12841 = vst [vmem:[#allocation4_spill] sm:$0xff] %v11656_v16  ;;  %v11658_v54 = vpop.f32.mrf.mxu1  ;;  %v12846_v16 = vld [vmem:[#allocation43_spill] sm:$0xff]  ;;  %v3539_v44 = vor.u32 %v3537_v52, %v3535_v34 }
 0x38e   : > { %v4819_v4 = vadd.f32 %v12846_v16, %v3949_v36  ;;  %v12849_v36 = vld [vmem:[#allocation9_spill] sm:$0xff] }
 0x38f   : > { %8981 = vmatmul.msk.bf16.gmra.mxu2 %vm2288_vm3, %v10172_v23  ;;  %v3049_v16 = vadd.f32 %v11486_v30, %v12849_v36  ;;  %v3051_v30 = vadd.f32 %v11501_v2, %v12853_v14 }
 0x390   : > { %8894 = vmatmul.msk.bf16.gmra.mxu3 %vm2288_vm3, %v3536_v17  ;;  %8953 = vmatmul.msk.bf16.gmra.mxu1 %vm2288_vm3, %v4526_v35  ;;  %v3541_v35 = vshll.u32 %v9490_v9, 16  ;;  %v12845_v17 = vld [vmem:[#allocation8_spill] sm:$0xff] }
 0x391   : > { %v11665_v10 = vpop.f32.mrf.mxu0  ;;  %v3046_v49 = vadd.f32 %v11476_v56, %v12845_v17 }
 0x392   : > { %v5057_v11 = vpop.f32.mrf.mxu2 }
 0x393   : > { %v3814_v46 = vpop.f32.mrf.mxu3  ;;  %v11670_v20 = vadd.f32 %v5057_v11, %v4818_v27  ;;  %v10189_v11 = vld [vmem:[#allocation2 + $0x30] sm:$0xff]  }
 0x394   : > { %v3950_v19 = vadd.f32 %v3814_v46, %v3044_v62  ;;  %v3543_v62 = vrot.slane %v3541_v35, 1  ;;  %v10692_v46 = vld [vmem:[#allocation2 + $0x84] sm:$0xff]   ;;  %v12850_v35 = vld [vmem:[#allocation45_spill] sm:$0xff] }
 0x395   : > { %12844 = vst [vmem:[#allocation71_spill] sm:$0xff] %v11670_v20  ;;  %v11672_v55 = vpop.f32.mrf.mxu1  ;;  %v6412_v56 = vshrl.u32 %v10692_v46, 16  ;;  %v6415_v17 = vshll.u32 %v10692_v46, 16  ;;  %v3545_v20 = vshrl.u32 %v9490_v9, 16  ;;  %v10190_v9 = vld [vmem:[#allocation2 + $0x38] sm:$0xff]  }
 0x396   : > { %v3544_v48 = vsel %vm3396_vm5, %v3539_v44, %v3543_v62 }
 0x399   : > { %v11674_v23 = vpop.f32.mrf.mxu0 }
 0x39a   : > { %v5059_v27 = vpop.f32.mrf.mxu2 }
 0x39b   : > { %v3816_v37 = vpop.f32.mrf.mxu3  ;;  %v11681_v41 = vadd.f32 %v5059_v27, %v4819_v4  ;;  %v6417_v4 = vrot.slane %v6415_v17, 4  ;;  %v3547_v17 = vor.u32 %v3545_v20, %v3543_v62 }
 0x39c   : > { %v3951_v12 = vadd.f32 %v3816_v37, %v3046_v49  ;;  %9191 = vmatmul.msk.bf16.gmra.mxu0 %vm2288_vm3, %v6410_v58  ;;  %v4820_v49 = vadd.f32 %v12850_v35, %v3950_v19  ;;  %v6414_v37 = vrot.slane %v6412_v56, 3  ;;  %v9491_v58 = vld [vmem:[#allocation2 + $0xa8] sm:$0xff] }
 0x39d   : > { %12847 = vst [vmem:[#allocation35_spill] sm:$0xff] %v11681_v41  ;;  %v11683_v15 = vpop.f32.mrf.mxu1  ;;  %v3549_v41 = vshll.u32 %v9491_v58, 16 }
 0x39f   : > { %8982 = vmatmul.msk.bf16.gmra.mxu2 %vm2288_vm3, %v10173_v60 }
 0x3a0   : > { %8895 = vmatmul.msk.bf16.gmra.mxu3 %vm2288_vm3, %v3544_v48  ;;  %9226 = vmatmul.msk.bf16.vlgmr.msra.gmra.mxu1 %vm2288_vm3, %v10189_v11  ;;  %v6418_v11 = vor.u32 %v6417_v4, %v6414_v37 }
 0x3a1   : > { %v11689_v34 = vpop.f32.mrf.mxu0 }
 0x3a2   : > { %12848 = vst [vmem:[#allocation5_spill] sm:$0xff] %v11689_v34  ;;  %v5062_v46 = vpop.f32.mrf.mxu2  ;;  %v12854_v34 = vld [vmem:[#allocation47_spill] sm:$0xff]  ;;  %v6419_v56 = vsel %vm2589_vm4, %v6409_v18, %v6418_v11 }
 0x3a3   : > { %v3819_v52 = vpop.f32.mrf.mxu3  ;;  %v11694_v27 = vadd.f32 %v5062_v46, %v4820_v49  ;;  %v4821_v19 = vadd.f32 %v12854_v34, %v3951_v12  ;;  %v10174_v46 = vld [vmem:[#allocation2 + $0xa8] sm:$0xff]   ;;  %v12857_v18 = vld [vmem:[#allocation11_spill] sm:$0xff] }
 0x3a4   : > { %v3952_v44 = vadd.f32 %v3819_v52, %v3049_v16  ;;  %v3551_v16 = vrot.slane %v3549_v41, 1  ;;  %v10694_v52 = vld [vmem:[#allocation2 + $0x8c] sm:$0xff]   ;;  %v3054_v62 = vadd.f32 %v11511_v29, %v12857_v18  ;;  %v12862_v18 = vld [vmem:[#allocation51_spill] sm:$0xff] }
 0x3a5   : > { %12851 = vst [vmem:[#allocation37_spill] sm:$0xff] %v11694_v27  ;;  %v11696_v48 = vpop.f32.mrf.mxu1  ;;  %v6421_v14 = vshrl.u32 %v10694_v52, 16  ;;  %v6424_v27 = vshll.u32 %v10694_v52, 16  ;;  %v12858_v41 = vld [vmem:[#allocation49_spill] sm:$0xff] }
 0x3a6   : > { %v3552_v2 = vsel %vm3396_vm5, %v3547_v17, %v3551_v16  ;;  %v4822_v34 = vadd.f32 %v12858_v41, %v3952_v44 }
 0x3a9   : > { %v11698_v60 = vpop.f32.mrf.mxu0 }
 0x3aa   : > { %12852 = vst [vmem:[#allocation6_spill] sm:$0xff] %v11698_v60  ;;  %v5064_v49 = vpop.f32.mrf.mxu2 }
 0x3ab   : > { %v3821_v36 = vpop.f32.mrf.mxu3  ;;  %v11705_v37 = vadd.f32 %v5064_v49, %v4821_v19  ;;  %v9492_v19 = vld [vmem:[#allocation2 + $0xb0] sm:$0xff] }
 0x3ac   : > { %v3953_v35 = vadd.f32 %v3821_v36, %v3051_v30  ;;  %9192 = vmatmul.msk.bf16.gmra.mxu0 %vm2288_vm3, %v6419_v56  ;;  %v6423_v30 = vrot.slane %v6421_v14, 3  ;;  %v6426_v36 = vrot.slane %v6424_v27, 4 }
 0x3ad   : > { %12855 = vst [vmem:[#allocation39_spill] sm:$0xff] %v11705_v37  ;;  %v11707_v4 = vpop.f32.mrf.mxu1  ;;  %v12860_v37 = vld [vmem:[#allocation12_spill] sm:$0xff] }
 0x3ae   : > { %v4823_v44 = vadd.f32 %v12862_v18, %v3953_v35 }
 0x3af   : > { %8983 = vmatmul.msk.bf16.gmra.mxu2 %vm2288_vm3, %v10174_v46  ;;  %v3557_v46 = vshll.u32 %v9492_v19, 16 }
 0x3b0   : > { %8896 = vmatmul.msk.bf16.gmra.mxu3 %vm2288_vm3, %v3552_v2  ;;  %9227 = vmatmul.msk.bf16.gmra.mxu1 %vm2288_vm3, %v10190_v9  ;;  %v6427_v9 = vor.u32 %v6426_v36, %v6423_v30  ;;  %v3553_v2 = vshrl.u32 %v9491_v58, 16 }
 0x3b1   : > { %v11713_v20 = vpop.f32.mrf.mxu0 }
 0x3b2   : > { %12856 = vst [vmem:[#allocation7_spill] sm:$0xff] %v11713_v20  ;;  %v5067_v17 = vpop.f32.mrf.mxu2  ;;  %v3056_v20 = vadd.f32 %v11526_v8, %v12860_v37  ;;  %v6428_v27 = vsel %vm2589_vm4, %v6418_v11, %v6427_v9  ;;  %v3555_v14 = vor.u32 %v3553_v2, %v3551_v16  ;;  %v10191_v37 = vld [vmem:[#allocation2 + $0x40] sm:$0xff]   ;;  %v10175_v11 = vld [vmem:[#allocation2 + $0xb0] sm:$0xff]  }
 0x3b3   : > { %v3824_v12 = vpop.f32.mrf.mxu3  ;;  %v11718_v52 = vadd.f32 %v5067_v17, %v4822_v34  ;;  %v12864_v16 = vld [vmem:[#allocation13_spill] sm:$0xff] }
 0x3b4   : > { %v3954_v56 = vadd.f32 %v3824_v12, %v3054_v62  ;;  %v3559_v62 = vrot.slane %v3557_v46, 1  ;;  %v10696_v12 = vld [vmem:[#allocation2 + $0x94] sm:$0xff]   ;;  %v3059_v35 = vadd.f32 %v11536_v25, %v12864_v16 }
 0x3b5   : > { %12859 = vst [vmem:[#allocation41_spill] sm:$0xff] %v11718_v52  ;;  %v11720_v49 = vpop.f32.mrf.mxu1  ;;  %v6430_v36 = vshrl.u32 %v10696_v12, 16  ;;  %v6433_v17 = vshll.u32 %v10696_v12, 16  ;;  %v12865_v2 = vld [vmem:[#allocation53_spill] sm:$0xff]  ;;  %v12868_v52 = vld [vmem:[#allocation14_spill] sm:$0xff] }
 0x3b6   : > { %v3560_v8 = vsel %vm3396_vm5, %v3555_v14, %v3559_v62  ;;  %v4824_v46 = vadd.f32 %v12865_v2, %v3954_v56  ;;  %v3061_v25 = vadd.f32 %v11551_v59, %v12868_v52  ;;  %v10176_v59 = vld [vmem:[#allocation2 + $0xb8] sm:$0xff]  }
 0x3b7   : > { %v6435_v18 = vrot.slane %v6433_v17, 4 }
 0x3b9   : > { %v11724_v60 = vpop.f32.mrf.mxu0 }
 0x3ba   : > { %12861 = vst [vmem:[#allocation8_spill] sm:$0xff] %v11724_v60  ;;  %v5069_v34 = vpop.f32.mrf.mxu2  ;;  %v12869_v60 = vld [vmem:[#allocation55_spill] sm:$0xff] }
 0x3bb   : > { %v3826_v29 = vpop.f32.mrf.mxu3  ;;  %v11729_v30 = vadd.f32 %v5069_v34, %v4823_v44  ;;  %v9493_v44 = vld [vmem:[#allocation2 + $0xb8] sm:$0xff] }
 0x3bc   : > { %v3955_v41 = vadd.f32 %v3826_v29, %v3056_v20  ;;  %9193 = vmatmul.msk.bf16.gmra.mxu0 %vm2288_vm3, %v6428_v27  ;;  %v6432_v29 = vrot.slane %v6430_v36, 3 }
 0x3bd   : > { %12863 = vst [vmem:[#allocation43_spill] sm:$0xff] %v11729_v30  ;;  %v11731_v58 = vpop.f32.mrf.mxu1  ;;  %v3565_v30 = vshll.u32 %v9493_v44, 16 }
 0x3be   : > { %v4825_v56 = vadd.f32 %v12869_v60, %v3955_v41 }
 0x3bf   : > { %8984 = vmatmul.msk.bf16.gmra.mxu2 %vm2288_vm3, %v10175_v11  ;;  %v3561_v11 = vshrl.u32 %v9492_v19, 16  ;;  %v3567_v2 = vrot.slane %v3565_v30, 1  ;;  %v10192_v19 = vld [vmem:[#allocation2 + $0x48] sm:$0xff]  }
 0x3c0   : > { %8897 = vmatmul.msk.bf16.gmra.mxu3 %vm2288_vm3, %v3560_v8  ;;  %9228 = vmatmul.msk.bf16.gmra.mxu1 %vm2288_vm3, %v10191_v37  ;;  %v6436_v37 = vor.u32 %v6435_v18, %v6432_v29 }
 0x3c1   : > { %v11740_v27 = vpop.f32.mrf.mxu0  ;;  %v3563_v17 = vor.u32 %v3561_v11, %v3559_v62 }
 0x3c2   : > { %12866 = vst [vmem:[#allocation9_spill] sm:$0xff] %v11740_v27  ;;  %v5072_v12 = vpop.f32.mrf.mxu2  ;;  %v6437_v36 = vsel %vm2589_vm4, %v6427_v9, %v6436_v37  ;;  %v10698_v27 = vld [vmem:[#allocation2 + $0x9c] sm:$0xff]  }
 0x3c3   : > { %v3829_v20 = vpop.f32.mrf.mxu3  ;;  %v11742_v34 = vadd.f32 %v5072_v12, %v4824_v46  ;;  %v3568_v52 = vsel %vm3396_vm5, %v3563_v17, %v3567_v2  ;;  %v6439_v60 = vshrl.u32 %v10698_v27, 16  ;;  %v6442_v41 = vshll.u32 %v10698_v27, 16  ;;  %v12872_v9 = vld [vmem:[#allocation15_spill] sm:$0xff]  ;;  %v12873_v12 = vld [vmem:[#allocation57_spill] sm:$0xff] }
 0x3c4   : > { %v3956_v14 = vadd.f32 %v3829_v20, %v3059_v35  ;;  %v3064_v62 = vadd.f32 %v11561_v47, %v12872_v9 }
 0x3c5   : > { %12867 = vst [vmem:[#allocation45_spill] sm:$0xff] %v11742_v34  ;;  %v11744_v8 = vpop.f32.mrf.mxu1 }
 0x3c6   : > { %v4826_v11 = vadd.f32 %v12873_v12, %v3956_v14 }
 0x3c9   : > { %v11755_v18 = vpop.f32.mrf.mxu0 }
 0x3ca   : > { %v5074_v20 = vpop.f32.mrf.mxu2  ;;  %12871 = vst [vmem:[#allocation47_spill] sm:$0xff] %v11755_v18  ;;  %v12877_v18 = vld [vmem:[#allocation59_spill] sm:$0xff] }
 0x3cb   : > { %v3831_v16 = vpop.f32.mrf.mxu3  ;;  %v11751_v46 = vadd.f32 %v5074_v20, %v4825_v56  ;;  %v9494_v56 = vld [vmem:[#allocation2 + $0xc0] sm:$0xff] }
 0x3cc   : > { %v3957_v35 = vadd.f32 %v3831_v16, %v3061_v25  ;;  %9194 = vmatmul.msk.bf16.gmra.mxu0 %vm2288_vm3, %v6437_v36  ;;  %v6441_v25 = vrot.slane %v6439_v60, 3  ;;  %v6444_v16 = vrot.slane %v6442_v41, 4 }
 0x3cd   : > { %12870 = vst [vmem:[#allocation10_spill] sm:$0xff] %v11751_v46  ;;  %v11753_v29 = vpop.f32.mrf.mxu1  ;;  %v3569_v46 = vshrl.u32 %v9493_v44, 16 }
 0x3ce   : > { %v4827_v14 = vadd.f32 %v12877_v18, %v3957_v35 }
 0x3cf   : > { %8985 = vmatmul.msk.bf16.gmra.mxu2 %vm2288_vm3, %v10176_v59  ;;  %v12876_v59 = vld [vmem:[#allocation16_spill] sm:$0xff]  ;;  %v3571_v41 = vor.u32 %v3569_v46, %v3567_v2  ;;  %v12879_v2 = vld [vmem:[#allocation17_spill] sm:$0xff] }
 0x3d0   : > { %8898 = vmatmul.msk.bf16.gmra.mxu3 %vm2288_vm3, %v3568_v52  ;;  %9229 = vmatmul.msk.bf16.gmra.mxu1 %vm2288_vm3, %v10192_v19  ;;  %v6445_v52 = vor.u32 %v6444_v16, %v6441_v25  ;;  %v3573_v19 = vshll.u32 %v9494_v56, 16  ;;  %v3066_v47 = vadd.f32 %v11576_v42, %v12876_v59  ;;  %v3069_v35 = vadd.f32 %v11586_v39, %v12879_v2 }
 0x3d1   : > { %v11768_v34 = vpop.f32.mrf.mxu0 }
 0x3d2   : > { %v5077_v20 = vpop.f32.mrf.mxu2  ;;  %12875 = vst [vmem:[#allocation49_spill] sm:$0xff] %v11768_v34  ;;  %v6446_v60 = vsel %vm2589_vm4, %v6436_v37, %v6445_v52  ;;  %v10177_v37 = vld [vmem:[#allocation2 + $0xc0] sm:$0xff]  }
 0x3d3   : > { %v3834_v30 = vpop.f32.mrf.mxu3  ;;  %v11764_v17 = vadd.f32 %v5077_v20, %v4826_v11  ;;  %v10193_v20 = vld [vmem:[#allocation2 + $0x50] sm:$0xff]  }
 0x3d4   : > { %v3958_v36 = vadd.f32 %v3834_v30, %v3064_v62  ;;  %v3575_v62 = vrot.slane %v3573_v19, 1  ;;  %v10700_v30 = vld [vmem:[#allocation2 + $0xa4] sm:$0xff]   ;;  %v12881_v19 = vld [vmem:[#allocation61_spill] sm:$0xff] }
 0x3d5   : > { %12874 = vst [vmem:[#allocation11_spill] sm:$0xff] %v11764_v17  ;;  %v11766_v27 = vpop.f32.mrf.mxu1  ;;  %v6448_v42 = vshrl.u32 %v10700_v30, 16  ;;  %v6451_v59 = vshll.u32 %v10700_v30, 16  ;;  %v12883_v17 = vld [vmem:[#allocation18_spill] sm:$0xff] }
 0x3d6   : > { %v3576_v16 = vsel %vm3396_vm5, %v3571_v41, %v3575_v62  ;;  %v3071_v39 = vadd.f32 %v11601_v6, %v12883_v17  ;;  %v10178_v6 = vld [vmem:[#allocation2 + $0xc8] sm:$0xff]  }
 0x3d9   : > { %v11785_v46 = vpop.f32.mrf.mxu0 }
 0x3da   : > { %v5079_v11 = vpop.f32.mrf.mxu2  ;;  %12880 = vst [vmem:[#allocation51_spill] sm:$0xff] %v11785_v46  ;;  %v12884_v46 = vld [vmem:[#allocation63_spill] sm:$0xff] }
 0x3db   : > { %v3836_v9 = vpop.f32.mrf.mxu3  ;;  %v11775_v25 = vadd.f32 %v5079_v11, %v4827_v14  ;;  %v6453_v14 = vrot.slane %v6451_v59, 4 }
 0x3dc   : > { %v3959_v12 = vadd.f32 %v3836_v9, %v3066_v47  ;;  %9195 = vmatmul.msk.bf16.gmra.mxu0 %vm2288_vm3, %v6446_v60  ;;  %v4828_v47 = vadd.f32 %v12881_v19, %v3958_v36  ;;  %v6450_v9 = vrot.slane %v6448_v42, 3  ;;  %v9495_v60 = vld [vmem:[#allocation2 + $0xc8] sm:$0xff] }
 0x3dd   : > { %12878 = vst [vmem:[#allocation12_spill] sm:$0xff] %v11775_v25  ;;  %v11777_v44 = vpop.f32.mrf.mxu1  ;;  %v3581_v25 = vshll.u32 %v9495_v60, 16  ;;  %v10702_v19 = vld [vmem:[#allocation2 + $0xac] sm:$0xff]  }
 0x3de   : > { %v4829_v34 = vadd.f32 %v12884_v46, %v3959_v12  ;;  %v6457_v12 = vshrl.u32 %v10702_v19, 16  ;;  %v6460_v46 = vshll.u32 %v10702_v19, 16 }
 0x3df   : > { %8986 = vmatmul.msk.bf16.gmra.mxu2 %vm2288_vm3, %v10177_v37  ;;  %v3577_v37 = vshrl.u32 %v9494_v56, 16  ;;  %v3583_v59 = vrot.slane %v3581_v25, 1 }
 0x3e0   : > { %8899 = vmatmul.msk.bf16.gmra.mxu3 %vm2288_vm3, %v3576_v16  ;;  %9230 = vmatmul.msk.bf16.gmra.mxu1 %vm2288_vm3, %v10193_v20  ;;  %v6454_v20 = vor.u32 %v6453_v14, %v6450_v9  ;;  %v10194_v14 = vld [vmem:[#allocation2 + $0x58] sm:$0xff]  }
 0x3e1   : > { %v3579_v42 = vor.u32 %v3577_v37, %v3575_v62  ;;  %v6459_v37 = vrot.slane %v6457_v12, 3 }
 0x3e2   : > { %v5082_v30 = vpop.f32.mrf.mxu2  ;;  %v6455_v36 = vsel %vm2589_vm4, %v6445_v52, %v6454_v20  ;;  %v12887_v52 = vld [vmem:[#allocation19_spill] sm:$0xff] }
 0x3e3   : > { %v3839_v18 = vpop.f32.mrf.mxu3  ;;  %v11788_v11 = vadd.f32 %v5082_v30, %v4828_v47  ;;  %v3584_v17 = vsel %vm3396_vm5, %v3579_v42, %v3583_v59  ;;  %v3074_v62 = vadd.f32 %v11614_v50, %v12887_v52 }
 0x3e4   : > { %v3960_v41 = vadd.f32 %v3839_v18, %v3069_v35  ;;  %v11796_v35 = vpop.f32.mrf.mxu0 }
 0x3e5   : > { %12882 = vst [vmem:[#allocation13_spill] sm:$0xff] %v11788_v11  ;;  %v11790_v16 = vpop.f32.mrf.mxu1  ;;  %v12891_v11 = vld [vmem:[#allocation20_spill] sm:$0xff] }
 0x3e6   : > { %12885 = vst [vmem:[#allocation53_spill] sm:$0xff] %v11796_v35  ;;  %v3076_v50 = vadd.f32 %v11635_v3, %v12891_v11  ;;  %v12892_v35 = vld [vmem:[#allocation67_spill] sm:$0xff] }
 0x3ea   : > { %v5084_v47 = vpop.f32.mrf.mxu2 }
 0x3eb   : > { %v3841_v2 = vpop.f32.mrf.mxu3  ;;  %v11799_v9 = vadd.f32 %v5084_v47, %v4829_v34  ;;  %v12888_v34 = vld [vmem:[#allocation65_spill] sm:$0xff] }
 0x3ec   : > { %v3961_v18 = vadd.f32 %v3841_v2, %v3071_v39  ;;  %9196 = vmatmul.msk.bf16.gmra.mxu0 %vm2288_vm3, %v6455_v36  ;;  %v4830_v30 = vadd.f32 %v12888_v34, %v3960_v41  ;;  %v6462_v39 = vrot.slane %v6460_v46, 4  ;;  %v9496_v2 = vld [vmem:[#allocation2 + $0xd0] sm:$0xff] }
 0x3ed   : > { %12886 = vst [vmem:[#allocation14_spill] sm:$0xff] %v11799_v9  ;;  %v11801_v56 = vpop.f32.mrf.mxu1  ;;  %v3585_v9 = vshrl.u32 %v9495_v60, 16 }
 0x3ee   : > { %v4831_v41 = vadd.f32 %v12892_v35, %v3961_v18  ;;  %v12895_v35 = vld [vmem:[#allocation70_spill] sm:$0xff] }
 0x3ef   : > { %8987 = vmatmul.msk.bf16.gmra.mxu2 %vm2288_vm3, %v10178_v6  ;;  %v3589_v6 = vshll.u32 %v9496_v2, 16  ;;  %v3587_v46 = vor.u32 %v3585_v9, %v3583_v59 }
 0x3f0   : > { %8900 = vmatmul.msk.bf16.gmra.mxu3 %vm2288_vm3, %v3584_v17  ;;  %9231 = vmatmul.msk.bf16.gmra.mxu1 %vm2288_vm3, %v10194_v14  ;;  %v11814_v17 = vpop.f32.mrf.mxu0  ;;  %v6463_v14 = vor.u32 %v6462_v39, %v6459_v37  ;;  %v10195_v39 = vld [vmem:[#allocation2 + $0x60] sm:$0xff]  }
 0x3f1   : > { %12890 = vst [vmem:[#allocation15_spill] sm:$0xff] %v11814_v17  ;;  %v12899_v17 = vld [vmem:[#allocation22_spill] sm:$0xff] }
 0x3f2   : > { %v5087_v47 = vpop.f32.mrf.mxu2  ;;  %v6464_v12 = vsel %vm2589_vm4, %v6454_v20, %v6463_v14  ;;  %v10179_v20 = vld [vmem:[#allocation2 + $0xd0] sm:$0xff]  }
 0x3f3   : > { %v3844_v25 = vpop.f32.mrf.mxu3  ;;  %v11810_v42 = vadd.f32 %v5087_v47, %v4830_v30 }
 0x3f4   : > { %v3962_v36 = vadd.f32 %v3844_v25, %v3074_v62  ;;  %v3591_v62 = vrot.slane %v3589_v6, 1  ;;  %v10704_v25 = vld [vmem:[#allocation2 + $0xb4] sm:$0xff]  }
 0x3f5   : > { %12889 = vst [vmem:[#allocation55_spill] sm:$0xff] %v11810_v42  ;;  %v11812_v19 = vpop.f32.mrf.mxu1  ;;  %v6466_v3 = vshrl.u32 %v10704_v25, 16  ;;  %v6469_v11 = vshll.u32 %v10704_v25, 16 }
 0x3f6   : > { %v3592_v60 = vsel %vm3396_vm5, %v3587_v46, %v3591_v62  ;;  %v4832_v18 = vadd.f32 %v12895_v35, %v3962_v36  ;;  %v10706_v35 = vld [vmem:[#allocation2 + $0xbc] sm:$0xff]  }
 0x3f7   : > { %v6468_v9 = vrot.slane %v6466_v3, 3  ;;  %v6471_v6 = vrot.slane %v6469_v11, 4 }
 0x3f8   : > { %v11826_v42 = vpop.f32.mrf.mxu0 }
 0x3f9   : > { %12894 = vst [vmem:[#allocation16_spill] sm:$0xff] %v11826_v42 }
 0x3fa   : > { %v5089_v30 = vpop.f32.mrf.mxu2 }
 0x3fb   : > { %v3846_v52 = vpop.f32.mrf.mxu3  ;;  %v11821_v47 = vadd.f32 %v5089_v30, %v4831_v41  ;;  %v6472_v30 = vor.u32 %v6471_v6, %v6468_v9  ;;  %v10180_v6 = vld [vmem:[#allocation2 + $0xd8] sm:$0xff]  }
 0x3fc   : > { %v3963_v34 = vadd.f32 %v3846_v52, %v3076_v50  ;;  %9197 = vmatmul.msk.bf16.gmra.mxu0 %vm2288_vm3, %v6464_v12  ;;  %v9497_v50 = vld [vmem:[#allocation2 + $0xd8] sm:$0xff]  ;;  %v12896_v52 = vld [vmem:[#allocation21_spill] sm:$0xff] }
 0x3fd   : > { %12893 = vst [vmem:[#allocation57_spill] sm:$0xff] %v11821_v47  ;;  %v11823_v37 = vpop.f32.mrf.mxu1  ;;  %v3593_v47 = vshrl.u32 %v9496_v2, 16  ;;  %v6473_v36 = vsel %vm2589_vm4, %v6463_v14, %v6472_v30  ;;  %v10196_v2 = vld [vmem:[#allocation2 + $0x68] sm:$0xff]  }
 0x3ff   : > { %8988 = vmatmul.msk.bf16.gmra.mxu2 %vm2288_vm3, %v10179_v20  ;;  %v4833_v20 = vadd.f32 %v11439_v63, %v3963_v34  ;;  %v3595_v3 = vor.u32 %v3593_v47, %v3591_v62  ;;  %v6478_v63 = vshll.u32 %v10706_v35, 16  ;;  %v9498_v34 = vld [vmem:[#allocation2 + $0xe0] sm:$0xff] }
 0x400   : > { %8901 = vmatmul.msk.bf16.gmra.mxu3 %vm2288_vm3, %v3592_v60  ;;  %9232 = vmatmul.msk.bf16.gmra.mxu1 %vm2288_vm3, %v10195_v39  ;;  %v3597_v60 = vshll.u32 %v9497_v50, 16  ;;  %v11837_v39 = vpop.f32.mrf.mxu0 }
 0x401   : > { %12898 = vst [vmem:[#allocation17_spill] sm:$0xff] %v11837_v39  ;;  %v6480_v62 = vrot.slane %v6478_v63, 4  ;;  %v10708_v63 = vld [vmem:[#allocation2 + $0xc4] sm:$0xff]  }
 0x402   : > { %v5092_v12 = vpop.f32.mrf.mxu2  ;;  %v3599_v11 = vrot.slane %v3597_v60, 1  ;;  %v12902_v60 = vld [vmem:[#allocation23_spill] sm:$0xff]  ;;  %v12904_v39 = vld [vmem:[#allocation24_spill] sm:$0xff] }
 0x403   : > { %v3849_v59 = vpop.f32.mrf.mxu3  ;;  %v11833_v46 = vadd.f32 %v5092_v12, %v4832_v18 }
 0x404   : > { %v3964_v41 = vadd.f32 %v3849_v59, %v12896_v52  ;;  %v3600_v12 = vsel %vm3396_vm5, %v3595_v3, %v3599_v11 }
 0x405   : > { %12897 = vst [vmem:[#allocation59_spill] sm:$0xff] %v11833_v46  ;;  %v11835_v25 = vpop.f32.mrf.mxu1  ;;  %v6475_v46 = vshrl.u32 %v10706_v35, 16 }
 0x407   : > { %v6477_v14 = vrot.slane %v6475_v46, 3 }
 0x408   : > { %v11852_v47 = vpop.f32.mrf.mxu0 }
 0x409   : > { %12901 = vst [vmem:[#allocation18_spill] sm:$0xff] %v11852_v47 }
 0x40a   : > { %v5094_v52 = vpop.f32.mrf.mxu2 }
 0x40b   : > { %v3851_v42 = vpop.f32.mrf.mxu3  ;;  %v11843_v18 = vadd.f32 %v5094_v52, %v4833_v20  ;;  %v6481_v52 = vor.u32 %v6480_v62, %v6477_v14  ;;  %v10197_v62 = vld [vmem:[#allocation2 + $0x70] sm:$0xff]  }
 0x40c   : > { %v3965_v59 = vadd.f32 %v3851_v42, %v12899_v17  ;;  %9198 = vmatmul.msk.bf16.gmra.mxu0 %vm2288_vm3, %v6473_v36  ;;  %v4834_v17 = vadd.f32 %v11447_v33, %v3964_v41 }
 0x40d   : > { %12900 = vst [vmem:[#allocation61_spill] sm:$0xff] %v11843_v18  ;;  %v11845_v9 = vpop.f32.mrf.mxu1  ;;  %v6482_v33 = vsel %vm2589_vm4, %v6472_v30, %v6481_v52  ;;  %v10181_v30 = vld [vmem:[#allocation2 + $0xe0] sm:$0xff]  }
 0x40f   : > { %8989 = vmatmul.msk.bf16.gmra.mxu2 %vm2288_vm3, %v10180_v6  ;;  %v4835_v6 = vadd.f32 %v11460_v57, %v3965_v59  ;;  %v6484_v57 = vshrl.u32 %v10708_v63, 16  ;;  %v6487_v59 = vshll.u32 %v10708_v63, 16 }
 0x410   : > { %8902 = vmatmul.msk.bf16.gmra.mxu3 %vm2288_vm3, %v3600_v12  ;;  %9233 = vmatmul.msk.bf16.gmra.mxu1 %vm2288_vm3, %v10196_v2  ;;  %v3601_v12 = vshrl.u32 %v9497_v50, 16  ;;  %v3605_v2 = vshll.u32 %v9498_v34, 16  ;;  %v11867_v14 = vpop.f32.mrf.mxu0 }
 0x411   : > { %12906 = vst [vmem:[#allocation65_spill] sm:$0xff] %v11867_v14  ;;  %v10724_v14 = vld [vmem:[#allocation2 + $0x104] sm:$0xff]  }
 0x412   : > { %v5097_v36 = vpop.f32.mrf.mxu2  ;;  %v3603_v41 = vor.u32 %v3601_v12, %v3599_v11  ;;  %v3607_v46 = vrot.slane %v3605_v2, 1  ;;  %v6486_v11 = vrot.slane %v6484_v57, 3 }
 0x413   : > { %v3854_v42 = vpop.f32.mrf.mxu3  ;;  %v11855_v3 = vadd.f32 %v5097_v36, %v4834_v17  ;;  %v12907_v36 = vld [vmem:[#allocation25_spill] sm:$0xff] }
 0x414   : > { %v3966_v20 = vadd.f32 %v3854_v42, %v12902_v60  ;;  %v3608_v50 = vsel %vm3396_vm5, %v3603_v41, %v3607_v46  ;;  %v9499_v60 = vld [vmem:[#allocation2 + $0xe8] sm:$0xff] }
 0x415   : > { %12903 = vst [vmem:[#allocation63_spill] sm:$0xff] %v11855_v3  ;;  %v11857_v35 = vpop.f32.mrf.mxu1  ;;  %v3613_v63 = vshll.u32 %v9499_v60, 16  ;;  %v12910_v3 = vld [vmem:[#allocation26_spill] sm:$0xff] }
 0x417   : > { %v3615_v57 = vrot.slane %v3613_v63, 1  ;;  %v9500_v63 = vld [vmem:[#allocation2 + $0xf0] sm:$0xff] }
 0x41a   : > { %v5099_v7 = vpop.f32.mrf.mxu2 }
 0x41b   : > { %v3856_v18 = vpop.f32.mrf.mxu3  ;;  %v11863_v42 = vadd.f32 %v5099_v7, %v4835_v6  ;;  %v4836_v7 = vadd.f32 %v11470_v45, %v3966_v20 }
 0x41c   : > { %v3967_v47 = vadd.f32 %v3856_v18, %v12904_v39  ;;  %9199 = vmatmul.msk.bf16.gmra.mxu0 %vm2288_vm3, %v6482_v33  ;;  %v6489_v18 = vrot.slane %v6487_v59, 4  ;;  %v10710_v59 = vld [vmem:[#allocation2 + $0xcc] sm:$0xff]  }
 0x41d   : > { %12905 = vst [vmem:[#allocation19_spill] sm:$0xff] %v11863_v42  ;;  %v11865_v17 = vpop.f32.mrf.mxu1 }
 0x41e   : > { %v6490_v41 = vor.u32 %v6489_v18, %v6486_v11  ;;  %v10198_v18 = vld [vmem:[#allocation2 + $0x78] sm:$0xff]  }
 0x41f   : > { %8990 = vmatmul.msk.bf16.gmra.mxu2 %vm2288_vm3, %v10181_v30  ;;  %v4837_v30 = vadd.f32 %v11484_v26, %v3967_v47  ;;  %v6496_v26 = vshll.u32 %v10710_v59, 16 }
 0x420   : > { %8903 = vmatmul.msk.bf16.gmra.mxu3 %vm2288_vm3, %v3608_v50  ;;  %9234 = vmatmul.msk.bf16.gmra.mxu1 %vm2288_vm3, %v10197_v62  ;;  %v11879_v50 = vpop.f32.mrf.mxu0  ;;  %v3609_v62 = vshrl.u32 %v9498_v34, 16  ;;  %v6491_v45 = vsel %vm2589_vm4, %v6481_v52, %v6490_v41 }
 0x421   : > { %12909 = vst [vmem:[#allocation67_spill] sm:$0xff] %v11879_v50 }
 0x422   : > { %v5102_v2 = vpop.f32.mrf.mxu2  ;;  %v3611_v20 = vor.u32 %v3609_v62, %v3607_v46  ;;  %v12913_v62 = vld [vmem:[#allocation27_spill] sm:$0xff] }
 0x423   : > { %v3859_v39 = vpop.f32.mrf.mxu3  ;;  %v11875_v6 = vadd.f32 %v5102_v2, %v4836_v7  ;;  %v10182_v2 = vld [vmem:[#allocation2 + $0xe8] sm:$0xff]  }
 0x424   : > { %v3968_v12 = vadd.f32 %v3859_v39, %v12907_v36  ;;  %v3616_v34 = vsel %vm3396_vm5, %v3611_v20, %v3615_v57 }
 0x425   : > { %12908 = vst [vmem:[#allocation20_spill] sm:$0xff] %v11875_v6  ;;  %v11877_v33 = vpop.f32.mrf.mxu1  ;;  %v6493_v6 = vshrl.u32 %v10710_v59, 16 }
 0x426   : > { %v4838_v52 = vadd.f32 %v11495_v13, %v3968_v12  ;;  %v10712_v12 = vld [vmem:[#allocation2 + $0xd4] sm:$0xff]  }
 0x427   : > { %v6495_v46 = vrot.slane %v6493_v6, 3 }
 0x428   : > { %v11893_v47 = vpop.f32.mrf.mxu0 }
 0x429   : > { %12912 = vst [vmem:[#allocation21_spill] sm:$0xff] %v11893_v47 }
 0x42a   : > { %v5104_v36 = vpop.f32.mrf.mxu2 }
 0x42b   : > { %v3861_v42 = vpop.f32.mrf.mxu3  ;;  %v11885_v7 = vadd.f32 %v5104_v36, %v4837_v30 }
 0x42c   : > { %v3969_v39 = vadd.f32 %v3861_v42, %v12910_v3  ;;  %9200 = vmatmul.msk.bf16.gmra.mxu0 %vm2288_vm3, %v6491_v45  ;;  %v6498_v42 = vrot.slane %v6496_v26, 4  ;;  %v12916_v26 = vld [vmem:[#allocation28_spill] sm:$0xff] }
 0x42d   : > { %12911 = vst [vmem:[#allocation70_spill] sm:$0xff] %v11885_v7  ;;  %v11887_v11 = vpop.f32.mrf.mxu1 }
 0x42e   : > { %v6499_v36 = vor.u32 %v6498_v42, %v6495_v46  ;;  %v10199_v42 = vld [vmem:[#allocation2 + $0x80] sm:$0xff]  }
 0x42f   : > { %8991 = vmatmul.msk.bf16.gmra.mxu2 %vm2288_vm3, %v10182_v2  ;;  %v4839_v2 = vadd.f32 %v11509_v21, %v3969_v39  ;;  %v6502_v21 = vshrl.u32 %v10712_v12, 16  ;;  %v6505_v39 = vshll.u32 %v10712_v12, 16 }
 0x430   : > { %8904 = vmatmul.msk.bf16.gmra.mxu3 %vm2288_vm3, %v3616_v34  ;;  %9235 = vmatmul.msk.bf16.gmra.mxu1 %vm2288_vm3, %v10198_v18  ;;  %v3617_v34 = vshrl.u32 %v9499_v60, 16  ;;  %v3621_v18 = vshll.u32 %v9500_v63, 16  ;;  %v6500_v47 = vsel %vm2589_vm4, %v6490_v41, %v6499_v36  ;;  %v11903_v6 = vpop.f32.mrf.mxu0  ;;  %v10183_v41 = vld [vmem:[#allocation2 + $0xf0] sm:$0xff]  }
 0x431   : > { %12915 = vst [vmem:[#allocation23_spill] sm:$0xff] %v11903_v6  ;;  %v12921_v6 = vld [vmem:[#allocation30_spill] sm:$0xff] }
 0x432   : > { %v5107_v45 = vpop.f32.mrf.mxu2  ;;  %v3619_v50 = vor.u32 %v3617_v34, %v3615_v57  ;;  %v3623_v13 = vrot.slane %v3621_v18, 1  ;;  %v9501_v34 = vld [vmem:[#allocation2 + $0xf8] sm:$0xff]  ;;  %v12918_v18 = vld [vmem:[#allocation29_spill] sm:$0xff] }
 0x433   : > { %v3864_v3 = vpop.f32.mrf.mxu3  ;;  %v11897_v20 = vadd.f32 %v5107_v45, %v4838_v52  ;;  %v6507_v45 = vrot.slane %v6505_v39, 4  ;;  %v10714_v39 = vld [vmem:[#allocation2 + $0xdc] sm:$0xff]  }
 0x434   : > { %v3970_v30 = vadd.f32 %v3864_v3, %v12913_v62  ;;  %v3624_v60 = vsel %vm3396_vm5, %v3619_v50, %v3623_v13 }
 0x435   : > { %12914 = vst [vmem:[#allocation22_spill] sm:$0xff] %v11897_v20  ;;  %v11899_v59 = vpop.f32.mrf.mxu1 }
 0x43a   : > { %v5109_v62 = vpop.f32.mrf.mxu2 }
 0x43b   : > { %v3866_v7 = vpop.f32.mrf.mxu3  ;;  %v11907_v52 = vadd.f32 %v5109_v62, %v4839_v2  ;;  %v11919_v62 = vpop.f32.mrf.mxu0 }
 0x43c   : > { %v3971_v3 = vadd.f32 %v3866_v7, %v12916_v26  ;;  %9201 = vmatmul.msk.bf16.gmra.mxu0 %vm2288_vm3, %v6500_v47  ;;  %v4840_v7 = vadd.f32 %v11520_v0, %v3970_v30  ;;  %v6504_v47 = vrot.slane %v6502_v21, 3  ;;  %12920 = vst [vmem:[#allocation26_spill] sm:$0xff] %v11919_v62 }
 0x43d   : > { %12917 = vst [vmem:[#allocation24_spill] sm:$0xff] %v11907_v52  ;;  %v11909_v46 = vpop.f32.mrf.mxu1 }
 0x43e   : > { %v6508_v12 = vor.u32 %v6507_v45, %v6504_v47  ;;  %v10200_v47 = vld [vmem:[#allocation2 + $0x88] sm:$0xff]   ;;  %v10184_v45 = vld [vmem:[#allocation2 + $0xf8] sm:$0xff]  }
 0x43f   : > { %8992 = vmatmul.msk.bf16.gmra.mxu2 %vm2288_vm3, %v10183_v41  ;;  %v4841_v41 = vadd.f32 %v11534_v24, %v3971_v3  ;;  %v9502_v3 = vld [vmem:[#allocation2 + $0x100] sm:$0xff] }
 0x440   : > { %8905 = vmatmul.msk.bf16.gmra.mxu3 %vm2288_vm3, %v3624_v60  ;;  %9236 = vmatmul.msk.bf16.gmra.mxu1 %vm2288_vm3, %v10199_v42  ;;  %v3629_v60 = vshll.u32 %v9501_v34, 16  ;;  %v3625_v42 = vshrl.u32 %v9500_v63, 16  ;;  %v6509_v0 = vsel %vm2589_vm4, %v6499_v36, %v6508_v12  ;;  %v6511_v63 = vshrl.u32 %v10714_v39, 16 }
 0x442   : > { %v5112_v26 = vpop.f32.mrf.mxu2  ;;  %v3627_v30 = vor.u32 %v3625_v42, %v3623_v13  ;;  %v3631_v21 = vrot.slane %v3629_v60, 1  ;;  %v6513_v13 = vrot.slane %v6511_v63, 3  ;;  %v12924_v60 = vld [vmem:[#allocation31_spill] sm:$0xff]  ;;  %v12927_v63 = vld [vmem:[#allocation32_spill] sm:$0xff] }
 0x443   : > { %v3869_v57 = vpop.f32.mrf.mxu3  ;;  %v11917_v50 = vadd.f32 %v5112_v26, %v4840_v7  ;;  %v11930_v62 = vpop.f32.mrf.mxu0 }
 0x444   : > { %v3972_v2 = vadd.f32 %v3869_v57, %v12918_v18  ;;  %v3632_v26 = vsel %vm3396_vm5, %v3627_v30, %v3631_v21  ;;  %12923 = vst [vmem:[#allocation28_spill] sm:$0xff] %v11930_v62 }
 0x445   : > { %12919 = vst [vmem:[#allocation25_spill] sm:$0xff] %v11917_v50  ;;  %v11921_v52 = vpop.f32.mrf.mxu1  ;;  %v6514_v50 = vshll.u32 %v10714_v39, 16  ;;  %v3633_v39 = vshrl.u32 %v9501_v34, 16 }
 0x446   : > { %v4842_v36 = vadd.f32 %v11545_v22, %v3972_v2  ;;  %v10716_v2 = vld [vmem:[#allocation2 + $0xe4] sm:$0xff]  }
 0x447   : > { %v3635_v62 = vor.u32 %v3633_v39, %v3631_v21 }
 0x44a   : > { %v5114_v18 = vpop.f32.mrf.mxu2 }
 0x44b   : > { %v3871_v20 = vpop.f32.mrf.mxu3  ;;  %v11927_v7 = vadd.f32 %v5114_v18, %v4841_v41  ;;  %v3637_v18 = vshll.u32 %v9502_v3, 16 }
 0x44c   : > { %v3973_v57 = vadd.f32 %v3871_v20, %v12921_v6  ;;  %9202 = vmatmul.msk.bf16.gmra.mxu0 %vm2288_vm3, %v6509_v0  ;;  %v6516_v6 = vrot.slane %v6514_v50, 4 }
 0x44d   : > { %12922 = vst [vmem:[#allocation27_spill] sm:$0xff] %v11927_v7  ;;  %v11935_v24 = vpop.f32.mrf.mxu1  ;;  %v3639_v22 = vrot.slane %v3637_v18, 1 }
 0x44e   : > { %v6517_v30 = vor.u32 %v6516_v6, %v6513_v13  ;;  %v10201_v13 = vld [vmem:[#allocation2 + $0x90] sm:$0xff]   ;;  %v6520_v6 = vshrl.u32 %v10716_v2, 16 }
 0x44f   : > { %8993 = vmatmul.msk.bf16.gmra.mxu2 %vm2288_vm3, %v10184_v45  ;;  %v4843_v45 = vadd.f32 %v11559_v31, %v3973_v57  ;;  %v3640_v34 = vsel %vm3396_vm5, %v3635_v62, %v3639_v22  ;;  %v10185_v31 = vld [vmem:[#allocation2 + $0x100] sm:$0xff]  }
 0x450   : > { %8906 = vmatmul.msk.bf16.gmra.mxu3 %vm2288_vm3, %v3632_v26  ;;  %9237 = vmatmul.msk.bf16.gmra.mxu1 %vm2288_vm3, %v10200_v47  ;;  %v11941_v26 = vpop.f32.mrf.mxu0  ;;  %v6518_v7 = vsel %vm2589_vm4, %v6508_v12, %v6517_v30  ;;  %v6522_v57 = vrot.slane %v6520_v6, 3 }
 0x451   : > { %12926 = vst [vmem:[#allocation30_spill] sm:$0xff] %v11941_v26 }
 0x452   : > { %v5117_v41 = vpop.f32.mrf.mxu2 }
 0x453   : > { %v3874_v20 = vpop.f32.mrf.mxu3  ;;  %v11939_v0 = vadd.f32 %v5117_v41, %v4842_v36  ;;  %v6523_v41 = vshll.u32 %v10716_v2, 16 }
 0x454   : > { %v3974_v42 = vadd.f32 %v3874_v20, %v12924_v60 }
 0x455   : > { %12925 = vst [vmem:[#allocation29_spill] sm:$0xff] %v11939_v0  ;;  %v11945_v50 = vpop.f32.mrf.mxu1  ;;  %v6525_v39 = vrot.slane %v6523_v41, 4  ;;  %v10718_v41 = vld [vmem:[#allocation2 + $0xec] sm:$0xff]  }
 0x456   : > { %v4844_v21 = vadd.f32 %v11570_v38, %v3974_v42  ;;  %v12932_v0 = vld [vmem:[#allocation36_spill] sm:$0xff] }
 0x458   : > { %v11956_v18 = vpop.f32.mrf.mxu0 }
 0x459   : > { %12929 = vst [vmem:[#allocation32_spill] sm:$0xff] %v11956_v18 }
 0x45a   : > { %v5119_v60 = vpop.f32.mrf.mxu2 }
 0x45b   : > { %v3876_v47 = vpop.f32.mrf.mxu3  ;;  %v11949_v36 = vadd.f32 %v5119_v60, %v4843_v45  ;;  %v6526_v60 = vor.u32 %v6525_v39, %v6522_v57 }
 0x45c   : > { %v3975_v20 = vadd.f32 %v3876_v47, %v12927_v63  ;;  %9203 = vmatmul.msk.bf16.gmra.mxu0 %vm2288_vm3, %v6518_v7  ;;  %v9503_v7 = vld [vmem:[#allocation2 + $0x108] sm:$0xff]  ;;  %v12930_v47 = vld [vmem:[#allocation34_spill] sm:$0xff] }
 0x45d   : > { %12928 = vst [vmem:[#allocation31_spill] sm:$0xff] %v11949_v36  ;;  %v11961_v2 = vpop.f32.mrf.mxu1  ;;  %v6527_v38 = vsel %vm2589_vm4, %v6517_v30, %v6526_v60 }
 0x45f   : > { %8994 = vmatmul.msk.bf16.gmra.mxu2 %vm2288_vm3, %v10185_v31  ;;  %v4845_v31 = vadd.f32 %v11584_v43, %v3975_v20  ;;  %v6529_v43 = vshrl.u32 %v10718_v41, 16  ;;  %v6532_v20 = vshll.u32 %v10718_v41, 16 }
 0x460   : > { %8907 = vmatmul.msk.bf16.gmra.mxu3 %vm2288_vm3, %v3640_v34  ;;  %9238 = vmatmul.msk.bf16.gmra.mxu1 %vm2288_vm3, %v10201_v13  ;;  %v3645_v34 = vshll.u32 %v9503_v7, 16  ;;  %v3641_v13 = vshrl.u32 %v9502_v3, 16  ;;  %v11969_v57 = vpop.f32.mrf.mxu0  ;;  %v10186_v3 = vld [vmem:[#allocation2 + $0x108] sm:$0xff]  }
 0x461   : > { %12934 = vst [vmem:[#allocation83_spill] sm:$0xff] %v11969_v57 }
 0x462   : > { %v5122_v45 = vpop.f32.mrf.mxu2  ;;  %v3643_v42 = vor.u32 %v3641_v13, %v3639_v22  ;;  %v3647_v6 = vrot.slane %v3645_v34, 1  ;;  %v12935_v13 = vld [vmem:[#allocation38_spill] sm:$0xff] }
 0x463   : > { %v3879_v12 = vpop.f32.mrf.mxu3  ;;  %v11959_v63 = vadd.f32 %v5122_v45, %v4844_v21  ;;  %v6534_v45 = vrot.slane %v6532_v20, 4  ;;  %v10720_v20 = vld [vmem:[#allocation2 + $0xf4] sm:$0xff]  }
 0x464   : > { %v3976_v62 = vadd.f32 %v3879_v12, %v12930_v47  ;;  %v3227_v12 = vld [vmem:[#allocation2 + $0x110] sm:$0x1]  ;;  %v10202_v47 = vld [vmem:[#allocation2 + $0x98] sm:$0xff]   ;;  %v3648_v39 = vsel %vm3396_vm5, %v3643_v42, %v3647_v6 }
 0x465   : > { %12931 = vst [vmem:[#allocation34_spill] sm:$0xff] %v11959_v63  ;;  %v3362_v30 = vunpack.c.l.b16 %v3227_v12  ;;  %v11972_v22 = vpop.f32.mrf.mxu1  ;;  %v3649_v12 = vshrl.u32 %v9503_v7, 16 }
 0x467   : > { %v3395_v34 = vpack.c.b16 %v3362_v30, %v3362_v30  ;;  %v12938_v30 = vld [vmem:[#allocation40_spill] sm:$0xff] }
 0x468   : > { %v11981_v63 = vpop.f32.mrf.mxu0 }
 0x469   : > { %12937 = vst [vmem:[#allocation84_spill] sm:$0xff] %v11981_v63  ;;  %v12944_v63 = vld [vmem:[#allocation44_spill] sm:$0xff] }
 0x46a   : > { %v5124_v26 = vpop.f32.mrf.mxu2 }
 0x46b   : > { %v3881_v36 = vpop.f32.mrf.mxu3  ;;  %v11967_v21 = vadd.f32 %v5124_v26, %v4845_v31  ;;  %v4846_v26 = vadd.f32 %v11595_v5, %v3976_v62  ;;  %v3651_v62 = vor.u32 %v3649_v12, %v3647_v6 }
 0x46c   : > { %v3977_v18 = vadd.f32 %v3881_v36, %v12932_v0  ;;  %9204 = vmatmul.msk.bf16.gmra.mxu0 %vm2288_vm3, %v6527_v38  ;;  %v6531_v36 = vrot.slane %v6529_v43, 3 }
 0x46d   : > { %12933 = vst [vmem:[#allocation36_spill] sm:$0xff] %v11967_v21  ;;  %v3653_v21 = vshll.u32 %v3395_v34, 16  ;;  %v6541_v34 = vshll.u32 %v10720_v20, 16 }
 0x46e   : > { %v6535_v41 = vor.u32 %v6534_v45, %v6531_v36  ;;  %v10203_v36 = vld [vmem:[#allocation2 + $0xa0] sm:$0xff]   ;;  %v6538_v45 = vshrl.u32 %v10720_v20, 16 }
 0x46f   : > { %8995 = vmatmul.msk.bf16.gmra.mxu2 %vm2288_vm3, %v10186_v3  ;;  %v4847_v3 = vadd.f32 %v11611_v61, %v3977_v18  ;;  %v3655_v43 = vrot.slane %v3653_v21, 1  ;;  %v10187_v61 = vld [vmem:[#allocation2 + $0x110] sm:$0xff]   ;;  %v6543_v12 = vrot.slane %v6541_v34, 4  ;;  %v10722_v34 = vld [vmem:[#allocation2 + $0xfc] sm:$0xff]  }
 0x470   : > { %8908 = vmatmul.msk.bf16.gmra.mxu3 %vm2288_vm3, %v3648_v39  ;;  %9239 = vmatmul.msk.bf16.gmra.mxu1 %vm2288_vm3, %v10202_v47  ;;  %v11983_v39 = vpop.f32.mrf.mxu1  ;;  %v6536_v5 = vsel %vm2589_vm4, %v6526_v60, %v6535_v41  ;;  %v11995_v18 = vpop.f32.mrf.mxu0  ;;  %v6540_v21 = vrot.slane %v6538_v45, 3 }
 0x471   : > { %v3656_v7 = vsel %vm3396_vm5, %v3651_v62, %v3655_v43  ;;  %12940 = vst [vmem:[#allocation85_spill] sm:$0xff] %v11995_v18  ;;  %v12941_v62 = vld [vmem:[#allocation42_spill] sm:$0xff] }
 0x472   : > { %v5127_v38 = vpop.f32.mrf.mxu2 }
 0x473   : > { %v3884_v0 = vpop.f32.mrf.mxu3  ;;  %v11979_v42 = vadd.f32 %v5127_v38, %v4846_v26  ;;  %v9510_v38 = vld [vmem:[#allocation2 + $0x20] sm:$0xff] }
 0x474   : > { %v3978_v31 = vadd.f32 %v3884_v0, %v12935_v13 }
 0x475   : > { %12936 = vst [vmem:[#allocation38_spill] sm:$0xff] %v11979_v42 }
 0x476   : > { %v4848_v6 = vadd.f32 %v11626_v32, %v3978_v31 }
 0x478   : > { %v12005_v18 = vpop.f32.mrf.mxu0 }
 0x479   : > { %12943 = vst [vmem:[#allocation86_spill] sm:$0xff] %v12005_v18 }
 0x47a   : > { %v5129_v13 = vpop.f32.mrf.mxu2 }
 0x47b   : > { %v3886_v47 = vpop.f32.mrf.mxu3  ;;  %v11989_v26 = vadd.f32 %v5129_v13, %v4847_v3  ;;  %v5482_v3 = vshll.u32 %v9510_v38, 16  ;;  %v6544_v13 = vor.u32 %v6543_v12, %v6540_v21  ;;  %v10204_v21 = vld [vmem:[#allocation2 + $0xa8] sm:$0xff]  }
 0x47c   : > { %v3979_v0 = vadd.f32 %v3886_v47, %v12938_v30  ;;  %9205 = vmatmul.msk.bf16.gmra.mxu0 %vm2288_vm3, %v6536_v5  ;;  %v9511_v47 = vld [vmem:[#allocation2 + $0x28] sm:$0xff]  ;;  %v11998_v5 = vpop.f32.mrf.mxu1 }
 0x47d   : > { %12939 = vst [vmem:[#allocation40_spill] sm:$0xff] %v11989_v26  ;;  %v6545_v32 = vsel %vm2589_vm4, %v6535_v41, %v6544_v13  ;;  %v9548_v41 = vld [vmem:[#allocation2 + $0x30] sm:$0xff] }
 0x47e   : > { %v4849_v42 = vadd.f32 %v11646_v28, %v3979_v0  ;;  %v6547_v28 = vshrl.u32 %v10722_v34, 16  ;;  %v6550_v0 = vshll.u32 %v10722_v34, 16 }
 0x47f   : > { %8996 = vmatmul.msk.bf16.gmra.mxu2 %vm2288_vm3, %v10187_v61  ;;  %v5480_v61 = vshrl.u32 %v9510_v38, 16 }
 0x480   : > { %8909 = vmatmul.msk.bf16.gmra.mxu3 %vm2288_vm3, %v3656_v7  ;;  %9240 = vmatmul.msk.bf16.gmra.mxu1 %vm2288_vm3, %v10203_v36  ;;  %v5484_v7 = vrot.slane %v5482_v3, 1  ;;  %v5487_v36 = vshll.u32 %v9511_v47, 16  ;;  %v10745_v3 = vld [vmem:[#allocation2 + $0x118] sm:$0xff]  }
 0x482   : > { %v5132_v20 = vpop.f32.mrf.mxu2  ;;  %v5485_v31 = vor.u32 %v5484_v7, %v5480_v61  ;;  %v5489_v45 = vrot.slane %v5487_v36, 1  ;;  %v12946_v7 = vld [vmem:[#allocation46_spill] sm:$0xff] }
 0x483   : > { %v3889_v60 = vpop.f32.mrf.mxu3  ;;  %v12001_v30 = vadd.f32 %v5132_v20, %v4848_v6  ;;  %v9512_v20 = vld [vmem:[#allocation2 + $0x30] sm:$0xff] }
 0x484   : > { %v3980_v43 = vadd.f32 %v3889_v60, %v12941_v62  ;;  %v12011_v12 = vpop.f32.mrf.mxu1  ;;  %v5490_v38 = vsel %vm3396_vm5, %v5485_v31, %v5489_v45  ;;  %v6552_v62 = vrot.slane %v6550_v0, 4  ;;  %v7564_v31 = vshll.u32 %v9548_v41, 16 }
 0x485   : > { %12942 = vst [vmem:[#allocation42_spill] sm:$0xff] %v12001_v30 }
 0x48a   : > { %v5134_v60 = vpop.f32.mrf.mxu2 }
 0x48b   : > { %v3891_v26 = vpop.f32.mrf.mxu3  ;;  %v12009_v6 = vadd.f32 %v5134_v60, %v4849_v42  ;;  %v6549_v42 = vrot.slane %v6547_v28, 3  ;;  %v12021_v60 = vpop.f32.mrf.mxu0 }
 0x48c   : > { %v3981_v57 = vadd.f32 %v3891_v26, %v12944_v63  ;;  %9206 = vmatmul.msk.bf16.gmra.mxu0 %vm2288_vm3, %v6545_v32  ;;  %v4850_v26 = vadd.f32 %v11658_v54, %v3980_v43  ;;  %v9549_v32 = vld [vmem:[#allocation2 + $0x38] sm:$0xff]  ;;  %12948 = vst [vmem:[#allocation87_spill] sm:$0xff] %v12021_v60  ;;  %v12023_v30 = vpop.f32.mrf.mxu1  ;;  %v7562_v54 = vshrl.u32 %v9548_v41, 16  ;;  %v10205_v41 = vld [vmem:[#allocation2 + $0xb0] sm:$0xff]   ;;  %v6556_v60 = vshrl.u32 %v10724_v14, 16 }
 0x48d   : > { %12945 = vst [vmem:[#allocation44_spill] sm:$0xff] %v12009_v6  ;;  %v5495_v6 = vshll.u32 %v9512_v20, 16  ;;  %v7569_v18 = vshll.u32 %v9549_v32, 16 }
 0x48e   : > { %12949 = vst [vmem:[#allocation88_spill] sm:$0xff] %v12023_v30  ;;  %v4851_v28 = vadd.f32 %v11672_v55, %v3981_v57  ;;  %v6559_v30 = vshll.u32 %v10724_v14, 16 }
 0x48f   : > { %8997 = vmatmul.msk.bf16.gmra.mxu2 %vm2288_vm3, %v10745_v3  ;;  %v7566_v3 = vrot.slane %v7564_v31, 1 }
 0x490   : > { %9138 = vmatmul.msk.bf16.vlgmr.msra.gmra.mxu3 %vm2288_vm3, %v5490_v38  ;;  %9241 = vmatmul.msk.bf16.gmra.mxu1 %vm2288_vm3, %v10204_v21  ;;  %v6553_v21 = vor.u32 %v6552_v62, %v6549_v42  ;;  %v5491_v38 = vshrl.u32 %v9511_v47, 16  ;;  %v7571_v42 = vrot.slane %v7569_v18, 1 }
 0x491   : > { %v7567_v47 = vor.u32 %v7566_v3, %v7562_v54  ;;  %v12952_v3 = vld [vmem:[#allocation50_spill] sm:$0xff] }
 0x492   : > { %v5137_v61 = vpop.f32.mrf.mxu2  ;;  %v6554_v0 = vsel %vm2589_vm4, %v6544_v13, %v6553_v21 }
 0x493   : > { %v3894_v63 = vpop.f32.mrf.mxu3  ;;  %v12019_v34 = vadd.f32 %v5137_v61, %v4850_v26  ;;  %v12950_v26 = vld [vmem:[#allocation48_spill] sm:$0xff]  ;;  %v12032_v55 = vpop.f32.mrf.mxu0  ;;  %v7572_v57 = vsel %vm3396_vm5, %v7567_v47, %v7571_v42 }
 0x494   : > { %v3982_v36 = vadd.f32 %v3894_v63, %v12946_v7  ;;  %v5493_v63 = vor.u32 %v5491_v38, %v5489_v45  ;;  %v5497_v7 = vrot.slane %v5495_v6, 1  ;;  %v12038_v13 = vpop.f32.mrf.mxu1  ;;  %v6558_v6 = vrot.slane %v6556_v60, 3  ;;  %v9513_v38 = vld [vmem:[#allocation2 + $0x38] sm:$0xff]  ;;  %v10726_v60 = vld [vmem:[#allocation2 + $0x10c] sm:$0xff]  }
 0x495   : > { %12947 = vst [vmem:[#allocation46_spill] sm:$0xff] %v12019_v34 }
 0x496   : > { %v5498_v31 = vsel %vm3396_vm5, %v5493_v63, %v5497_v7  ;;  %v4852_v45 = vadd.f32 %v11683_v15, %v3982_v36  ;;  %v5503_v63 = vshll.u32 %v9513_v38, 16 }
 0x498   : > { %v5505_v36 = vrot.slane %v5503_v63, 1 }
 0x49a   : > { %v5139_v34 = vpop.f32.mrf.mxu2 }
 0x49b   : > { %v3896_v43 = vpop.f32.mrf.mxu3  ;;  %v12029_v62 = vadd.f32 %v5139_v34, %v4851_v28  ;;  %v6561_v34 = vrot.slane %v6559_v30, 4 }
 0x49c   : > { %v3983_v61 = vadd.f32 %v3896_v43, %v12950_v26  ;;  %9207 = vmatmul.msk.bf16.gmra.mxu0 %vm2288_vm3, %v6554_v0  ;;  %v9550_v43 = vld [vmem:[#allocation2 + $0x40] sm:$0xff]  ;;  %v7573_v26 = vshrl.u32 %v9549_v32, 16 }
 0x49d   : > { %12951 = vst [vmem:[#allocation48_spill] sm:$0xff] %v12029_v62  ;;  %v6562_v0 = vor.u32 %v6561_v34, %v6558_v6  ;;  %v7577_v47 = vshll.u32 %v9550_v43, 16  ;;  %v10206_v34 = vld [vmem:[#allocation2 + $0xb8] sm:$0xff]  }
 0x49e   : > { %v4853_v62 = vadd.f32 %v11696_v48, %v3983_v61  ;;  %v7575_v32 = vor.u32 %v7573_v26, %v7571_v42  ;;  %v6565_v48 = vshrl.u32 %v10726_v60, 16  ;;  %v6568_v61 = vshll.u32 %v10726_v60, 16 }
 0x49f   : > { %9398 = vmatmul.msk.bf16.vlgmr.msra.gmra.mxu2 %vm2288_vm3, %v7572_v57  ;;  %v6563_v15 = vsel %vm2589_vm4, %v6553_v21, %v6562_v0  ;;  %v7579_v6 = vrot.slane %v7577_v47, 1 }
 0x4a0   : > { %9139 = vmatmul.msk.bf16.gmra.mxu3 %vm2288_vm3, %v5498_v31  ;;  %9242 = vmatmul.msk.bf16.gmra.mxu1 %vm2288_vm3, %v10205_v41  ;;  %v5499_v31 = vshrl.u32 %v9512_v20, 16  ;;  %v12044_v41 = vpop.f32.mrf.mxu0  ;;  %v6567_v42 = vrot.slane %v6565_v48, 3  ;;  %v6570_v26 = vrot.slane %v6568_v61, 4 }
 0x4a1   : > { %12954 = vst [vmem:[#allocation89_spill] sm:$0xff] %v12044_v41  ;;  %v7580_v21 = vsel %vm3396_vm5, %v7575_v32, %v7579_v6 }
 0x4a2   : > { %v5142_v54 = vpop.f32.mrf.mxu2  ;;  %v5501_v30 = vor.u32 %v5499_v31, %v5497_v7  ;;  %v12958_v31 = vld [vmem:[#allocation54_spill] sm:$0xff] }
 0x4a3   : > { %v3899_v18 = vpop.f32.mrf.mxu3  ;;  %v12042_v28 = vadd.f32 %v5142_v54, %v4852_v45 }
 0x4a4   : > { %v3984_v14 = vadd.f32 %v3899_v18, %v12952_v3  ;;  %v12048_v18 = vpop.f32.mrf.mxu1  ;;  %v12955_v3 = vld [vmem:[#allocation52_spill] sm:$0xff] }
 0x4a5   : > { %12953 = vst [vmem:[#allocation50_spill] sm:$0xff] %v12042_v28  ;;  %v5506_v28 = vsel %vm3396_vm5, %v5501_v30, %v5505_v36  ;;  %v9551_v30 = vld [vmem:[#allocation2 + $0x48] sm:$0xff] }
 0x4a6   : > { %v4854_v63 = vadd.f32 %v11707_v4, %v3984_v14 }
 0x4a8   : > { %v12060_v47 = vpop.f32.mrf.mxu0 }
 0x4a9   : > { %12957 = vst [vmem:[#allocation90_spill] sm:$0xff] %v12060_v47  ;;  %v10728_v47 = vld [vmem:[#allocation2 + $0x114] sm:$0xff]  }
 0x4aa   : > { %v5144_v54 = vpop.f32.mrf.mxu2 }
 0x4ab   : > { %v3901_v57 = vpop.f32.mrf.mxu3  ;;  %v12052_v20 = vadd.f32 %v5144_v54, %v4853_v62  ;;  %v9514_v62 = vld [vmem:[#allocation2 + $0x40] sm:$0xff]  ;;  %v5507_v54 = vshrl.u32 %v9513_v38, 16 }
 0x4ac   : > { %v3985_v45 = vadd.f32 %v3901_v57, %v12955_v3  ;;  %9208 = vmatmul.msk.bf16.gmra.mxu0 %vm2288_vm3, %v6563_v15  ;;  %v6571_v3 = vor.u32 %v6570_v26, %v6567_v42  ;;  %v5511_v32 = vshll.u32 %v9514_v62, 16  ;;  %v10207_v26 = vld [vmem:[#allocation2 + $0xc0] sm:$0xff]  }
 0x4ad   : > { %12956 = vst [vmem:[#allocation52_spill] sm:$0xff] %v12052_v20  ;;  %v5509_v48 = vor.u32 %v5507_v54, %v5505_v36 }
 0x4ae   : > { %v4855_v4 = vadd.f32 %v11720_v49, %v3985_v45  ;;  %v6572_v14 = vsel %vm2589_vm4, %v6562_v0, %v6571_v3  ;;  %v5513_v61 = vrot.slane %v5511_v32, 1  ;;  %v6574_v49 = vshrl.u32 %v10728_v47, 16  ;;  %v9515_v32 = vld [vmem:[#allocation2 + $0x48] sm:$0xff] }
 0x4af   : > { %9399 = vmatmul.msk.bf16.gmra.mxu2 %vm2288_vm3, %v7580_v21  ;;  %v7581_v21 = vshrl.u32 %v9550_v43, 16  ;;  %v6577_v45 = vshll.u32 %v10728_v47, 16  ;;  %v9552_v47 = vld [vmem:[#allocation2 + $0x50] sm:$0xff] }
 0x4b0   : > { %9140 = vmatmul.msk.bf16.gmra.mxu3 %vm2288_vm3, %v5506_v28  ;;  %9243 = vmatmul.msk.bf16.gmra.mxu1 %vm2288_vm3, %v10206_v34  ;;  %v12065_v28 = vpop.f32.mrf.mxu1  ;;  %v7585_v34 = vshll.u32 %v9551_v30, 16  ;;  %v12073_v38 = vpop.f32.mrf.mxu0  ;;  %v5514_v43 = vsel %vm3396_vm5, %v5509_v48, %v5513_v61 }
 0x4b1   : > { %12962 = vst [vmem:[#allocation91_spill] sm:$0xff] %v12073_v38  ;;  %v6579_v54 = vrot.slane %v6577_v45, 4 }
 0x4b2   : > { %v5147_v15 = vpop.f32.mrf.mxu2 }
 0x4b3   : > { %v3904_v7 = vpop.f32.mrf.mxu3  ;;  %v12063_v60 = vadd.f32 %v5147_v15, %v4854_v63  ;;  %v7583_v63 = vor.u32 %v7581_v21, %v7579_v6  ;;  %v7587_v15 = vrot.slane %v7585_v34, 1  ;;  %v12963_v34 = vld [vmem:[#allocation58_spill] sm:$0xff] }
 0x4b4   : > { %v3986_v57 = vadd.f32 %v3904_v7, %v12958_v31  ;;  %v12960_v7 = vld [vmem:[#allocation56_spill] sm:$0xff] }
 0x4b5   : > { %12959 = vst [vmem:[#allocation54_spill] sm:$0xff] %v12063_v60  ;;  %v7588_v36 = vsel %vm3396_vm5, %v7583_v63, %v7587_v15  ;;  %v7593_v63 = vshll.u32 %v9552_v47, 16 }
 0x4b8   : > { %v12076_v0 = vpop.f32.mrf.mxu1 }
 0x4ba   : > { %v5149_v41 = vpop.f32.mrf.mxu2 }
 0x4bb   : > { %v3906_v20 = vpop.f32.mrf.mxu3  ;;  %v12071_v42 = vadd.f32 %v5149_v41, %v4855_v4  ;;  %v4856_v41 = vadd.f32 %v11731_v58, %v3986_v57 }
 0x4bc   : > { %v3987_v31 = vadd.f32 %v3906_v20, %v12960_v7  ;;  %9209 = vmatmul.msk.bf16.gmra.mxu0 %vm2288_vm3, %v6572_v14  ;;  %v6576_v20 = vrot.slane %v6574_v49, 3  ;;  %v5519_v7 = vshll.u32 %v9515_v32, 16 }
 0x4bd   : > { %12961 = vst [vmem:[#allocation56_spill] sm:$0xff] %v12071_v42  ;;  %v5515_v42 = vshrl.u32 %v9514_v62, 16  ;;  %v10208_v62 = vld [vmem:[#allocation2 + $0xc8] sm:$0xff]  }
 0x4be   : > { %v6580_v48 = vor.u32 %v6579_v54, %v6576_v20  ;;  %v4857_v58 = vadd.f32 %v11744_v8, %v3987_v31  ;;  %v5521_v45 = vrot.slane %v5519_v7, 1  ;;  %v7595_v54 = vrot.slane %v7593_v63, 1 }
 0x4bf   : > { %9400 = vmatmul.msk.bf16.gmra.mxu2 %vm2288_vm3, %v7588_v36  ;;  %v5517_v49 = vor.u32 %v5515_v42, %v5513_v61  ;;  %v9516_v42 = vld [vmem:[#allocation2 + $0x50] sm:$0xff] }
 0x4c0   : > { %9141 = vmatmul.msk.bf16.gmra.mxu3 %vm2288_vm3, %v5514_v43  ;;  %9244 = vmatmul.msk.bf16.gmra.mxu1 %vm2288_vm3, %v10207_v26  ;;  %v12086_v43 = vpop.f32.mrf.mxu0  ;;  %v7589_v26 = vshrl.u32 %v9551_v30, 16  ;;  %v12088_v36 = vpop.f32.mrf.mxu1  ;;  %v6581_v57 = vsel %vm2589_vm4, %v6571_v3, %v6580_v48 }
 0x4c1   : > { %12965 = vst [vmem:[#allocation92_spill] sm:$0xff] %v12086_v43 }
 0x4c2   : > { %v5152_v4 = vpop.f32.mrf.mxu2  ;;  %v7591_v20 = vor.u32 %v7589_v26, %v7587_v15  ;;  %v12967_v26 = vld [vmem:[#allocation62_spill] sm:$0xff] }
 0x4c3   : > { %v3909_v6 = vpop.f32.mrf.mxu3  ;;  %v12084_v14 = vadd.f32 %v5152_v4, %v4856_v41 }
 0x4c4   : > { %v3988_v21 = vadd.f32 %v3909_v6, %v12963_v34  ;;  %v10730_v6 = vld [vmem:[#allocation2 + $0x11c] sm:$0xff]   ;;  %v12966_v34 = vld [vmem:[#allocation60_spill] sm:$0xff]  ;;  %v7596_v8 = vsel %vm3396_vm5, %v7591_v20, %v7595_v54  ;;  %v7597_v20 = vshrl.u32 %v9552_v47, 16 }
 0x4c5   : > { %12964 = vst [vmem:[#allocation58_spill] sm:$0xff] %v12084_v14  ;;  %v5522_v14 = vsel %vm3396_vm5, %v5517_v49, %v5521_v45  ;;  %v6583_v43 = vshrl.u32 %v10730_v6, 16  ;;  %v6586_v38 = vshll.u32 %v10730_v6, 16  ;;  %v5523_v6 = vshrl.u32 %v9515_v32, 16 }
 0x4c6   : > { %v4858_v61 = vadd.f32 %v11753_v29, %v3988_v21 }
 0x4c7   : > { %v6585_v31 = vrot.slane %v6583_v43, 3  ;;  %v6588_v15 = vrot.slane %v6586_v38, 4  ;;  %v5525_v21 = vor.u32 %v5523_v6, %v5521_v45  ;;  %v12971_v6 = vld [vmem:[#allocation66_spill] sm:$0xff] }
 0x4c8   : > { %v12104_v7 = vpop.f32.mrf.mxu1 }
 0x4c9   : > { %v12109_v49 = vor.u32 %v6588_v15, %v6585_v31  ;;  %v7599_v31 = vor.u32 %v7597_v20, %v7595_v54  ;;  %v9517_v54 = vld [vmem:[#allocation2 + $0x58] sm:$0xff]  ;;  %v9554_v20 = vld [vmem:[#allocation2 + $0x60] sm:$0xff] }
 0x4ca   : > { %v5154_v4 = vpop.f32.mrf.mxu2 }
 0x4cb   : > { %v3911_v60 = vpop.f32.mrf.mxu3  ;;  %v12094_v30 = vadd.f32 %v5154_v4, %v4857_v58  ;;  %v6590_v38 = vsel %vm2589_vm4, %v6580_v48, %v12109_v49 }
 0x4cc   : > { %v3989_v41 = vadd.f32 %v3911_v60, %v12966_v34  ;;  %9210 = vmatmul.msk.bf16.gmra.mxu0 %vm2288_vm3, %v6581_v57  ;;  %v12101_v60 = vpop.f32.mrf.mxu0  ;;  %v5527_v34 = vshll.u32 %v9516_v42, 16 }
 0x4ce   : > { %v4859_v29 = vadd.f32 %v11766_v27, %v3989_v41  ;;  %v5529_v43 = vrot.slane %v5527_v34, 1  ;;  %v10209_v41 = vld [vmem:[#allocation2 + $0xd0] sm:$0xff]  }
 0x4cf   : > { %9401 = vmatmul.msk.bf16.gmra.mxu2 %vm2288_vm3, %v7596_v8 }
 0x4d0   : > { %9142 = vmatmul.msk.bf16.gmra.mxu3 %vm2288_vm3, %v5522_v14  ;;  %9245 = vmatmul.msk.bf16.gmra.mxu1 %vm2288_vm3, %v10208_v62  ;;  %v9553_v14 = vld [vmem:[#allocation2 + $0x58] sm:$0xff]  ;;  %v12120_v47 = vpop.f32.mrf.mxu1  ;;  %v5530_v27 = vsel %vm3396_vm5, %v5525_v21, %v5529_v43 }
 0x4d1   : > { %v7601_v4 = vshll.u32 %v9553_v14, 16  ;;  %v7605_v21 = vshrl.u32 %v9553_v14, 16 }
 0x4d2   : > { %v5157_v58 = vpop.f32.mrf.mxu2 }
 0x4d3   : > { %v3914_v3 = vpop.f32.mrf.mxu3  ;;  %v12107_v57 = vadd.f32 %v5157_v58, %v4858_v61  ;;  %v7603_v32 = vrot.slane %v7601_v4, 1 }
 0x4d4   : > { %v3990_v63 = vadd.f32 %v3914_v3, %v12967_v26  ;;  %v12114_v8 = vpop.f32.mrf.mxu0  ;;  %v12969_v3 = vld [vmem:[#allocation64_spill] sm:$0xff] }
 0x4d5   : > { %12968 = vst [vmem:[#allocation60_spill] sm:$0xff] %v12107_v57  ;;  %v7604_v48 = vsel %vm3396_vm5, %v7599_v31, %v7603_v32  ;;  %v7607_v57 = vor.u32 %v7605_v21, %v7603_v32  ;;  %v12975_v32 = vld [vmem:[#allocation72_spill] sm:$0xff] }
 0x4d6   : > { %v4860_v58 = vadd.f32 %v11777_v44, %v3990_v63  ;;  %v9555_v21 = vld [vmem:[#allocation2 + $0x68] sm:$0xff] }
 0x4da   : > { %v5159_v61 = vpop.f32.mrf.mxu2 }
 0x4db   : > { %v3916_v62 = vpop.f32.mrf.mxu3  ;;  %v12118_v15 = vadd.f32 %v5159_v61, %v4859_v29  ;;  %v5535_v29 = vshll.u32 %v9517_v54, 16  ;;  %v5531_v61 = vshrl.u32 %v9516_v42, 16 }
 0x4dc   : > { %v3991_v26 = vadd.f32 %v3916_v62, %v12969_v3  ;;  %9211 = vmatmul.msk.bf16.gmra.mxu0 %vm2288_vm3, %v6590_v38  ;;  %v12131_v38 = vpop.f32.mrf.mxu1  ;;  %v7609_v3 = vshll.u32 %v9554_v20, 16 }
 0x4dd   : > { %12970 = vst [vmem:[#allocation62_spill] sm:$0xff] %v12118_v15  ;;  %v12973_v15 = vld [vmem:[#allocation69_spill] sm:$0xff] }
 0x4de   : > { %v4861_v31 = vadd.f32 %v11790_v16, %v3991_v26  ;;  %v9518_v26 = vld [vmem:[#allocation2 + $0x60] sm:$0xff] }
 0x4df   : > { %9402 = vmatmul.msk.bf16.gmra.mxu2 %vm2288_vm3, %v7604_v48  ;;  %v5537_v48 = vrot.slane %v5535_v29, 1 }
 0x4e0   : > { %9143 = vmatmul.msk.bf16.gmra.mxu3 %vm2288_vm3, %v5530_v27  ;;  %9246 = vmatmul.msk.bf16.gmra.mxu1 %vm2288_vm3, %v10209_v41  ;;  %v5533_v41 = vor.u32 %v5531_v61, %v5529_v43  ;;  %v5539_v61 = vshrl.u32 %v9517_v54, 16  ;;  %v10211_v54 = vld [vmem:[#allocation2 + $0xe0] sm:$0xff]  }
 0x4e2   : > { %v5162_v4 = vpop.f32.mrf.mxu2 }
 0x4e3   : > { %v3919_v45 = vpop.f32.mrf.mxu3  ;;  %v12129_v62 = vadd.f32 %v5162_v4, %v4860_v58  ;;  %v10210_v58 = vld [vmem:[#allocation2 + $0xd8] sm:$0xff]   ;;  %v5538_v4 = vsel %vm3396_vm5, %v5533_v41, %v5537_v48  ;;  %v7613_v41 = vshrl.u32 %v9554_v20, 16 }
 0x4e4   : > { %v3992_v34 = vadd.f32 %v3919_v45, %v12971_v6  ;;  %v7611_v45 = vrot.slane %v7609_v3, 1  ;;  %v12142_v16 = vpop.f32.mrf.mxu1 }
 0x4e5   : > { %12972 = vst [vmem:[#allocation64_spill] sm:$0xff] %v12129_v62 }
 0x4e6   : > { %v7612_v42 = vsel %vm3396_vm5, %v7607_v57, %v7611_v45  ;;  %v4862_v43 = vadd.f32 %v11801_v56, %v3992_v34  ;;  %v7615_v62 = vor.u32 %v7613_v41, %v7611_v45 }
 0x4ea   : > { %v5164_v63 = vpop.f32.mrf.mxu2 }
 0x4eb   : > { %v3921_v27 = vpop.f32.mrf.mxu3  ;;  %v12135_v6 = vadd.f32 %v5164_v63, %v4861_v31  ;;  %v7617_v31 = vshll.u32 %v9555_v21, 16 }
 0x4ec   : > { %v3993_v44 = vadd.f32 %v3921_v27, %v12973_v15  ;;  %v5543_v27 = vshll.u32 %v9518_v26, 16 }
 0x4ed   : > { %12974 = vst [vmem:[#allocation66_spill] sm:$0xff] %v12135_v6  ;;  %v12976_v6 = vld [vmem:[#allocation73_spill] sm:$0xff] }
 0x4ee   : > { %v4863_v57 = vadd.f32 %v11812_v19, %v3993_v44  ;;  %v9519_v44 = vld [vmem:[#allocation2 + $0x68] sm:$0xff] }
 0x4ef   : > { %9403 = vmatmul.msk.bf16.gmra.mxu2 %vm2288_vm3, %v7612_v42  ;;  %v12149_v42 = vpop.f32.mrf.mxu1  ;;  %v5551_v41 = vshll.u32 %v9519_v44, 16 }
 0x4f0   : > { %9144 = vmatmul.msk.bf16.gmra.mxu3 %vm2288_vm3, %v5538_v4  ;;  %9247 = vmatmul.msk.bf16.gmra.mxu1 %vm2288_vm3, %v10210_v58  ;;  %v5541_v58 = vor.u32 %v5539_v61, %v5537_v48  ;;  %v5545_v4 = vrot.slane %v5543_v27, 1  ;;  %v9556_v61 = vld [vmem:[#allocation2 + $0x70] sm:$0xff] }
 0x4f2   : > { %v5167_v29 = vpop.f32.mrf.mxu2 }
 0x4f3   : > { %v3924_v14 = vpop.f32.mrf.mxu3  ;;  %v12146_v3 = vadd.f32 %v5167_v29, %v4862_v43  ;;  %v5546_v43 = vsel %vm3396_vm5, %v5541_v58, %v5545_v4  ;;  %v5547_v58 = vshrl.u32 %v9518_v26, 16 }
 0x4f4   : > { %v3994_v15 = vadd.f32 %v3924_v14, %v12975_v32  ;;  %v7619_v14 = vrot.slane %v7617_v31, 1 }
 0x4f6   : > { %v7620_v19 = vsel %vm3396_vm5, %v7615_v62, %v7619_v14  ;;  %v4864_v48 = vadd.f32 %v11823_v37, %v3994_v15 }
 0x4f7   : > { %v12163_v31 = vpop.f32.mrf.mxu1 }
 0x4fa   : > { %v5169_v34 = vpop.f32.mrf.mxu2 }
 0x4fb   : > { %v3926_v63 = vpop.f32.mrf.mxu3  ;;  %v12152_v32 = vadd.f32 %v5169_v34, %v4863_v57  ;;  %v7625_v57 = vshll.u32 %v9556_v61, 16 }
 0x4fc   : > { %v3995_v56 = vadd.f32 %v3926_v63, %v12976_v6  ;;  %v12978_v6 = vld [vmem:[#allocation74_spill] sm:$0xff]  ;;  %v7621_v63 = vshrl.u32 %v9555_v21, 16 }
 0x4fd   : > { %12977 = vst [vmem:[#allocation69_spill] sm:$0xff] %v12152_v32 }
 0x4fe   : > { %v4865_v62 = vadd.f32 %v11835_v25, %v3995_v56  ;;  %v7623_v32 = vor.u32 %v7621_v63, %v7619_v14  ;;  %v9557_v14 = vld [vmem:[#allocation2 + $0x78] sm:$0xff]  ;;  %v5555_v63 = vshrl.u32 %v9519_v44, 16 }
 0x4ff   : > { %9404 = vmatmul.msk.bf16.gmra.mxu2 %vm2288_vm3, %v7620_v19  ;;  %v12980_v19 = vld [vmem:[#allocation75_spill] sm:$0xff] }
 0x500   : > { %9145 = vmatmul.msk.bf16.gmra.mxu3 %vm2288_vm3, %v5546_v43  ;;  %9248 = vmatmul.msk.bf16.gmra.mxu1 %vm2288_vm3, %v10211_v54  ;;  %v5549_v43 = vor.u32 %v5547_v58, %v5545_v4  ;;  %v5553_v54 = vrot.slane %v5551_v41, 1  ;;  %v9520_v4 = vld [vmem:[#allocation2 + $0x70] sm:$0xff]  ;;  %v7633_v58 = vshll.u32 %v9557_v14, 16 }
 0x502   : > { %v5172_v29 = vpop.f32.mrf.mxu2 }
 0x503   : > { %v3929_v20 = vpop.f32.mrf.mxu3  ;;  %v12161_v27 = vadd.f32 %v5172_v29, %v4864_v48  ;;  %v10212_v48 = vld [vmem:[#allocation2 + $0xe8] sm:$0xff]   ;;  %v5554_v29 = vsel %vm3396_vm5, %v5549_v43, %v5553_v54 }
 0x504   : > { %v3996_v45 = vadd.f32 %v3929_v20, %v12978_v6  ;;  %v7627_v20 = vrot.slane %v7625_v57, 1  ;;  %v5559_v57 = vshll.u32 %v9520_v4, 16 }
 0x505   : > { %12979 = vst [vmem:[#allocation72_spill] sm:$0xff] %v12161_v27  ;;  %v12170_v27 = vpop.f32.mrf.mxu1 }
 0x506   : > { %v7628_v25 = vsel %vm3396_vm5, %v7623_v32, %v7627_v20  ;;  %v4866_v21 = vadd.f32 %v11845_v9, %v3996_v45  ;;  %v7635_v45 = vrot.slane %v7633_v58, 1 }
 0x50a   : > { %v5174_v15 = vpop.f32.mrf.mxu2 }
 0x50b   : > { %v3931_v34 = vpop.f32.mrf.mxu3  ;;  %v12167_v6 = vadd.f32 %v5174_v15, %v4865_v62  ;;  %v7629_v62 = vshrl.u32 %v9556_v61, 16  ;;  %v5557_v15 = vor.u32 %v5555_v63, %v5553_v54  ;;  %v9558_v63 = vld [vmem:[#allocation2 + $0x80] sm:$0xff] }
 0x50c   : > { %v3997_v37 = vadd.f32 %v3931_v34, %v12980_v19 }
 0x50d   : > { %v12179_v34 = vpop.f32.mrf.mxu1  ;;  %v7631_v9 = vor.u32 %v7629_v62, %v7627_v20 }
 0x50e   : > { %v4867_v32 = vadd.f32 %v11857_v35, %v3997_v37  ;;  %v9521_v35 = vld [vmem:[#allocation2 + $0x78] sm:$0xff] }
 0x50f   : > { %9405 = vmatmul.msk.bf16.gmra.mxu2 %vm2288_vm3, %v7628_v25  ;;  %v5567_v58 = vshll.u32 %v9521_v35, 16 }
 0x510   : > { %9146 = vmatmul.msk.bf16.gmra.mxu3 %vm2288_vm3, %v5554_v29  ;;  %9249 = vmatmul.msk.bf16.gmra.mxu1 %vm2288_vm3, %v10212_v48  ;;  %v5561_v48 = vrot.slane %v5559_v57, 1 }
 0x512   : > { %v5177_v56 = vpop.f32.mrf.mxu2  ;;  %v5562_v44 = vsel %vm3396_vm5, %v5557_v15, %v5561_v48  ;;  %v5563_v15 = vshrl.u32 %v9520_v4, 16 }
 0x513   : > { %v5856_v26 = vpop.f32.mrf.mxu3  ;;  %v12177_v41 = vadd.f32 %v5177_v56, %v4866_v21  ;;  %v10213_v56 = vld [vmem:[#allocation2 + $0xf0] sm:$0xff]  }
 0x514   : > { %v6016_v43 = vadd.f32 %v5856_v26, %v11482_v53  ;;  %v7636_v53 = vsel %vm3396_vm5, %v7631_v9, %v7635_v45 }
 0x515   : > { %v12198_v20 = vpop.f32.mrf.mxu1 }
 0x516   : > { %v6886_v21 = vadd.f32 %v11648_v40, %v6016_v43  ;;  %v12196_v40 = vld [vmem:[%s12746_s4] ss:$0 sm:$0xff] }
 0x518   : > { %v7264_v37 = vadd.f32 %v11865_v17, %v6886_v21  ;;  %v5569_v17 = vrot.slane %v5567_v58, 1 }
 0x51a   : > { %v5179_v29 = vpop.f32.mrf.mxu2 }
 0x51b   : > { %v5858_v19 = vpop.f32.mrf.mxu3  ;;  %v12183_v25 = vadd.f32 %v5179_v29, %v4867_v32  ;;  %v7637_v32 = vshrl.u32 %v9557_v14, 16 }
 0x51c   : > { %v6017_v61 = vadd.f32 %v5858_v19, %v11493_v1  ;;  %v7641_v1 = vshll.u32 %v9558_v63, 16 }
 0x51d   : > { %v7639_v14 = vor.u32 %v7637_v32, %v7635_v45  ;;  %v12981_v45 = vld [vmem:[#allocation76_spill] sm:$0xff] }
 0x51e   : > { %v6887_v62 = vadd.f32 %v11665_v10, %v6017_v61  ;;  %v10214_v61 = vld [vmem:[#allocation2 + $0xf8] sm:$0xff]  }
 0x51f   : > { %9406 = vmatmul.msk.bf16.gmra.mxu2 %vm2288_vm3, %v7636_v53  ;;  %v7643_v53 = vrot.slane %v7641_v1, 1  ;;  %v9559_v1 = vld [vmem:[#allocation2 + $0x88] sm:$0xff] }
 0x520   : > { %9147 = vmatmul.msk.bf16.gmra.mxu3 %vm2288_vm3, %v5562_v44  ;;  %9250 = vmatmul.msk.bf16.gmra.mxu1 %vm2288_vm3, %v10213_v56  ;;  %v7265_v10 = vadd.f32 %v11877_v33, %v6887_v62  ;;  %v5565_v44 = vor.u32 %v5563_v15, %v5561_v48  ;;  %v5571_v15 = vshrl.u32 %v9521_v35, 16 }
 0x521   : > { %v7644_v33 = vsel %vm3396_vm5, %v7639_v14, %v7643_v53 }
 0x522   : > { %v7938_v26 = vpop.f32.mrf.mxu2 }
 0x523   : > { %v5861_v54 = vpop.f32.mrf.mxu3  ;;  %v8098_v57 = vadd.f32 %v7938_v26, %v7264_v37  ;;  %v12213_v37 = vpop.f32.mrf.mxu1 }
 0x524   : > { %v6018_v29 = vadd.f32 %v5861_v54, %v11507_v51  ;;  %v5570_v51 = vsel %vm3396_vm5, %v5565_v44, %v5569_v17 }
 0x525   : > { %v8166_v43 = vadd.f32 %v12196_v40, %v8098_v57 }
 0x526   : > { %v6888_v26 = vadd.f32 %v11674_v23, %v6018_v29  ;;  %v9522_v23 = vld [vmem:[#allocation2 + $0x80] sm:$0xff]  ;;  %v12982_v29 = vld [vmem:[#allocation5_spill] sm:$0xff] }
 0x527   : > { %v8230_v19 = vmax.f32 %v8166_v43, 0.0  ;;  %v5575_v44 = vshll.u32 %v9522_v23, 16 }
 0x528   : > { %v7266_v43 = vadd.f32 %v11887_v11, %v6888_v26  ;;  %v12983_v11 = vld [vmem:[#allocation77_spill] sm:$0xff] }
 0x529   : > { %v8294_v9 = vpack.c.bf16 %v8230_v19, %v8230_v19 }
 0x52a   : > { %v7940_v56 = vpop.f32.mrf.mxu2 }
 0x52b   : > { %v5863_v21 = vpop.f32.mrf.mxu3  ;;  %8358 = vst.msk [vmem:[%s12207_s29] sm:$0xf] %vm1897_vm2, %v8294_v9  ;;  %v8099_v4 = vadd.f32 %v7940_v56, %v7265_v10  ;;  %v12228_v56 = vpop.f32.mrf.mxu1 }
 0x52c   : > { %v6019_v54 = vadd.f32 %v5863_v21, %v12981_v45  ;;  %v7649_v21 = vshll.u32 %v9559_v1, 16 }
 0x52d   : > { %v8167_v57 = vadd.f32 %v12196_v40, %v8099_v4  ;;  %v5573_v4 = vor.u32 %v5571_v15, %v5569_v17  ;;  %v10215_v17 = vld [vmem:[#allocation2 + $0x100] sm:$0xff]   ;;  %v9523_v15 = vld [vmem:[#allocation2 + $0x88] sm:$0xff] }
 0x52e   : > { %v6889_v9 = vadd.f32 %v12982_v29, %v6019_v54  ;;  %v7651_v54 = vrot.slane %v7649_v21, 1  ;;  %v12985_v29 = vld [vmem:[#allocation78_spill] sm:$0xff] }
 0x52f   : > { %v8231_v48 = vmax.f32 %v8167_v57, 0.0  ;;  %9407 = vmatmul.msk.bf16.gmra.mxu2 %vm2288_vm3, %v7644_v33 }
 0x530   : > { %9148 = vmatmul.msk.bf16.gmra.mxu3 %vm2288_vm3, %v5570_v51  ;;  %9251 = vmatmul.msk.bf16.gmra.mxu1 %vm2288_vm3, %v10214_v61  ;;  %v7645_v61 = vshrl.u32 %v9558_v63, 16  ;;  %v7267_v33 = vadd.f32 %v11899_v59, %v6889_v9 }
 0x531   : > { %v8295_v58 = vpack.c.bf16 %v8231_v48, %v8231_v48  ;;  %v5577_v48 = vrot.slane %v5575_v44, 1 }
 0x532   : > { %v7943_v32 = vpop.f32.mrf.mxu2  ;;  %v7647_v45 = vor.u32 %v7645_v61, %v7643_v53 }
 0x533   : > { %v5866_v62 = vpop.f32.mrf.mxu3  ;;  %8359 = vst.msk [vmem:[%s12207_s29 + $0x4] sm:$0xf] %vm1897_vm2, %v8295_v58  ;;  %v8100_v19 = vadd.f32 %v7943_v32, %v7266_v43  ;;  %v12984_v43 = vld [vmem:[#allocation6_spill] sm:$0xff]  ;;  %v5578_v63 = vsel %vm3396_vm5, %v5573_v4, %v5577_v48  ;;  %v12241_v53 = vpop.f32.mrf.mxu1  ;;  %v9560_v4 = vld [vmem:[#allocation2 + $0x90] sm:$0xff] }
 0x534   : > { %v6020_v26 = vadd.f32 %v5866_v62, %v12983_v11  ;;  %v7652_v59 = vsel %vm3396_vm5, %v7647_v45, %v7651_v54  ;;  %v5583_v11 = vshll.u32 %v9523_v15, 16  ;;  %v7657_v45 = vshll.u32 %v9560_v4, 16 }
 0x535   : > { %v8168_v10 = vadd.f32 %v12196_v40, %v8100_v19 }
 0x536   : > { %v6890_v32 = vadd.f32 %v12984_v43, %v6020_v26  ;;  %v12986_v26 = vld [vmem:[#allocation7_spill] sm:$0xff]  ;;  %v5579_v43 = vshrl.u32 %v9522_v23, 16 }
 0x537   : > { %v8232_v14 = vmax.f32 %v8168_v10, 0.0 }
 0x538   : > { %v7268_v21 = vadd.f32 %v11909_v46, %v6890_v32 }
 0x539   : > { %v8296_v57 = vpack.c.bf16 %v8232_v14, %v8232_v14 }
 0x53a   : > { %v7945_v35 = vpop.f32.mrf.mxu2 }
 0x53b   : > { %v5868_v51 = vpop.f32.mrf.mxu3  ;;  %8360 = vst.msk [vmem:[%s12207_s29 + $0x8] sm:$0xf] %vm1897_vm2, %v8296_v57  ;;  %v8101_v58 = vadd.f32 %v7945_v35, %v7267_v33  ;;  %v7653_v35 = vshrl.u32 %v9559_v1, 16  ;;  %v10216_v1 = vld [vmem:[#allocation2 + $0x108] sm:$0xff]  }
 0x53c   : > { %v6021_v9 = vadd.f32 %v5868_v51, %v12985_v29  ;;  %v5585_v51 = vrot.slane %v5583_v11, 1 }
 0x53d   : > { %v8169_v19 = vadd.f32 %v12196_v40, %v8101_v58 }
 0x53e   : > { %v6891_v57 = vadd.f32 %v12986_v26, %v6021_v9  ;;  %v7659_v9 = vrot.slane %v7657_v45, 1 }
 0x53f   : > { %v8233_v62 = vmax.f32 %v8169_v19, 0.0  ;;  %9408 = vmatmul.msk.bf16.gmra.mxu2 %vm2288_vm3, %v7652_v59  ;;  %v12987_v19 = vld [vmem:[#allocation79_spill] sm:$0xff]  ;;  %v5581_v59 = vor.u32 %v5579_v43, %v5577_v48 }
 0x540   : > { %9149 = vmatmul.msk.bf16.gmra.mxu3 %vm2288_vm3, %v5578_v63  ;;  %9252 = vmatmul.msk.bf16.gmra.mxu1 %vm2288_vm3, %v10215_v17  ;;  %v7269_v32 = vadd.f32 %v11921_v52, %v6891_v57 }
 0x541   : > { %v8297_v10 = vpack.c.bf16 %v8233_v62, %v8233_v62  ;;  %v12251_v62 = vpop.f32.mrf.mxu1 }
 0x542   : > { %v7948_v14 = vpop.f32.mrf.mxu2 }
 0x543   : > { %v5871_v44 = vpop.f32.mrf.mxu3  ;;  %8361 = vst.msk [vmem:[%s12207_s29 + $0xc] sm:$0xf] %vm1897_vm2, %v8297_v10  ;;  %v8102_v61 = vadd.f32 %v7948_v14, %v7268_v21  ;;  %v7655_v10 = vor.u32 %v7653_v35, %v7651_v54  ;;  %v12988_v14 = vld [vmem:[#allocation8_spill] sm:$0xff]  ;;  %v9524_v35 = vld [vmem:[#allocation2 + $0x90] sm:$0xff] }
 0x544   : > { %v6022_v63 = vadd.f32 %v5871_v44, %v12987_v19  ;;  %v5586_v44 = vsel %vm3396_vm5, %v5581_v59, %v5585_v51  ;;  %v12989_v54 = vld [vmem:[#allocation80_spill] sm:$0xff] }
 0x545   : > { %v8170_v33 = vadd.f32 %v12196_v40, %v8102_v61  ;;  %v7660_v52 = vsel %vm3396_vm5, %v7655_v10, %v7659_v9 }
 0x546   : > { %v6892_v23 = vadd.f32 %v12988_v14, %v6022_v63  ;;  %v5587_v63 = vshrl.u32 %v9523_v15, 16 }
 0x547   : > { %v8234_v58 = vmax.f32 %v8170_v33, 0.0 }
 0x548   : > { %v7270_v33 = vadd.f32 %v11935_v24, %v6892_v23  ;;  %v12991_v24 = vld [vmem:[#allocation81_spill] sm:$0xff] }
 0x549   : > { %v8298_v17 = vpack.c.bf16 %v8234_v58, %v8234_v58  ;;  %v9561_v58 = vld [vmem:[#allocation2 + $0x98] sm:$0xff]  ;;  %v12266_v19 = vpop.f32.mrf.mxu1 }
 0x54a   : > { %v7950_v29 = vpop.f32.mrf.mxu2 }
 0x54b   : > { %v5873_v46 = vpop.f32.mrf.mxu3  ;;  %8362 = vst.msk [vmem:[%s12207_s29 + $0x10] sm:$0xf] %vm1897_vm2, %v8298_v17  ;;  %v8103_v21 = vadd.f32 %v7950_v29, %v7269_v32  ;;  %v12990_v17 = vld [vmem:[#allocation9_spill] sm:$0xff]  ;;  %v5591_v29 = vshll.u32 %v9524_v35, 16 }
 0x54c   : > { %v6023_v11 = vadd.f32 %v5873_v46, %v12989_v54  ;;  %v7665_v46 = vshll.u32 %v9561_v58, 16 }
 0x54d   : > { %v8171_v61 = vadd.f32 %v12196_v40, %v8103_v21  ;;  %v5589_v21 = vor.u32 %v5587_v63, %v5585_v51  ;;  %v10217_v51 = vld [vmem:[#allocation2 + $0x110] sm:$0xff]   ;;  %v12993_v63 = vld [vmem:[#allocation82_spill] sm:$0xff] }
 0x54e   : > { %v6893_v32 = vadd.f32 %v12990_v17, %v6023_v11  ;;  %v7667_v15 = vrot.slane %v7665_v46, 1 }
 0x54f   : > { %v8235_v48 = vmax.f32 %v8171_v61, 0.0  ;;  %9409 = vmatmul.msk.bf16.gmra.mxu2 %vm2288_vm3, %v7660_v52  ;;  %v5593_v52 = vrot.slane %v5591_v29, 1 }
 0x550   : > { %9150 = vmatmul.msk.bf16.gmra.mxu3 %vm2288_vm3, %v5586_v44  ;;  %9253 = vmatmul.msk.bf16.gmra.mxu1 %vm2288_vm3, %v10216_v1  ;;  %v7661_v1 = vshrl.u32 %v9560_v4, 16  ;;  %v7271_v44 = vadd.f32 %v11945_v50, %v6893_v32 }
 0x551   : > { %v8299_v26 = vpack.c.bf16 %v8235_v48, %v8235_v48  ;;  %v5594_v4 = vsel %vm3396_vm5, %v5589_v21, %v5593_v52 }
 0x552   : > { %v7953_v45 = vpop.f32.mrf.mxu2  ;;  %v7663_v54 = vor.u32 %v7661_v1, %v7659_v9 }
 0x553   : > { %v5876_v57 = vpop.f32.mrf.mxu3  ;;  %8363 = vst.msk [vmem:[%s12207_s29 + $0x14] sm:$0xf] %vm1897_vm2, %v8299_v26  ;;  %v8104_v43 = vadd.f32 %v7953_v45, %v7270_v33  ;;  %v12992_v26 = vld [vmem:[#allocation47_spill] sm:$0xff] }
 0x554   : > { %v6024_v14 = vadd.f32 %v5876_v57, %v12991_v24  ;;  %v12277_v57 = vpop.f32.mrf.mxu1  ;;  %v7668_v50 = vsel %vm3396_vm5, %v7663_v54, %v7667_v15  ;;  %v12994_v24 = vld [vmem:[#allocation49_spill] sm:$0xff] }
 0x555   : > { %v8172_v59 = vadd.f32 %v12196_v40, %v8104_v43  ;;  %v9525_v43 = vld [vmem:[#allocation2 + $0x98] sm:$0xff] }
 0x556   : > { %v6894_v33 = vadd.f32 %v12992_v26, %v6024_v14  ;;  %v5599_v1 = vshll.u32 %v9525_v43, 16  ;;  %v12995_v26 = vld [vmem:[#allocation3_spill] sm:$0xff] }
 0x557   : > { %v8236_v10 = vmax.f32 %v8172_v59, 0.0 }
 0x558   : > { %v7272_v29 = vadd.f32 %v11961_v2, %v6894_v33 }
 0x559   : > { %v8300_v23 = vpack.c.bf16 %v8236_v10, %v8236_v10  ;;  %v9562_v10 = vld [vmem:[#allocation2 + $0xa0] sm:$0xff] }
 0x55a   : > { %v7955_v48 = vpop.f32.mrf.mxu2 }
 0x55b   : > { %v5878_v61 = vpop.f32.mrf.mxu3  ;;  %8364 = vst.msk [vmem:[%s12207_s29 + $0x18] sm:$0xf] %vm1897_vm2, %v8300_v23  ;;  %v8105_v11 = vadd.f32 %v7955_v48, %v7271_v44  ;;  %v7669_v44 = vshrl.u32 %v9561_v58, 16  ;;  %v7673_v48 = vshll.u32 %v9562_v10, 16 }
 0x55c   : > { %v6025_v17 = vadd.f32 %v5878_v61, %v12993_v63  ;;  %v5601_v61 = vrot.slane %v5599_v1, 1 }
 0x55d   : > { %v8173_v45 = vadd.f32 %v12196_v40, %v8105_v11  ;;  %v5595_v11 = vshrl.u32 %v9524_v35, 16  ;;  %v7675_v63 = vrot.slane %v7673_v48, 1  ;;  %v5603_v48 = vshrl.u32 %v9525_v43, 16 }
 0x55e   : > { %v6895_v14 = vadd.f32 %v12994_v24, %v6025_v17  ;;  %v9526_v24 = vld [vmem:[#allocation2 + $0xa0] sm:$0xff] }
 0x55f   : > { %v8237_v9 = vmax.f32 %v8173_v45, 0.0  ;;  %9410 = vmatmul.msk.bf16.gmra.mxu2 %vm2288_vm3, %v7668_v50 }
 0x560   : > { %9151 = vmatmul.msk.bf16.gmra.mxu3 %vm2288_vm3, %v5594_v4  ;;  %9254 = vmatmul.msk.bf16.gmra.mxu1 %vm2288_vm3, %v10217_v51  ;;  %v7273_v33 = vadd.f32 %v11972_v22, %v6895_v14  ;;  %v5597_v51 = vor.u32 %v5595_v11, %v5593_v52  ;;  %v12997_v22 = vld [vmem:[#allocation68_spill] sm:$0xff] }
 0x561   : > { %v8301_v32 = vpack.c.bf16 %v8237_v9, %v8237_v9  ;;  %v7671_v9 = vor.u32 %v7669_v44, %v7667_v15 }
 0x562   : > { %v7958_v46 = vpop.f32.mrf.mxu2  ;;  %v5602_v35 = vsel %vm3396_vm5, %v5597_v51, %v5601_v61  ;;  %v7677_v51 = vshrl.u32 %v9562_v10, 16 }
 0x563   : > { %v5881_v59 = vpop.f32.mrf.mxu3  ;;  %8365 = vst.msk [vmem:[%s12207_s29 + $0x1c] sm:$0xf] %vm1897_vm2, %v8301_v32  ;;  %v8106_v21 = vadd.f32 %v7958_v46, %v7272_v29  ;;  %v12996_v32 = vld [vmem:[#allocation51_spill] sm:$0xff] }
 0x564   : > { %v6026_v45 = vadd.f32 %v5881_v59, %v12995_v26  ;;  %v7676_v59 = vsel %vm3396_vm5, %v7671_v9, %v7675_v63 }
 0x565   : > { %v8174_v23 = vadd.f32 %v12196_v40, %v8106_v21 }
 0x566   : > { %v6896_v58 = vadd.f32 %v12996_v32, %v6026_v45  ;;  %v5607_v45 = vshll.u32 %v9526_v24, 16 }
 0x567   : > { %v8238_v54 = vmax.f32 %v8174_v23, 0.0  ;;  %v9563_v23 = vld [vmem:[#allocation2 + $0xa8] sm:$0xff] }
 0x568   : > { %v7274_v1 = vadd.f32 %v11983_v39, %v6896_v58  ;;  %v5609_v58 = vrot.slane %v5607_v45, 1  ;;  %v13002_v45 = vld [vmem:[#allocation16_spill] sm:$0xff] }
 0x569   : > { %v8302_v4 = vpack.c.bf16 %v8238_v54, %v8238_v54  ;;  %v12998_v54 = vld [vmem:[#allocation53_spill] sm:$0xff] }
 0x56a   : > { %v7960_v50 = vpop.f32.mrf.mxu2 }
 0x56b   : > { %v5883_v2 = vpop.f32.mrf.mxu3  ;;  %8366 = vst.msk [vmem:[%s12207_s29 + $0x20] sm:$0xf] %vm1897_vm2, %v8302_v4  ;;  %v8107_v17 = vadd.f32 %v7960_v50, %v7273_v33  ;;  %v7681_v4 = vshll.u32 %v9563_v23, 16  ;;  %v12999_v50 = vld [vmem:[#allocation33_spill] sm:$0xff] }
 0x56c   : > { %v6027_v52 = vadd.f32 %v5883_v2, %v12997_v22  ;;  %v5605_v2 = vor.u32 %v5603_v48, %v5601_v61 }
 0x56d   : > { %v8175_v29 = vadd.f32 %v12196_v40, %v8107_v17  ;;  %v7683_v43 = vrot.slane %v7681_v4, 1 }
 0x56e   : > { %v6897_v11 = vadd.f32 %v12998_v54, %v6027_v52  ;;  %v5610_v10 = vsel %vm3396_vm5, %v5605_v2, %v5609_v58  ;;  %v9564_v54 = vld [vmem:[#allocation2 + $0xb0] sm:$0xff]  ;;  %v7685_v2 = vshrl.u32 %v9563_v23, 16 }
 0x56f   : > { %v8239_v46 = vmax.f32 %v8175_v29, 0.0  ;;  %9411 = vmatmul.msk.bf16.gmra.mxu2 %vm2288_vm3, %v7676_v59 }
 0x570   : > { %9152 = vmatmul.msk.bf16.gmra.mxu3 %vm2288_vm3, %v5602_v35  ;;  %v7275_v32 = vadd.f32 %v11998_v5, %v6897_v11  ;;  %v7679_v35 = vor.u32 %v7677_v51, %v7675_v63  ;;  %v9527_v5 = vld [vmem:[#allocation2 + $0xa8] sm:$0xff]  ;;  %v7689_v51 = vshll.u32 %v9564_v54, 16 }
 0x571   : > { %v8303_v15 = vpack.c.bf16 %v8239_v46, %v8239_v46  ;;  %v13000_v46 = vld [vmem:[#allocation15_spill] sm:$0xff]  ;;  %v13001_v63 = vld [vmem:[#allocation4_spill] sm:$0xff] }
 0x572   : > { %v7963_v14 = vpop.f32.mrf.mxu2  ;;  %v7684_v61 = vsel %vm3396_vm5, %v7679_v35, %v7683_v43  ;;  %v13004_v35 = vld [vmem:[#allocation88_spill] sm:$0xff] }
 0x573   : > { %v5886_v21 = vpop.f32.mrf.mxu3  ;;  %8367 = vst.msk [vmem:[%s12207_s29 + $0x24] sm:$0xf] %vm1897_vm2, %v8303_v15  ;;  %v8108_v44 = vadd.f32 %v7963_v14, %v7274_v1 }
 0x574   : > { %v6028_v9 = vadd.f32 %v5886_v21, %v12999_v50 }
 0x575   : > { %v8176_v26 = vadd.f32 %v12196_v40, %v8108_v44 }
 0x576   : > { %v6898_v22 = vadd.f32 %v13000_v46, %v6028_v9  ;;  %v5611_v9 = vshrl.u32 %v9526_v24, 16 }
 0x577   : > { %v8240_v33 = vmax.f32 %v8176_v26, 0.0  ;;  %v5615_v26 = vshll.u32 %v9527_v5, 16 }
 0x578   : > { %v7276_v44 = vadd.f32 %v12011_v12, %v6898_v22  ;;  %v5613_v46 = vor.u32 %v5611_v9, %v5609_v58  ;;  %v13006_v58 = vld [vmem:[#allocation35_spill] sm:$0xff] }
 0x579   : > { %v8304_v39 = vpack.c.bf16 %v8240_v33, %v8240_v33 }
 0x57a   : > { %v7965_v29 = vpop.f32.mrf.mxu2 }
 0x57b   : > { %v5888_v17 = vpop.f32.mrf.mxu3  ;;  %8368 = vst.msk [vmem:[%s12207_s29 + $0x28] sm:$0xf] %vm1897_vm2, %v8304_v39  ;;  %v8109_v59 = vadd.f32 %v7965_v29, %v7275_v32  ;;  %v5617_v39 = vrot.slane %v5615_v26, 1 }
 0x57c   : > { %v6029_v21 = vadd.f32 %v5888_v17, %v13001_v63  ;;  %v13003_v17 = vld [vmem:[#allocation71_spill] sm:$0xff] }
 0x57d   : > { %v8177_v52 = vadd.f32 %v12196_v40, %v8109_v59  ;;  %v5618_v24 = vsel %vm3396_vm5, %v5613_v46, %v5617_v39 }
 0x57e   : > { %v6899_v4 = vadd.f32 %v13002_v45, %v6029_v21  ;;  %v9565_v45 = vld [vmem:[#allocation2 + $0xb8] sm:$0xff] }
 0x57f   : > { %v8241_v15 = vmax.f32 %v8177_v52, 0.0  ;;  %9412 = vmatmul.msk.bf16.gmra.mxu2 %vm2288_vm3, %v7684_v61  ;;  %v7687_v52 = vor.u32 %v7685_v2, %v7683_v43  ;;  %v13007_v2 = vld [vmem:[#allocation18_spill] sm:$0xff] }
 0x580   : > { %9153 = vmatmul.msk.bf16.gmra.mxu3 %vm2288_vm3, %v5610_v10  ;;  %v7277_v59 = vadd.f32 %v13004_v35, %v6899_v4  ;;  %v7691_v10 = vrot.slane %v7689_v51, 1  ;;  %v13008_v35 = vld [vmem:[#allocation37_spill] sm:$0xff] }
 0x581   : > { %v8305_v1 = vpack.c.bf16 %v8241_v15, %v8241_v15  ;;  %v13005_v15 = vld [vmem:[#allocation17_spill] sm:$0xff] }
 0x582   : > { %v7968_v48 = vpop.f32.mrf.mxu2  ;;  %v7692_v21 = vsel %vm3396_vm5, %v7687_v52, %v7691_v10 }
 0x583   : > { %v5891_v14 = vpop.f32.mrf.mxu3  ;;  %8369 = vst.msk [vmem:[%s12207_s29 + $0x2c] sm:$0xf] %vm1897_vm2, %v8305_v1  ;;  %v8110_v11 = vadd.f32 %v7968_v48, %v7276_v44 }
 0x584   : > { %v6030_v32 = vadd.f32 %v5891_v14, %v13003_v17  ;;  %v7697_v17 = vshll.u32 %v9565_v45, 16 }
 0x585   : > { %v8178_v33 = vadd.f32 %v12196_v40, %v8110_v11  ;;  %v9528_v11 = vld [vmem:[#allocation2 + $0xb0] sm:$0xff] }
 0x586   : > { %v6900_v23 = vadd.f32 %v13005_v15, %v6030_v32  ;;  %v5623_v9 = vshll.u32 %v9528_v11, 16 }
 0x587   : > { %v8242_v50 = vmax.f32 %v8178_v33, 0.0  ;;  %v5619_v33 = vshrl.u32 %v9527_v5, 16  ;;  %v7699_v5 = vrot.slane %v7697_v17, 1 }
 0x588   : > { %v7278_v48 = vadd.f32 %v12038_v13, %v6900_v23  ;;  %v5625_v52 = vrot.slane %v5623_v9, 1  ;;  %v7701_v9 = vshrl.u32 %v9565_v45, 16 }
 0x589   : > { %v8306_v29 = vpack.c.bf16 %v8242_v50, %v8242_v50 }
 0x58a   : > { %v7970_v22 = vpop.f32.mrf.mxu2 }
 0x58b   : > { %v5893_v12 = vpop.f32.mrf.mxu3  ;;  %8370 = vst.msk [vmem:[%s12207_s29 + $0x30] sm:$0xf] %vm1897_vm2, %v8306_v29  ;;  %v8111_v61 = vadd.f32 %v7970_v22, %v7277_v59  ;;  %v5621_v29 = vor.u32 %v5619_v33, %v5617_v39 }
 0x58c   : > { %v6031_v43 = vadd.f32 %v5893_v12, %v13006_v58  ;;  %v7693_v12 = vshrl.u32 %v9564_v54, 16 }
 0x58d   : > { %v8179_v63 = vadd.f32 %v12196_v40, %v8111_v61  ;;  %v5626_v54 = vsel %vm3396_vm5, %v5621_v29, %v5625_v52  ;;  %v5627_v29 = vshrl.u32 %v9528_v11, 16 }
 0x58e   : > { %v6901_v51 = vadd.f32 %v13007_v2, %v6031_v43  ;;  %v7695_v15 = vor.u32 %v7693_v12, %v7691_v10  ;;  %v13010_v10 = vld [vmem:[#allocation39_spill] sm:$0xff] }
 0x58f   : > { %v8243_v1 = vmax.f32 %v8179_v63, 0.0  ;;  %9413 = vmatmul.msk.bf16.gmra.mxu2 %vm2288_vm3, %v7692_v21  ;;  %v13009_v63 = vld [vmem:[#allocation65_spill] sm:$0xff]  ;;  %v13011_v2 = vld [vmem:[#allocation67_spill] sm:$0xff] }
 0x590   : > { %9154 = vmatmul.msk.bf16.gmra.mxu3 %vm2288_vm3, %v5618_v24  ;;  %v7279_v22 = vadd.f32 %v12048_v18, %v6901_v51  ;;  %v7700_v39 = vsel %vm3396_vm5, %v7695_v15, %v7699_v5  ;;  %v9529_v18 = vld [vmem:[#allocation2 + $0xb8] sm:$0xff]  ;;  %v7703_v15 = vor.u32 %v7701_v9, %v7699_v5 }
 0x591   : > { %v8307_v14 = vpack.c.bf16 %v8243_v1, %v8243_v1  ;;  %v5631_v33 = vshll.u32 %v9529_v18, 16 }
 0x592   : > { %v7973_v26 = vpop.f32.mrf.mxu2 }
 0x593   : > { %v5896_v44 = vpop.f32.mrf.mxu3  ;;  %8371 = vst.msk [vmem:[%s12207_s29 + $0x34] sm:$0xf] %vm1897_vm2, %v8307_v14  ;;  %v8112_v4 = vadd.f32 %v7973_v26, %v7278_v48  ;;  %v9566_v26 = vld [vmem:[#allocation2 + $0xc0] sm:$0xff]  ;;  %v5633_v12 = vrot.slane %v5631_v33, 1 }
 0x594   : > { %v6032_v59 = vadd.f32 %v5896_v44, %v13008_v35  ;;  %v7705_v17 = vshll.u32 %v9566_v26, 16  ;;  %v13012_v35 = vld [vmem:[#allocation41_spill] sm:$0xff] }
 0x595   : > { %v8180_v50 = vadd.f32 %v12196_v40, %v8112_v4 }
 0x596   : > { %v6902_v24 = vadd.f32 %v13009_v63, %v6032_v59 }
 0x597   : > { %v8244_v32 = vmax.f32 %v8180_v50, 0.0 }
 0x598   : > { %v7280_v44 = vadd.f32 %v12065_v28, %v6902_v24  ;;  %v13013_v24 = vld [vmem:[#allocation21_spill] sm:$0xff] }
 0x599   : > { %v8308_v13 = vpack.c.bf16 %v8244_v32, %v8244_v32 }
 0x59a   : > { %v7975_v61 = vpop.f32.mrf.mxu2 }
 0x59b   : > { %v5898_v46 = vpop.f32.mrf.mxu3  ;;  %8372 = vst.msk [vmem:[%s12207_s29 + $0x38] sm:$0xf] %vm1897_vm2, %v8308_v13  ;;  %v8113_v23 = vadd.f32 %v7975_v61, %v7279_v22  ;;  %v5629_v22 = vor.u32 %v5627_v29, %v5625_v52  ;;  %v13016_v29 = vld [vmem:[#allocation45_spill] sm:$0xff] }
 0x59c   : > { %v6033_v58 = vadd.f32 %v5898_v46, %v13010_v10 }
 0x59d   : > { %v8181_v21 = vadd.f32 %v12196_v40, %v8113_v23  ;;  %v7707_v23 = vrot.slane %v7705_v17, 1  ;;  %v5634_v11 = vsel %vm3396_vm5, %v5629_v22, %v5633_v12 }
 0x59e   : > { %v6903_v51 = vadd.f32 %v13011_v2, %v6033_v58  ;;  %v9530_v58 = vld [vmem:[#allocation2 + $0xc0] sm:$0xff] }
 0x59f   : > { %v8245_v1 = vmax.f32 %v8181_v21, 0.0  ;;  %9414 = vmatmul.msk.bf16.gmra.mxu2 %vm2288_vm3, %v7700_v39 }
 0x5a0   : > { %9155 = vmatmul.msk.bf16.gmra.mxu3 %vm2288_vm3, %v5626_v54  ;;  %v7281_v46 = vadd.f32 %v12076_v0, %v6903_v51  ;;  %v7708_v54 = vsel %vm3396_vm5, %v7703_v15, %v7707_v23  ;;  %v13014_v0 = vld [vmem:[#allocation43_spill] sm:$0xff]  ;;  %v5639_v51 = vshll.u32 %v9530_v58, 16  ;;  %v13017_v15 = vld [vmem:[#allocation26_spill] sm:$0xff] }
 0x5a1   : > { %v8309_v43 = vpack.c.bf16 %v8245_v1, %v8245_v1 }
 0x5a2   : > { %v7978_v48 = vpop.f32.mrf.mxu2 }
 0x5a3   : > { %v5901_v14 = vpop.f32.mrf.mxu3  ;;  %8373 = vst.msk [vmem:[%s12207_s29 + $0x3c] sm:$0xf] %vm1897_vm2, %v8309_v43  ;;  %v8114_v4 = vadd.f32 %v7978_v48, %v7280_v44  ;;  %v5635_v48 = vshrl.u32 %v9529_v18, 16 }
 0x5a4   : > { %v6034_v59 = vadd.f32 %v5901_v14, %v13012_v35  ;;  %v9567_v14 = vld [vmem:[#allocation2 + $0xc8] sm:$0xff] }
 0x5a5   : > { %v8182_v50 = vadd.f32 %v12196_v40, %v8114_v4  ;;  %v13015_v4 = vld [vmem:[#allocation23_spill] sm:$0xff]  ;;  %v5637_v17 = vor.u32 %v5635_v48, %v5633_v12  ;;  %v7717_v48 = vshrl.u32 %v9567_v14, 16 }
 0x5a6   : > { %v6904_v45 = vadd.f32 %v13013_v24, %v6034_v59 }
 0x5a7   : > { %v8246_v32 = vmax.f32 %v8182_v50, 0.0  ;;  %v7713_v50 = vshll.u32 %v9567_v14, 16 }
 0x5a8   : > { %v7282_v10 = vadd.f32 %v12088_v36, %v6904_v45 }
 0x5a9   : > { %v8310_v13 = vpack.c.bf16 %v8246_v32, %v8246_v32  ;;  %v7709_v32 = vshrl.u32 %v9566_v26, 16  ;;  %v7715_v18 = vrot.slane %v7713_v50, 1  ;;  %v13020_v50 = vld [vmem:[#allocation11_spill] sm:$0xff] }
 0x5aa   : > { %v7980_v61 = vpop.f32.mrf.mxu2 }
 0x5ab   : > { %v5903_v28 = vpop.f32.mrf.mxu3  ;;  %8374 = vst.msk [vmem:[%s12207_s29 + $0x40] sm:$0xf] %vm1897_vm2, %v8310_v13  ;;  %v8115_v63 = vadd.f32 %v7980_v61, %v7281_v46  ;;  %v7711_v22 = vor.u32 %v7709_v32, %v7707_v23  ;;  %v13018_v23 = vld [vmem:[#allocation10_spill] sm:$0xff] }
 0x5ac   : > { %v6035_v52 = vadd.f32 %v5903_v28, %v13014_v0  ;;  %v5641_v28 = vrot.slane %v5639_v51, 1 }
 0x5ad   : > { %v8183_v21 = vadd.f32 %v12196_v40, %v8115_v63  ;;  %v7716_v12 = vsel %vm3396_vm5, %v7711_v22, %v7715_v18 }
 0x5ae   : > { %v6905_v33 = vadd.f32 %v13015_v4, %v6035_v52  ;;  %v5642_v26 = vsel %vm3396_vm5, %v5637_v17, %v5641_v28  ;;  %v9568_v52 = vld [vmem:[#allocation2 + $0xd0] sm:$0xff] }
 0x5af   : > { %v8247_v39 = vmax.f32 %v8183_v21, 0.0  ;;  %9415 = vmatmul.msk.bf16.gmra.mxu2 %vm2288_vm3, %v7708_v54  ;;  %v7721_v4 = vshll.u32 %v9568_v52, 16 }
 0x5b0   : > { %9156 = vmatmul.msk.bf16.gmra.mxu3 %vm2288_vm3, %v5634_v11  ;;  %v7283_v13 = vadd.f32 %v12104_v7, %v6905_v33  ;;  %v9531_v7 = vld [vmem:[#allocation2 + $0xc8] sm:$0xff] }
 0x5b1   : > { %v8311_v5 = vpack.c.bf16 %v8247_v39, %v8247_v39 }
 0x5b2   : > { %v7983_v43 = vpop.f32.mrf.mxu2 }
 0x5b3   : > { %v5906_v1 = vpop.f32.mrf.mxu3  ;;  %8375 = vst.msk [vmem:[%s12207_s29 + $0x44] sm:$0xf] %vm1897_vm2, %v8311_v5  ;;  %v8116_v44 = vadd.f32 %v7983_v43, %v7282_v10  ;;  %v13019_v10 = vld [vmem:[#allocation28_spill] sm:$0xff] }
 0x5b4   : > { %v6036_v35 = vadd.f32 %v5906_v1, %v13016_v29  ;;  %v5647_v1 = vshll.u32 %v9531_v7, 16 }
 0x5b5   : > { %v8184_v2 = vadd.f32 %v12196_v40, %v8116_v44 }
 0x5b6   : > { %v6906_v63 = vadd.f32 %v13017_v15, %v6036_v35  ;;  %v5649_v51 = vrot.slane %v5647_v1, 1 }
 0x5b7   : > { %v8248_v9 = vmax.f32 %v8184_v2, 0.0  ;;  %v5643_v2 = vshrl.u32 %v9530_v58, 16 }
 0x5b8   : > { %v7284_v39 = vadd.f32 %v12120_v47, %v6906_v63 }
 0x5b9   : > { %v8312_v36 = vpack.c.bf16 %v8248_v9, %v8248_v9  ;;  %v5645_v29 = vor.u32 %v5643_v2, %v5641_v28 }
 0x5ba   : > { %v7985_v46 = vpop.f32.mrf.mxu2 }
 0x5bb   : > { %v5908_v59 = vpop.f32.mrf.mxu3  ;;  %8376 = vst.msk [vmem:[%s12207_s29 + $0x48] sm:$0xf] %vm1897_vm2, %v8312_v36  ;;  %v8117_v61 = vadd.f32 %v7985_v46, %v7283_v13  ;;  %v7719_v36 = vor.u32 %v7717_v48, %v7715_v18  ;;  %v13021_v46 = vld [vmem:[#allocation30_spill] sm:$0xff]  ;;  %v5650_v58 = vsel %vm3396_vm5, %v5645_v29, %v5649_v51 }
 0x5bc   : > { %v6037_v21 = vadd.f32 %v5908_v59, %v13018_v23  ;;  %v7723_v59 = vrot.slane %v7721_v4, 1 }
 0x5bd   : > { %v8185_v24 = vadd.f32 %v12196_v40, %v8117_v61 }
 0x5be   : > { %v6907_v43 = vadd.f32 %v13019_v10, %v6037_v21  ;;  %v7724_v61 = vsel %vm3396_vm5, %v7719_v36, %v7723_v59  ;;  %v5651_v21 = vshrl.u32 %v9531_v7, 16  ;;  %v13026_v36 = vld [vmem:[#allocation14_spill] sm:$0xff] }
 0x5bf   : > { %v8249_v45 = vmax.f32 %v8185_v24, 0.0  ;;  %9416 = vmatmul.msk.bf16.gmra.mxu2 %vm2288_vm3, %v7716_v12 }
 0x5c0   : > { %9157 = vmatmul.msk.bf16.gmra.mxu3 %vm2288_vm3, %v5642_v26  ;;  %v7285_v32 = vadd.f32 %v12131_v38, %v6907_v43  ;;  %v13022_v38 = vld [vmem:[#allocation12_spill] sm:$0xff]  ;;  %v9532_v26 = vld [vmem:[#allocation2 + $0xd0] sm:$0xff]  ;;  %v5653_v10 = vor.u32 %v5651_v21, %v5649_v51  ;;  %v7725_v43 = vshrl.u32 %v9568_v52, 16 }
 0x5c1   : > { %v8313_v11 = vpack.c.bf16 %v8249_v45, %v8249_v45  ;;  %v9569_v45 = vld [vmem:[#allocation2 + $0xd8] sm:$0xff] }
 0x5c2   : > { %v7988_v0 = vpop.f32.mrf.mxu2 }
 0x5c3   : > { %v5911_v54 = vpop.f32.mrf.mxu3  ;;  %8377 = vst.msk [vmem:[%s12207_s29 + $0x4c] sm:$0xf] %vm1897_vm2, %v8313_v11  ;;  %v8118_v5 = vadd.f32 %v7988_v0, %v7284_v39  ;;  %v13023_v11 = vld [vmem:[#allocation32_spill] sm:$0xff]  ;;  %v5655_v0 = vshll.u32 %v9532_v26, 16 }
 0x5c4   : > { %v6038_v9 = vadd.f32 %v5911_v54, %v13020_v50 }
 0x5c5   : > { %v8186_v44 = vadd.f32 %v12196_v40, %v8118_v5  ;;  %v7729_v5 = vshll.u32 %v9569_v45, 16  ;;  %v5657_v2 = vrot.slane %v5655_v0, 1 }
 0x5c6   : > { %v6908_v14 = vadd.f32 %v13021_v46, %v6038_v9  ;;  %v7727_v9 = vor.u32 %v7725_v43, %v7723_v59 }
 0x5c7   : > { %v8250_v33 = vmax.f32 %v8186_v44, 0.0  ;;  %v13024_v44 = vld [vmem:[#allocation13_spill] sm:$0xff]  ;;  %v7731_v7 = vrot.slane %v7729_v5, 1  ;;  %v5658_v52 = vsel %vm3396_vm5, %v5653_v10, %v5657_v2 }
 0x5c8   : > { %v7286_v24 = vadd.f32 %v12142_v16, %v6908_v14 }
 0x5c9   : > { %v8314_v17 = vpack.c.bf16 %v8250_v33, %v8250_v33  ;;  %v7732_v51 = vsel %vm3396_vm5, %v7727_v9, %v7731_v7 }
 0x5ca   : > { %v7990_v35 = vpop.f32.mrf.mxu2 }
 0x5cb   : > { %v5913_v47 = vpop.f32.mrf.mxu3  ;;  %8378 = vst.msk [vmem:[%s12207_s29 + $0x50] sm:$0xf] %vm1897_vm2, %v8314_v17  ;;  %v8119_v13 = vadd.f32 %v7990_v35, %v7285_v32 }
 0x5cc   : > { %v6039_v28 = vadd.f32 %v5913_v47, %v13022_v38  ;;  %v13025_v47 = vld [vmem:[#allocation83_spill] sm:$0xff]  ;;  %v13027_v38 = vld [vmem:[#allocation84_spill] sm:$0xff] }
 0x5cd   : > { %v8187_v22 = vadd.f32 %v12196_v40, %v8119_v13 }
 0x5ce   : > { %v6909_v54 = vadd.f32 %v13023_v11, %v6039_v28  ;;  %v13028_v11 = vld [vmem:[#allocation55_spill] sm:$0xff] }
 0x5cf   : > { %v8251_v15 = vmax.f32 %v8187_v22, 0.0  ;;  %9417 = vmatmul.msk.bf16.gmra.mxu2 %vm2288_vm3, %v7724_v61 }
 0x5d0   : > { %9158 = vmatmul.msk.bf16.gmra.mxu3 %vm2288_vm3, %v5650_v58  ;;  %v7287_v33 = vadd.f32 %v12149_v42, %v6909_v54  ;;  %v9533_v42 = vld [vmem:[#allocation2 + $0xd8] sm:$0xff]  ;;  %v9570_v58 = vld [vmem:[#allocation2 + $0xe0] sm:$0xff] }
 0x5d1   : > { %v8315_v18 = vpack.c.bf16 %v8251_v15, %v8251_v15  ;;  %v5663_v15 = vshll.u32 %v9533_v42, 16 }
 0x5d2   : > { %v7993_v12 = vpop.f32.mrf.mxu2 }
 0x5d3   : > { %v5916_v63 = vpop.f32.mrf.mxu3  ;;  %8379 = vst.msk [vmem:[%s12207_s29 + $0x54] sm:$0xf] %vm1897_vm2, %v8315_v18  ;;  %v8120_v23 = vadd.f32 %v7993_v12, %v7286_v24  ;;  %v7737_v24 = vshll.u32 %v9570_v58, 16  ;;  %v5665_v21 = vrot.slane %v5663_v15, 1 }
 0x5d4   : > { %v6040_v48 = vadd.f32 %v5916_v63, %v13024_v44  ;;  %v7733_v63 = vshrl.u32 %v9569_v45, 16 }
 0x5d5   : > { %v8188_v39 = vadd.f32 %v12196_v40, %v8120_v23  ;;  %v5659_v23 = vshrl.u32 %v9532_v26, 16  ;;  %v7739_v43 = vrot.slane %v7737_v24, 1 }
 0x5d6   : > { %v6910_v32 = vadd.f32 %v13025_v47, %v6040_v48  ;;  %v7735_v10 = vor.u32 %v7733_v63, %v7731_v7  ;;  %v13029_v48 = vld [vmem:[#allocation85_spill] sm:$0xff] }
 0x5d7   : > { %v8252_v1 = vmax.f32 %v8188_v39, 0.0  ;;  %v5661_v5 = vor.u32 %v5659_v23, %v5657_v2 }
 0x5d8   : > { %v7288_v14 = vadd.f32 %v12163_v31, %v6910_v32  ;;  %v9571_v32 = vld [vmem:[#allocation2 + $0xe8] sm:$0xff] }
 0x5d9   : > { %v8316_v16 = vpack.c.bf16 %v8252_v1, %v8252_v1  ;;  %v5666_v26 = vsel %vm3396_vm5, %v5661_v5, %v5665_v21  ;;  %v13034_v5 = vld [vmem:[#allocation61_spill] sm:$0xff] }
 0x5da   : > { %v7995_v50 = vpop.f32.mrf.mxu2 }
 0x5db   : > { %v5918_v4 = vpop.f32.mrf.mxu3  ;;  %8380 = vst.msk [vmem:[%s12207_s29 + $0x58] sm:$0xf] %vm1897_vm2, %v8316_v16  ;;  %v8121_v17 = vadd.f32 %v7995_v50, %v7287_v33 }
 0x5dc   : > { %v6041_v59 = vadd.f32 %v5918_v4, %v13026_v36  ;;  %v7740_v4 = vsel %vm3396_vm5, %v7735_v10, %v7739_v43 }
 0x5dd   : > { %v8189_v29 = vadd.f32 %v12196_v40, %v8121_v17  ;;  %v9534_v17 = vld [vmem:[#allocation2 + $0xe0] sm:$0xff] }
 0x5de   : > { %v6911_v28 = vadd.f32 %v13027_v38, %v6041_v59  ;;  %v5671_v59 = vshll.u32 %v9534_v17, 16 }
 0x5df   : > { %v8253_v35 = vmax.f32 %v8189_v29, 0.0  ;;  %9418 = vmatmul.msk.bf16.gmra.mxu2 %vm2288_vm3, %v7732_v51  ;;  %v13031_v51 = vld [vmem:[#allocation86_spill] sm:$0xff] }
 0x5e0   : > { %9159 = vmatmul.msk.bf16.gmra.mxu3 %vm2288_vm3, %v5658_v52  ;;  %v7289_v0 = vadd.f32 %v12170_v27, %v6911_v28  ;;  %v13030_v27 = vld [vmem:[#allocation57_spill] sm:$0xff]  ;;  %v5667_v52 = vshrl.u32 %v9533_v42, 16  ;;  %v5673_v63 = vrot.slane %v5671_v59, 1 }
 0x5e1   : > { %v8317_v13 = vpack.c.bf16 %v8253_v35, %v8253_v35 }
 0x5e2   : > { %v7998_v22 = vpop.f32.mrf.mxu2 }
 0x5e3   : > { %v5921_v46 = vpop.f32.mrf.mxu3  ;;  %8381 = vst.msk [vmem:[%s12207_s29 + $0x5c] sm:$0xf] %vm1897_vm2, %v8317_v13  ;;  %v8122_v61 = vadd.f32 %v7998_v22, %v7288_v14  ;;  %v12433_v13 = vpop.f32.mrf.mxu1  ;;  %v5669_v22 = vor.u32 %v5667_v52, %v5665_v21 }
 0x5e4   : > { %v6042_v54 = vadd.f32 %v5921_v46, %v13028_v11  ;;  %v7745_v46 = vshll.u32 %v9571_v32, 16  ;;  %v13033_v11 = vld [vmem:[#allocation87_spill] sm:$0xff] }
 0x5e5   : > { %v8190_v18 = vadd.f32 %v12196_v40, %v8122_v61  ;;  %v7741_v61 = vshrl.u32 %v9570_v58, 16  ;;  %v5674_v58 = vsel %vm3396_vm5, %v5669_v22, %v5673_v63 }
 0x5e6   : > { %v6912_v45 = vadd.f32 %v13029_v48, %v6042_v54 }
 0x5e7   : > { %v8254_v12 = vmax.f32 %v8190_v18, 0.0  ;;  %v7743_v24 = vor.u32 %v7741_v61, %v7739_v43 }
 0x5e8   : > { %v7290_v7 = vadd.f32 %v12179_v34, %v6912_v45  ;;  %v13032_v34 = vld [vmem:[#allocation59_spill] sm:$0xff]  ;;  %v9572_v45 = vld [vmem:[#allocation2 + $0xf0] sm:$0xff] }
 0x5e9   : > { %v8318_v39 = vpack.c.bf16 %v8254_v12, %v8254_v12  ;;  %v7747_v12 = vrot.slane %v7745_v46, 1 }
 0x5ea   : > { %v8000_v1 = vpop.f32.mrf.mxu2 }
 0x5eb   : > { %v5923_v31 = vpop.f32.mrf.mxu3  ;;  %8382 = vst.msk [vmem:[%s12207_s29 + $0x60] sm:$0xf] %vm1897_vm2, %v8318_v39  ;;  %v8123_v44 = vadd.f32 %v8000_v1, %v7289_v0  ;;  %v7748_v21 = vsel %vm3396_vm5, %v7743_v24, %v7747_v12  ;;  %v9535_v0 = vld [vmem:[#allocation2 + $0xe8] sm:$0xff] }
 0x5ec   : > { %v6043_v2 = vadd.f32 %v5923_v31, %v13030_v27  ;;  %v12453_v27 = vpop.f32.mrf.mxu0 }
 0x5ed   : > { %v8191_v16 = vadd.f32 %v12196_v40, %v8123_v44 }
 0x5ee   : > { %v6913_v35 = vadd.f32 %v13031_v51, %v6043_v2  ;;  %v7749_v2 = vshrl.u32 %v9571_v32, 16  ;;  %v13036_v32 = vld [vmem:[#allocation89_spill] sm:$0xff] }
 0x5ef   : > { %v8255_v33 = vmax.f32 %v8191_v16, 0.0  ;;  %9419 = vmatmul.msk.bf16.gmra.mxu2 %vm2288_vm3, %v7740_v4 }
 0x5f0   : > { %9160 = vmatmul.msk.bf16.gmra.mxu3 %vm2288_vm3, %v5666_v26  ;;  %v7291_v18 = vadd.f32 %v12198_v20, %v6913_v35  ;;  %v12445_v20 = vpop.f32.mrf.mxu1  ;;  %v5679_v26 = vshll.u32 %v9535_v0, 16  ;;  %v7751_v46 = vor.u32 %v7749_v2, %v7747_v12  ;;  %v9536_v12 = vld [vmem:[#allocation2 + $0xf0] sm:$0xff] }
 0x5f1   : > { %v8319_v50 = vpack.c.bf16 %v8255_v33, %v8255_v33 }
 0x5f2   : > { %v8003_v47 = vpop.f32.mrf.mxu2 }
 0x5f3   : > { %v5926_v9 = vpop.f32.mrf.mxu3  ;;  %8383 = vst.msk [vmem:[%s12207_s29 + $0x64] sm:$0xf] %vm1897_vm2, %v8319_v50  ;;  %v8124_v29 = vadd.f32 %v8003_v47, %v7290_v7  ;;  %v7753_v50 = vshll.u32 %v9572_v45, 16  ;;  %v5675_v7 = vshrl.u32 %v9534_v17, 16  ;;  %v5681_v47 = vrot.slane %v5679_v26, 1 }
 0x5f4   : > { %v6044_v15 = vadd.f32 %v5926_v9, %v13032_v34  ;;  %v12465_v17 = vld [vmem:[%s12746_s4] ss:$0 sm:$0xff] }
 0x5f5   : > { %v8192_v36 = vadd.f32 %v12196_v40, %v8124_v29  ;;  %v13035_v29 = vld [vmem:[#allocation63_spill] sm:$0xff] }
 0x5f6   : > { %v6914_v54 = vadd.f32 %v13033_v11, %v6044_v15  ;;  %v9573_v11 = vld [vmem:[#allocation2 + $0xf8] sm:$0xff] }
 0x5f7   : > { %v8256_v14 = vmax.f32 %v8192_v36, 0.0  ;;  %v5677_v36 = vor.u32 %v5675_v7, %v5673_v63 }
 0x5f8   : > { %v7292_v44 = vadd.f32 %v12213_v37, %v6914_v54  ;;  %v12457_v59 = vpop.f32.mrf.mxu1 }
 0x5f9   : > { %v8320_v38 = vpack.c.bf16 %v8256_v14, %v8256_v14 }
 0x5fa   : > { %v8005_v42 = vpop.f32.mrf.mxu2 }
 0x5fb   : > { %v5928_v28 = vpop.f32.mrf.mxu3  ;;  %8384 = vst.msk [vmem:[%s12207_s29 + $0x68] sm:$0xf] %vm1897_vm2, %v8320_v38  ;;  %v8125_v23 = vadd.f32 %v8005_v42, %v7291_v18  ;;  %v12472_v38 = vpop.f32.mrf.mxu0 }
 0x5fc   : > { %v6045_v1 = vadd.f32 %v5928_v28, %v13034_v5  ;;  %v13037_v28 = vld [vmem:[#allocation19_spill] sm:$0xff] }
 0x5fd   : > { %v8193_v39 = vadd.f32 %v12196_v40, %v8125_v23 }
 0x5fe   : > { %v6915_v4 = vadd.f32 %v12032_v55, %v6045_v1  ;;  %v5687_v1 = vshll.u32 %v9536_v12, 16 }
 0x5ff   : > { %v8257_v31 = vmax.f32 %v8193_v39, 0.0  ;;  %9420 = vmatmul.msk.bf16.gmra.mxu2 %vm2288_vm3, %v7748_v21  ;;  %v13038_v21 = vld [vmem:[#allocation90_spill] sm:$0xff] }
 0x600   : > { %9161 = vmatmul.msk.bf16.gmra.mxu3 %vm2288_vm3, %v5674_v58  ;;  %v7293_v35 = vadd.f32 %v12228_v56, %v6915_v4  ;;  %v5682_v56 = vsel %vm3396_vm5, %v5677_v36, %v5681_v47  ;;  %v12478_v39 = vpop.f32.mrf.mxu1  ;;  %v5683_v58 = vshrl.u32 %v9535_v0, 16  ;;  %v5689_v2 = vrot.slane %v5687_v1, 1  ;;  %v9537_v36 = vld [vmem:[#allocation2 + $0xf8] sm:$0xff] }
 0x601   : > { %v8321_v10 = vpack.c.bf16 %v8257_v31, %v8257_v31 }
 0x602   : > { %v8008_v48 = vpop.f32.mrf.mxu2 }
 0x603   : > { %v5931_v43 = vpop.f32.mrf.mxu3  ;;  %8385 = vst.msk [vmem:[%s12207_s29 + $0x6c] sm:$0xf] %vm1897_vm2, %v8321_v10  ;;  %v8126_v16 = vadd.f32 %v8008_v48, %v7292_v44  ;;  %v7761_v10 = vshll.u32 %v9573_v11, 16  ;;  %v5685_v44 = vor.u32 %v5683_v58, %v5681_v47  ;;  %v7757_v48 = vshrl.u32 %v9572_v45, 16 }
 0x604   : > { %v6046_v37 = vadd.f32 %v5931_v43, %v13035_v29 }
 0x605   : > { %v8194_v33 = vadd.f32 %v12196_v40, %v8126_v16  ;;  %v7755_v40 = vrot.slane %v7753_v50, 1  ;;  %v12484_v50 = vpop.f32.mrf.mxu0  ;;  %v7763_v7 = vrot.slane %v7761_v10, 1  ;;  %v5690_v47 = vsel %vm3396_vm5, %v5685_v44, %v5689_v2 }
 0x606   : > { %v6916_v22 = vadd.f32 %v13036_v32, %v6046_v37  ;;  %v13040_v37 = vld [vmem:[#allocation91_spill] sm:$0xff] }
 0x607   : > { %v8258_v9 = vmax.f32 %v8194_v33, 0.0  ;;  %v7756_v34 = vsel %vm3396_vm5, %v7751_v46, %v7755_v40 }
 0x608   : > { %v7294_v24 = vadd.f32 %v12241_v53, %v6916_v22  ;;  %v13039_v53 = vld [vmem:[#allocation20_spill] sm:$0xff] }
 0x609   : > { %v8322_v52 = vpack.c.bf16 %v8258_v9, %v8258_v9  ;;  %v7759_v9 = vor.u32 %v7757_v48, %v7755_v40 }
 0x60a   : > { %v8010_v55 = vpop.f32.mrf.mxu2 }
 0x60b   : > { %v5933_v51 = vpop.f32.mrf.mxu3  ;;  %8386 = vst.msk [vmem:[%s12207_s29 + $0x70] sm:$0xf] %vm1897_vm2, %v8322_v52  ;;  %v8127_v14 = vadd.f32 %v8010_v55, %v7293_v35  ;;  %v13041_v55 = vld [vmem:[#allocation70_spill] sm:$0xff] }
 0x60c   : > { %v6047_v18 = vadd.f32 %v5933_v51, %v13037_v28  ;;  %v12491_v51 = vpop.f32.mrf.mxu1  ;;  %v13042_v28 = vld [vmem:[#allocation92_spill] sm:$0xff] }
 0x60d   : > { %v8195_v61 = vadd.f32 %v12465_v17, %v8127_v14 }
 0x60e   : > { %v6917_v31 = vadd.f32 %v13038_v21, %v6047_v18  ;;  %v13043_v21 = vld [vmem:[#allocation22_spill] sm:$0xff] }
 0x60f   : > { %v8259_v15 = vmax.f32 %v8195_v61, 0.0  ;;  %9421 = vmatmul.msk.bf16.gmra.mxu2 %vm2288_vm3, %v7756_v34  ;;  %v9574_v61 = vld [vmem:[#allocation2 + $0x100] sm:$0xff]  ;;  %v12500_v34 = vpop.f32.mrf.mxu0 }
 0x610   : > { %9162 = vmatmul.msk.bf16.gmra.mxu3 %vm2288_vm3, %v5682_v56  ;;  %v7295_v33 = vadd.f32 %v12251_v62, %v6917_v31  ;;  %v7764_v62 = vsel %vm3396_vm5, %v7759_v9, %v7763_v7 }
 0x611   : > { %v8323_v63 = vpack.c.bf16 %v8259_v15, %v8259_v15  ;;  %v5695_v15 = vshll.u32 %v9537_v36, 16 }
 0x612   : > { %v8013_v23 = vpop.f32.mrf.mxu2 }
 0x613   : > { %v5936_v42 = vpop.f32.mrf.mxu3  ;;  %8387 = vst.msk [vmem:[%s12207_s29 + $0x74] sm:$0xf] %vm1897_vm2, %v8323_v63  ;;  %v8128_v54 = vadd.f32 %v8013_v23, %v7294_v24  ;;  %v7769_v24 = vshll.u32 %v9574_v61, 16 }
 0x614   : > { %v6048_v16 = vadd.f32 %v5936_v42, %v13039_v53  ;;  %v7765_v42 = vshrl.u32 %v9573_v11, 16  ;;  %v12504_v58 = vpop.f32.mrf.mxu1 }
 0x615   : > { %v8196_v5 = vadd.f32 %v12465_v17, %v8128_v54  ;;  %v5691_v54 = vshrl.u32 %v9536_v12, 16  ;;  %v7771_v53 = vrot.slane %v7769_v24, 1 }
 0x616   : > { %v6918_v52 = vadd.f32 %v13040_v37, %v6048_v16  ;;  %v7767_v48 = vor.u32 %v7765_v42, %v7763_v7 }
 0x617   : > { %v8260_v43 = vmax.f32 %v8196_v5, 0.0 }
 0x618   : > { %v7296_v32 = vadd.f32 %v12266_v19, %v6918_v52  ;;  %v5697_v19 = vrot.slane %v5695_v15, 1 }
 0x619   : > { %v8324_v26 = vpack.c.bf16 %v8260_v43, %v8260_v43  ;;  %v5693_v43 = vor.u32 %v5691_v54, %v5689_v2  ;;  %v13044_v2 = vld [vmem:[#allocation24_spill] sm:$0xff] }
 0x61a   : > { %v8015_v0 = vpop.f32.mrf.mxu2 }
 0x61b   : > { %v5938_v4 = vpop.f32.mrf.mxu3  ;;  %8388 = vst.msk [vmem:[%s12207_s29 + $0x78] sm:$0xf] %vm1897_vm2, %v8324_v26  ;;  %v8129_v29 = vadd.f32 %v8015_v0, %v7295_v33  ;;  %v5698_v26 = vsel %vm3396_vm5, %v5693_v43, %v5697_v19 }
 0x61c   : > { %v6049_v46 = vadd.f32 %v5938_v4, %v13041_v55  ;;  %v12513_v4 = vpop.f32.mrf.mxu0  ;;  %v12520_v37 = vpop.f32.mrf.mxu1 }
 0x61d   : > { %v8197_v45 = vadd.f32 %v12465_v17, %v8129_v29  ;;  %v9538_v29 = vld [vmem:[#allocation2 + $0x100] sm:$0xff] }
 0x61e   : > { %v6919_v18 = vadd.f32 %v13042_v28, %v6049_v46  ;;  %v5703_v46 = vshll.u32 %v9538_v29, 16 }
 0x61f   : > { %v8261_v35 = vmax.f32 %v8197_v45, 0.0  ;;  %9422 = vmatmul.msk.bf16.gmra.mxu2 %vm2288_vm3, %v7764_v62  ;;  %v9575_v45 = vld [vmem:[#allocation2 + $0x108] sm:$0xff]  ;;  %v5699_v62 = vshrl.u32 %v9537_v36, 16 }
 0x620   : > { %9163 = vmatmul.msk.bf16.gmra.mxu3 %vm2288_vm3, %v5690_v47  ;;  %v7297_v10 = vadd.f32 %v12277_v57, %v6919_v18  ;;  %v7772_v57 = vsel %vm3396_vm5, %v7767_v48, %v7771_v53  ;;  %v5705_v42 = vrot.slane %v5703_v46, 1 }
 0x621   : > { %v8325_v40 = vpack.c.bf16 %v8261_v35, %v8261_v35 }
 0x622   : > { %v8018_v22 = vpop.f32.mrf.mxu2 }
 0x623   : > { %v5941_v14 = vpop.f32.mrf.mxu3  ;;  %8389 = vst.msk [vmem:[%s12207_s29 + $0x7c] sm:$0xf] %vm1897_vm2, %v8325_v40  ;;  %v8130_v56 = vadd.f32 %v8018_v22, %v7296_v32  ;;  %v7777_v40 = vshll.u32 %v9575_v45, 16  ;;  %v7773_v22 = vshrl.u32 %v9574_v61, 16 }
 0x624   : > { %v6050_v31 = vadd.f32 %v5941_v14, %v13043_v21  ;;  %v12526_v32 = vpop.f32.mrf.mxu0  ;;  %v12532_v54 = vpop.f32.mrf.mxu1 }
 0x625   : > { %v8198_v63 = vadd.f32 %v12465_v17, %v8130_v56  ;;  %v13045_v56 = vld [vmem:[#allocation25_spill] sm:$0xff]  ;;  %v7775_v24 = vor.u32 %v7773_v22, %v7771_v53 }
 0x626   : > { %v6920_v11 = vadd.f32 %v12101_v60, %v6050_v31 }
 0x627   : > { %v8262_v23 = vmax.f32 %v8198_v63, 0.0 }
 0x628   : > { %v7298_v60 = vadd.f32 %v12433_v13, %v6920_v11  ;;  %v5701_v13 = vor.u32 %v5699_v62, %v5697_v19 }
 0x629   : > { %v8326_v5 = vpack.c.bf16 %v8262_v23, %v8262_v23 }
 0x62a   : > { %v8020_v44 = vpop.f32.mrf.mxu2  ;;  %v5706_v19 = vsel %vm3396_vm5, %v5701_v13, %v5705_v42 }
 0x62b   : > { %v5943_v1 = vpop.f32.mrf.mxu3  ;;  %8390 = vst.msk [vmem:[%s12207_s29 + $0x80] sm:$0xf] %vm1897_vm2, %v8326_v5  ;;  %v8131_v16 = vadd.f32 %v8020_v44, %v7297_v10  ;;  %v9539_v5 = vld [vmem:[#allocation2 + $0x108] sm:$0xff] }
 0x62c   : > { %v6051_v0 = vadd.f32 %v5943_v1, %v13044_v2  ;;  %v13046_v1 = vld [vmem:[#allocation27_spill] sm:$0xff]  ;;  %v12542_v53 = vpop.f32.mrf.mxu0  ;;  %v5711_v11 = vshll.u32 %v9539_v5, 16  ;;  %v7781_v2 = vshrl.u32 %v9575_v45, 16 }
 0x62d   : > { %v8199_v12 = vadd.f32 %v12465_v17, %v8131_v16 }
 0x62e   : > { %v6921_v35 = vadd.f32 %v12114_v8, %v6051_v0  ;;  %v7779_v8 = vrot.slane %v7777_v40, 1 }
 0x62f   : > { %v8263_v33 = vmax.f32 %v8199_v12, 0.0  ;;  %9423 = vmatmul.msk.bf16.gmra.mxu2 %vm2288_vm3, %v7772_v57  ;;  %v9576_v12 = vld [vmem:[#allocation2 + $0x110] sm:$0xff] }
 0x630   : > { %9164 = vmatmul.msk.bf16.gmra.mxu3 %vm2288_vm3, %v5698_v26  ;;  %v7299_v63 = vadd.f32 %v12445_v20, %v6921_v35  ;;  %v7780_v20 = vsel %vm3396_vm5, %v7775_v24, %v7779_v8  ;;  %v7783_v40 = vor.u32 %v7781_v2, %v7779_v8  ;;  %v12567_v8 = vld [vmem:[#allocation2 + $0x118] sm:$0xff] }
 0x631   : > { %v8327_v9 = vpack.c.bf16 %v8263_v33, %v8263_v33  ;;  %v12548_v33 = vpop.f32.mrf.mxu1 }
 0x632   : > { %v8023_v52 = vpop.f32.mrf.mxu2 }
 0x633   : > { %v5946_v7 = vpop.f32.mrf.mxu3  ;;  %8391 = vst.msk [vmem:[%s12207_s29 + $0x84] sm:$0xf] %vm1897_vm2, %v8327_v9  ;;  %v8132_v47 = vadd.f32 %v8023_v52, %v7298_v60  ;;  %v5707_v9 = vshrl.u32 %v9538_v29, 16  ;;  %v13047_v60 = vld [vmem:[#allocation29_spill] sm:$0xff] }
 0x634   : > { %v6052_v15 = vadd.f32 %v5946_v7, %v13045_v56  ;;  %v5713_v7 = vrot.slane %v5711_v11, 1  ;;  %v12554_v13 = vpop.f32.mrf.mxu0 }
 0x635   : > { %v8200_v55 = vadd.f32 %v12465_v17, %v8132_v47 }
 0x636   : > { %v6922_v21 = vadd.f32 %v12453_v27, %v6052_v15 }
 0x637   : > { %v8264_v14 = vmax.f32 %v8200_v55, 0.0  ;;  %v5709_v55 = vor.u32 %v5707_v9, %v5705_v42 }
 0x638   : > { %v7300_v48 = vadd.f32 %v12457_v59, %v6922_v21  ;;  %v7785_v59 = vshll.u32 %v9576_v12, 16  ;;  %v9540_v21 = vld [vmem:[#allocation2 + $0x110] sm:$0xff] }
 0x639   : > { %v8328_v28 = vpack.c.bf16 %v8264_v14, %v8264_v14  ;;  %v10218_v14 = vld [vmem:[#allocation2 + $0x118] sm:$0xff]   ;;  %v5714_v56 = vsel %vm3396_vm5, %v5709_v55, %v5713_v7 }
 0x63a   : > { %v8025_v36 = vpop.f32.mrf.mxu2  ;;  %v7787_v45 = vrot.slane %v7785_v59, 1  ;;  %9255 = vmatmul.msk.bf16.gmra.mxu1 %vm2288_vm3, %v10218_v14 }
 0x63b   : > { %v5948_v18 = vpop.f32.mrf.mxu3  ;;  %8392 = vst.msk [vmem:[%s12207_s29 + $0x88] sm:$0xf] %vm1897_vm2, %v8328_v28  ;;  %v8133_v23 = vadd.f32 %v8025_v36, %v7299_v63  ;;  %v12563_v28 = vpop.f32.mrf.mxu1 }
 0x63c   : > { %v6053_v10 = vadd.f32 %v5948_v18, %v13046_v1  ;;  %v13048_v18 = vld [vmem:[#allocation31_spill] sm:$0xff]  ;;  %v7789_v1 = vshrl.u32 %v9576_v12, 16 }
 0x63d   : > { %v8201_v61 = vadd.f32 %v12465_v17, %v8133_v23 }
 0x63e   : > { %v6923_v26 = vadd.f32 %v12472_v38, %v6053_v10  ;;  %v7793_v10 = vshll.u32 %v12567_v8, 16  ;;  %v7791_v9 = vor.u32 %v7789_v1, %v7787_v45 }
 0x63f   : > { %v8265_v31 = vmax.f32 %v8201_v61, 0.0  ;;  %9424 = vmatmul.msk.bf16.gmra.mxu2 %vm2288_vm3, %v7780_v20 }
 0x640   : > { %9165 = vmatmul.msk.bf16.gmra.mxu3 %vm2288_vm3, %v5706_v19  ;;  %v7301_v35 = vadd.f32 %v12478_v39, %v6923_v26  ;;  %v7788_v39 = vsel %vm3396_vm5, %v7783_v40, %v7787_v45  ;;  %v5715_v19 = vshrl.u32 %v9539_v5, 16  ;;  %v7795_v12 = vrot.slane %v7793_v10, 1  ;;  %v12593_v45 = vld [vmem:[#allocation2 + $0x120] sm:$0xff] }
 0x641   : > { %v8329_v43 = vpack.c.bf16 %v8265_v31, %v8265_v31  ;;  %v12573_v31 = vpop.f32.mrf.mxu0 }
 0x642   : > { %v8028_v27 = vpop.f32.mrf.mxu2 }
 0x643   : > { %v5951_v44 = vpop.f32.mrf.mxu3  ;;  %8393 = vst.msk [vmem:[%s12207_s29 + $0x8c] sm:$0xf] %vm1897_vm2, %v8329_v43  ;;  %v8134_v16 = vadd.f32 %v8028_v27, %v7300_v48  ;;  %v5717_v27 = vor.u32 %v5715_v19, %v5713_v7  ;;  %v12578_v2 = vpop.f32.mrf.mxu1 }
 0x644   : > { %v6054_v52 = vadd.f32 %v5951_v44, %v13047_v60  ;;  %v10731_v44 = vld [vmem:[#allocation2 + $0x124] sm:$0xff]  }
 0x645   : > { %v8202_v57 = vadd.f32 %v12465_v17, %v8134_v16  ;;  %v13049_v16 = vld [vmem:[#allocation34_spill] sm:$0xff]  ;;  %v6595_v5 = vshll.u32 %v10731_v44, 16 }
 0x646   : > { %v6924_v29 = vadd.f32 %v12484_v50, %v6054_v52 }
 0x647   : > { %v8266_v0 = vmax.f32 %v8202_v57, 0.0 }
 0x648   : > { %v7302_v24 = vadd.f32 %v12491_v51, %v6924_v29  ;;  %v5719_v51 = vshll.u32 %v9540_v21, 16 }
 0x649   : > { %v8330_v47 = vpack.c.bf16 %v8266_v0, %v8266_v0  ;;  %v12591_v14 = vpop.f32.mrf.mxu0 }
 0x64a   : > { %v8030_v46 = vpop.f32.mrf.mxu2  ;;  %v5721_v60 = vrot.slane %v5719_v51, 1  ;;  %v5310_v51 = vld [vmem:[#allocation2 + $0x120] sm:$0x1] }
 0x64b   : > { %v5953_v62 = vpop.f32.mrf.mxu3  ;;  %8394 = vst.msk [vmem:[%s12207_s29 + $0x90] sm:$0xf] %vm1897_vm2, %v8330_v47  ;;  %v8135_v38 = vadd.f32 %v8030_v46, %v7301_v35  ;;  %v6597_v47 = vrot.slane %v6595_v5, 4  ;;  %v7796_v46 = vsel %vm3396_vm5, %v7791_v9, %v7795_v12 }
 0x64c   : > { %v6055_v63 = vadd.f32 %v5953_v62, %v13048_v18  ;;  %v10219_v62 = vld [vmem:[#allocation2 + $0x120] sm:$0xff]   ;;  %v5722_v35 = vsel %vm3396_vm5, %v5717_v27, %v5721_v60 }
 0x64d   : > { %v8203_v22 = vadd.f32 %v12465_v17, %v8135_v38  ;;  %9256 = vmatmul.msk.bf16.gmra.mxu1 %vm2288_vm3, %v10219_v62 }
 0x64e   : > { %v6925_v61 = vadd.f32 %v12500_v34, %v6055_v63  ;;  %v6592_v34 = vshrl.u32 %v10731_v44, 16 }
 0x64f   : > { %v8267_v15 = vmax.f32 %v8203_v22, 0.0  ;;  %9425 = vmatmul.msk.bf16.gmra.mxu2 %vm2288_vm3, %v7788_v39 }
 0x650   : > { %9166 = vmatmul.msk.bf16.gmra.mxu3 %vm2288_vm3, %v5714_v56  ;;  %v7303_v48 = vadd.f32 %v12504_v58, %v6925_v61  ;;  %v6594_v52 = vrot.slane %v6592_v34, 3 }
 0x651   : > { %v8331_v42 = vpack.c.bf16 %v8267_v15, %v8267_v15  ;;  %v12598_v15 = vld [vmem:[#allocation2 + $0x118] sm:$0xff] }
 0x652   : > { %v8033_v50 = vpop.f32.mrf.mxu2  ;;  %v6598_v55 = vor.u32 %v6597_v47, %v6594_v52 }
 0x653   : > { %v5956_v36 = vpop.f32.mrf.mxu3  ;;  %8395 = vst.msk [vmem:[%s12207_s29 + $0x94] sm:$0xf] %vm1897_vm2, %v8331_v42  ;;  %v8136_v23 = vadd.f32 %v8033_v50, %v7302_v24  ;;  %v12602_v42 = vpop.f32.mrf.mxu1  ;;  %v7801_v24 = vshll.u32 %v12593_v45, 16  ;;  %v10220_v50 = vld [vmem:[#allocation2 + $0x128] sm:$0xff]  }
 0x654   : > { %v6056_v11 = vadd.f32 %v5956_v36, %v13049_v16  ;;  %v6599_v38 = vsel %vm2589_vm4, %v12109_v49, %v6598_v55  ;;  %v5723_v49 = vshrl.u32 %v9540_v21, 16  ;;  %v7797_v36 = vshrl.u32 %v12567_v8, 16  ;;  %v13051_v21 = vld [vmem:[#allocation38_spill] sm:$0xff] }
 0x655   : > { %v8204_v20 = vadd.f32 %v12465_v17, %v8136_v23  ;;  %9212 = vmatmul.msk.bf16.gmra.mxu0 %vm2288_vm3, %v6599_v38  ;;  %v9965_v19 = vunpack.c.h.b16 %v10220_v50 }
 0x656   : > { %v6926_v58 = vadd.f32 %v12513_v4, %v6056_v11  ;;  %v13050_v4 = vld [vmem:[#allocation36_spill] sm:$0xff]  ;;  %v5725_v1 = vor.u32 %v5723_v49, %v5721_v60  ;;  %v7799_v10 = vor.u32 %v7797_v36, %v7795_v12  ;;  %v7805_v49 = vshrl.u32 %v12593_v45, 16  ;;  %v7392_v45 = vld [vmem:[#allocation2 + $0x130] sm:$0x1] }
 0x657   : > { %v8268_v43 = vmax.f32 %v8204_v20, 0.0  ;;  %v6312_v44 = vpack.c.b16 %v9965_v19, %v9965_v19 }
 0x658   : > { %v7304_v39 = vadd.f32 %v12520_v37, %v6926_v58  ;;  %v5727_v37 = vshll.u32 %v12598_v15, 16 }
 0x659   : > { %v8332_v26 = vpack.c.bf16 %v8268_v43, %v8268_v43  ;;  %v7803_v43 = vrot.slane %v7801_v24, 1  ;;  %v6604_v34 = vshll.u32 %v6312_v44, 16 }
 0x65a   : > { %v8035_v0 = vpop.f32.mrf.mxu2  ;;  %v5729_v11 = vrot.slane %v5727_v37, 1 }
 0x65b   : > { %v5958_v57 = vpop.f32.mrf.mxu3  ;;  %8396 = vst.msk [vmem:[%s12207_s29 + $0x98] sm:$0xf] %vm1897_vm2, %v8332_v26  ;;  %v8137_v59 = vadd.f32 %v8035_v0, %v7303_v48  ;;  %v5445_v0 = vunpack.c.l.b16 %v5310_v51  ;;  %v7804_v9 = vsel %vm3396_vm5, %v7799_v10, %v7803_v43  ;;  %v12620_v47 = vpop.f32.mrf.mxu1  ;;  %v7807_v37 = vor.u32 %v7805_v49, %v7803_v43  ;;  %v13056_v49 = vld [vmem:[#allocation48_spill] sm:$0xff] }
 0x65c   : > { %v6057_v29 = vadd.f32 %v5958_v57, %v13050_v4  ;;  %v6601_v57 = vshrl.u32 %v6312_v44, 16  ;;  %v5730_v52 = vsel %vm3396_vm5, %v5725_v1, %v5729_v11 }
 0x65d   : > { %v8205_v7 = vadd.f32 %v12465_v17, %v8137_v59  ;;  %v6606_v59 = vrot.slane %v6604_v34, 4  ;;  %9257 = vmatmul.msk.bf16.gmra.mxu1 %vm2288_vm3, %v10220_v50 }
 0x65e   : > { %v6927_v23 = vadd.f32 %v12526_v32, %v6057_v29  ;;  %v12611_v32 = vpop.f32.mrf.mxu0  ;;  %v6603_v12 = vrot.slane %v6601_v57, 3 }
 0x65f   : > { %v8269_v40 = vmax.f32 %v8205_v7, 0.0  ;;  %9426 = vmatmul.msk.bf16.gmra.mxu2 %vm2288_vm3, %v7796_v46  ;;  %v5478_v7 = vpack.c.b16 %v5445_v0, %v5445_v0 }
 0x660   : > { %9167 = vmatmul.msk.bf16.gmra.mxu3 %vm2288_vm3, %v5722_v35  ;;  %v7305_v16 = vadd.f32 %v12532_v54, %v6927_v23  ;;  %v6607_v62 = vor.u32 %v6606_v59, %v6603_v12  ;;  %v9579_v35 = vld [vmem:[#allocation2 + $0x128] sm:$0xff] }
 0x661   : > { %v8333_v22 = vpack.c.bf16 %v8269_v40, %v8269_v40  ;;  %v13052_v40 = vld [vmem:[#allocation40_spill] sm:$0xff]  ;;  %v7813_v59 = vshrl.u32 %v9579_v35, 16 }
 0x662   : > { %v8038_v18 = vpop.f32.mrf.mxu2  ;;  %v6608_v46 = vsel %vm2589_vm4, %v6598_v55, %v6607_v62  ;;  %v7809_v55 = vshll.u32 %v9579_v35, 16 }
 0x663   : > { %v5961_v56 = vpop.f32.mrf.mxu3  ;;  %8397 = vst.msk [vmem:[%s12207_s29 + $0x9c] sm:$0xf] %vm1897_vm2, %v8333_v22  ;;  %v8138_v63 = vadd.f32 %v8038_v18, %v7304_v39  ;;  %v5731_v39 = vshrl.u32 %v12598_v15, 16  ;;  %v5735_v18 = vshll.u32 %v5478_v7, 16 }
 0x664   : > { %v6058_v48 = vadd.f32 %v5961_v56, %v13051_v21  ;;  %v7811_v19 = vrot.slane %v7809_v55, 1 }
 0x665   : > { %v8206_v61 = vadd.f32 %v12465_v17, %v8138_v63  ;;  %9213 = vmatmul.msk.bf16.gmra.mxu0 %vm2288_vm3, %v6608_v46  ;;  %v5733_v50 = vor.u32 %v5731_v39, %v5729_v11  ;;  %v5737_v23 = vrot.slane %v5735_v18, 1 }
 0x666   : > { %v6928_v60 = vadd.f32 %v12542_v53, %v6058_v48  ;;  %v12631_v63 = vpop.f32.mrf.mxu0  ;;  %v7812_v48 = vsel %vm3396_vm5, %v7807_v37, %v7811_v19  ;;  %v7815_v7 = vor.u32 %v7813_v59, %v7811_v19 }
 0x667   : > { %v8270_v20 = vmax.f32 %v8206_v61, 0.0  ;;  %v12636_v61 = vpop.f32.mrf.mxu1  ;;  %v5738_v21 = vsel %vm3396_vm5, %v5733_v50, %v5737_v23 }
 0x668   : > { %v7306_v29 = vadd.f32 %v12548_v33, %v6928_v60 }
 0x669   : > { %v8334_v8 = vpack.c.bf16 %v8270_v20, %v8270_v20  ;;  %v13053_v20 = vld [vmem:[#allocation42_spill] sm:$0xff] }
 0x66a   : > { %v8040_v26 = vpop.f32.mrf.mxu2 }
 0x66b   : > { %v5963_v27 = vpop.f32.mrf.mxu3  ;;  %8398 = vst.msk [vmem:[%s12207_s29 + $0xa0] sm:$0xf] %vm1897_vm2, %v8334_v8  ;;  %v8139_v5 = vadd.f32 %v8040_v26, %v7305_v16  ;;  %v7527_v8 = vunpack.c.l.b16 %v7392_v45  ;;  %v13054_v26 = vld [vmem:[#allocation44_spill] sm:$0xff] }
 0x66c   : > { %v6059_v38 = vadd.f32 %v5963_v27, %v13052_v40  ;;  %v13055_v40 = vld [vmem:[#allocation46_spill] sm:$0xff] }
 0x66d   : > { %v8207_v54 = vadd.f32 %v12465_v17, %v8139_v5 }
 0x66e   : > { %v6929_v36 = vadd.f32 %v12554_v13, %v6059_v38  ;;  %v6846_v16 = vpop.f32.mrf.mxu0 }
 0x66f   : > { %v8271_v58 = vmax.f32 %v8207_v54, 0.0  ;;  %9427 = vmatmul.msk.bf16.gmra.mxu2 %vm2288_vm3, %v7804_v9  ;;  %v7224_v9 = vpop.f32.mrf.mxu1 }
 0x670   : > { %9168 = vmatmul.msk.bf16.gmra.mxu3 %vm2288_vm3, %v5730_v52  ;;  %v7307_v51 = vadd.f32 %v12563_v28, %v6929_v36  ;;  %v7560_v28 = vpack.c.b16 %v7527_v8, %v7527_v8 }
 0x671   : > { %v8335_v53 = vpack.c.bf16 %v8271_v58, %v8271_v58 }
 0x672   : > { %v8043_v22 = vpop.f32.mrf.mxu2  ;;  %v7817_v60 = vshll.u32 %v7560_v28, 16 }
 0x673   : > { %v5966_v4 = vpop.f32.mrf.mxu3  ;;  %8399 = vst.msk [vmem:[%s12207_s29 + $0xa4] sm:$0xf] %vm1897_vm2, %v8335_v53  ;;  %v8140_v56 = vadd.f32 %v8043_v22, %v7306_v29 }
 0x674   : > { %v6060_v15 = vadd.f32 %v5966_v4, %v13053_v20  ;;  %v7819_v46 = vrot.slane %v7817_v60, 1 }
 0x675   : > { %v8208_v24 = vadd.f32 %v12465_v17, %v8140_v56 }
 0x676   : > { %v6930_v43 = vadd.f32 %v12573_v31, %v6060_v15  ;;  %v6848_v58 = vpop.f32.mrf.mxu0  ;;  %v13057_v15 = vld [vmem:[#allocation50_spill] sm:$0xff] }
 0x677   : > { %v8272_v33 = vmax.f32 %v8208_v24, 0.0  ;;  %v7226_v22 = vpop.f32.mrf.mxu1 }
 0x678   : > { %v7308_v0 = vadd.f32 %v12578_v2, %v6930_v43  ;;  %v13058_v43 = vld [vmem:[#allocation52_spill] sm:$0xff] }
 0x679   : > { %v8336_v1 = vpack.c.bf16 %v8272_v33, %v8272_v33 }
 0x67a   : > { %v8045_v44 = vpop.f32.mrf.mxu2 }
 0x67b   : > { %v5968_v10 = vpop.f32.mrf.mxu3  ;;  %8400 = vst.msk [vmem:[%s12207_s29 + $0xa8] sm:$0xf] %vm1897_vm2, %v8336_v1  ;;  %v8141_v13 = vadd.f32 %v8045_v44, %v7307_v51 }
 0x67c   : > { %v6061_v57 = vadd.f32 %v5968_v10, %v13054_v26 }
 0x67d   : > { %v8209_v27 = vadd.f32 %v12465_v17, %v8141_v13 }
 0x67e   : > { %v6931_v54 = vadd.f32 %v12591_v14, %v6061_v57  ;;  %v7820_v14 = vsel %vm3396_vm5, %v7815_v7, %v7819_v46  ;;  %v6851_v33 = vpop.f32.mrf.mxu0 }
 0x67f   : > { %v8273_v11 = vmax.f32 %v8209_v27, 0.0  ;;  %9428 = vmatmul.msk.bf16.gmra.mxu2 %vm2288_vm3, %v7812_v48  ;;  %v7229_v19 = vpop.f32.mrf.mxu1 }
 0x680   : > { %9169 = vmatmul.msk.bf16.gmra.mxu3 %vm2288_vm3, %v5738_v21  ;;  %v7309_v4 = vadd.f32 %v12602_v42, %v6931_v54 }
 0x681   : > { %v8337_v34 = vpack.c.bf16 %v8273_v11, %v8273_v11 }
 0x682   : > { %v8048_v12 = vpop.f32.mrf.mxu2 }
 0x683   : > { %v5971_v5 = vpop.f32.mrf.mxu3  ;;  %8401 = vst.msk [vmem:[%s12207_s29 + $0xac] sm:$0xf] %vm1897_vm2, %v8337_v34  ;;  %v8142_v31 = vadd.f32 %v8048_v12, %v7308_v0 }
 0x684   : > { %v6062_v38 = vadd.f32 %v5971_v5, %v13055_v40 }
 0x685   : > { %v8210_v52 = vadd.f32 %v12465_v17, %v8142_v31 }
 0x686   : > { %v6932_v56 = vadd.f32 %v12611_v32, %v6062_v38  ;;  %v6853_v13 = vpop.f32.mrf.mxu0  ;;  %v13060_v38 = vld [vmem:[#allocation56_spill] sm:$0xff] }
 0x687   : > { %v8274_v62 = vmax.f32 %v8210_v52, 0.0  ;;  %v7231_v8 = vpop.f32.mrf.mxu1 }
 0x688   : > { %v7310_v24 = vadd.f32 %v12620_v47, %v6932_v56 }
 0x689   : > { %v8338_v53 = vpack.c.bf16 %v8274_v62, %v8274_v62 }
 0x68a   : > { %v8050_v29 = vpop.f32.mrf.mxu2 }
 0x68b   : > { %v5973_v2 = vpop.f32.mrf.mxu3  ;;  %8402 = vst.msk [vmem:[%s12207_s29 + $0xb0] sm:$0xf] %vm1897_vm2, %v8338_v53  ;;  %v8143_v35 = vadd.f32 %v8050_v29, %v7309_v4 }
 0x68c   : > { %v6063_v55 = vadd.f32 %v5973_v2, %v13056_v49  ;;  %v13061_v49 = vld [vmem:[#allocation58_spill] sm:$0xff] }
 0x68d   : > { %v8211_v39 = vadd.f32 %v12465_v17, %v8143_v35 }
 0x68e   : > { %v6933_v37 = vadd.f32 %v12631_v63, %v6063_v55  ;;  %v6856_v0 = vpop.f32.mrf.mxu0 }
 0x68f   : > { %v8275_v18 = vmax.f32 %v8211_v39, 0.0  ;;  %9429 = vmatmul.msk.bf16.gmra.mxu2 %vm2288_vm3, %v7820_v14  ;;  %v7234_v52 = vpop.f32.mrf.mxu1 }
 0x690   : > { %v7311_v45 = vadd.f32 %v12636_v61, %v6933_v37 }
 0x691   : > { %v8339_v36 = vpack.c.bf16 %v8275_v18, %v8275_v18 }
 0x692   : > { %v8053_v50 = vpop.f32.mrf.mxu2 }
 0x693   : > { %v5976_v42 = vpop.f32.mrf.mxu3  ;;  %8403 = vst.msk [vmem:[%s12207_s29 + $0xb4] sm:$0xf] %vm1897_vm2, %v8339_v36  ;;  %v8144_v23 = vadd.f32 %v8053_v50, %v7310_v24 }
 0x694   : > { %v6064_v1 = vadd.f32 %v5976_v42, %v13057_v15 }
 0x695   : > { %v8212_v32 = vadd.f32 %v12465_v17, %v8144_v23 }
 0x696   : > { %v6934_v21 = vadd.f32 %v6846_v16, %v6064_v1  ;;  %v13059_v16 = vld [vmem:[#allocation54_spill] sm:$0xff] }
 0x697   : > { %v8276_v20 = vmax.f32 %v8212_v32, 0.0  ;;  %v7236_v14 = vpop.f32.mrf.mxu1 }
 0x698   : > { %v7312_v26 = vadd.f32 %v7224_v9, %v6934_v21 }
 0x699   : > { %v8340_v10 = vpack.c.bf16 %v8276_v20, %v8276_v20 }
 0x69a   : > { %v8055_v44 = vpop.f32.mrf.mxu2 }
 0x69b   : > { %v5978_v51 = vpop.f32.mrf.mxu3  ;;  %8404 = vst.msk [vmem:[%s12207_s29 + $0xb8] sm:$0xf] %vm1897_vm2, %v8340_v10  ;;  %v8145_v47 = vadd.f32 %v8055_v44, %v7311_v45 }
 0x69c   : > { %v6065_v27 = vadd.f32 %v5978_v51, %v13058_v43 }
 0x69d   : > { %v8213_v48 = vadd.f32 %v12465_v17, %v8145_v47 }
 0x69e   : > { %v6935_v34 = vadd.f32 %v6848_v58, %v6065_v27  ;;  %v6858_v58 = vpop.f32.mrf.mxu0 }
 0x69f   : > { %v8277_v63 = vmax.f32 %v8213_v48, 0.0 }
 0x6a0   : > { %v7313_v54 = vadd.f32 %v7226_v22, %v6935_v34 }
 0x6a1   : > { %v8341_v11 = vpack.c.bf16 %v8277_v63, %v8277_v63 }
 0x6a2   : > { %v8058_v57 = vpop.f32.mrf.mxu2 }
 0x6a3   : > { %v5981_v28 = vpop.f32.mrf.mxu3  ;;  %8405 = vst.msk [vmem:[%s12207_s29 + $0xbc] sm:$0xf] %vm1897_vm2, %v8341_v11  ;;  %v8146_v61 = vadd.f32 %v8058_v57, %v7312_v26 }
 0x6a4   : > { %v6066_v31 = vadd.f32 %v5981_v28, %v13059_v16 }
 0x6a5   : > { %v8214_v5 = vadd.f32 %v12465_v17, %v8146_v61 }
 0x6a6   : > { %v6936_v7 = vadd.f32 %v6851_v33, %v6066_v31  ;;  %v6861_v33 = vpop.f32.mrf.mxu0 }
 0x6a7   : > { %v8278_v12 = vmax.f32 %v8214_v5, 0.0 }
 0x6a8   : > { %v7314_v29 = vadd.f32 %v7229_v19, %v6936_v7  ;;  %v7239_v19 = vpop.f32.mrf.mxu1 }
 0x6a9   : > { %v8342_v59 = vpack.c.bf16 %v8278_v12, %v8278_v12 }
 0x6aa   : > { %v8060_v62 = vpop.f32.mrf.mxu2 }
 0x6ab   : > { %v5983_v60 = vpop.f32.mrf.mxu3  ;;  %8406 = vst.msk [vmem:[%s12207_s29 + $0xc0] sm:$0xf] %vm1897_vm2, %v8342_v59  ;;  %v8147_v9 = vadd.f32 %v8060_v62, %v7313_v54 }
 0x6ac   : > { %v6067_v53 = vadd.f32 %v5983_v60, %v13060_v38 }
 0x6ad   : > { %v8215_v46 = vadd.f32 %v12465_v17, %v8147_v9 }
 0x6ae   : > { %v6937_v56 = vadd.f32 %v6853_v13, %v6067_v53  ;;  %v6863_v47 = vpop.f32.mrf.mxu0 }
 0x6af   : > { %v8279_v40 = vmax.f32 %v8215_v46, 0.0 }
 0x6b0   : > { %v7315_v24 = vadd.f32 %v7231_v8, %v6937_v56  ;;  %v7241_v63 = vpop.f32.mrf.mxu1  ;;  %v13062_v8 = vld [vmem:[#allocation60_spill] sm:$0xff] }
 0x6b1   : > { %v8343_v2 = vpack.c.bf16 %v8279_v40, %v8279_v40  ;;  %v13064_v40 = vld [vmem:[#allocation64_spill] sm:$0xff] }
 0x6b2   : > { %v8063_v35 = vpop.f32.mrf.mxu2 }
 0x6b3   : > { %v5986_v4 = vpop.f32.mrf.mxu3  ;;  %8407 = vst.msk [vmem:[%s12207_s29 + $0xc4] sm:$0xf] %vm1897_vm2, %v8343_v2  ;;  %v8148_v22 = vadd.f32 %v8063_v35, %v7314_v29 }
 0x6b4   : > { %v6068_v55 = vadd.f32 %v5986_v4, %v13061_v49 }
 0x6b5   : > { %v8216_v39 = vadd.f32 %v12465_v17, %v8148_v22 }
 0x6b6   : > { %v6938_v37 = vadd.f32 %v6856_v0, %v6068_v55  ;;  %v6866_v34 = vpop.f32.mrf.mxu0  ;;  %v13063_v0 = vld [vmem:[#allocation62_spill] sm:$0xff] }
 0x6b7   : > { %v8280_v18 = vmax.f32 %v8216_v39, 0.0  ;;  %v13065_v39 = vld [vmem:[#allocation66_spill] sm:$0xff] }
 0x6b8   : > { %v7316_v51 = vadd.f32 %v7234_v52, %v6938_v37  ;;  %v7244_v60 = vpop.f32.mrf.mxu1 }
 0x6b9   : > { %v8344_v36 = vpack.c.bf16 %v8280_v18, %v8280_v18 }
 0x6ba   : > { %v8065_v50 = vpop.f32.mrf.mxu2 }
 0x6bb   : > { %v5988_v42 = vpop.f32.mrf.mxu3  ;;  %8408 = vst.msk [vmem:[%s12207_s29 + $0xc8] sm:$0xf] %vm1897_vm2, %v8344_v36  ;;  %v8149_v23 = vadd.f32 %v8065_v50, %v7315_v24 }
 0x6bc   : > { %v6069_v15 = vadd.f32 %v5988_v42, %v12094_v30 }
 0x6bd   : > { %v8217_v32 = vadd.f32 %v12465_v17, %v8149_v23 }
 0x6be   : > { %v6939_v13 = vadd.f32 %v6858_v58, %v6069_v15  ;;  %v6868_v46 = vpop.f32.mrf.mxu0 }
 0x6bf   : > { %v8281_v20 = vmax.f32 %v8217_v32, 0.0 }
 0x6c0   : > { %v7317_v30 = vadd.f32 %v7236_v14, %v6939_v13  ;;  %v7246_v35 = vpop.f32.mrf.mxu1 }
 0x6c1   : > { %v8345_v1 = vpack.c.bf16 %v8281_v20, %v8281_v20 }
 0x6c2   : > { %v8068_v45 = vpop.f32.mrf.mxu2 }
 0x6c3   : > { %v5991_v10 = vpop.f32.mrf.mxu3  ;;  %8409 = vst.msk [vmem:[%s12207_s29 + $0xcc] sm:$0xf] %vm1897_vm2, %v8345_v1  ;;  %v8150_v44 = vadd.f32 %v8068_v45, %v7316_v51 }
 0x6c4   : > { %v6070_v43 = vadd.f32 %v5991_v10, %v13062_v8 }
 0x6c5   : > { %v8218_v21 = vadd.f32 %v12465_v17, %v8150_v44 }
 0x6c6   : > { %v6940_v57 = vadd.f32 %v6861_v33, %v6070_v43  ;;  %v6871_v42 = vpop.f32.mrf.mxu0 }
 0x6c7   : > { %v8282_v48 = vmax.f32 %v8218_v21, 0.0 }
 0x6c8   : > { %v7318_v59 = vadd.f32 %v7239_v19, %v6940_v57  ;;  %v7249_v50 = vpop.f32.mrf.mxu1 }
 0x6c9   : > { %v8346_v27 = vpack.c.bf16 %v8282_v48, %v8282_v48 }
 0x6ca   : > { %v8070_v28 = vpop.f32.mrf.mxu2 }
 0x6cb   : > { %v5993_v11 = vpop.f32.mrf.mxu3  ;;  %8410 = vst.msk [vmem:[%s12207_s29 + $0xd0] sm:$0xf] %vm1897_vm2, %v8346_v27  ;;  %v8151_v26 = vadd.f32 %v8070_v28, %v7317_v30 }
 0x6cc   : > { %v6071_v12 = vadd.f32 %v5993_v11, %v13063_v0 }
 0x6cd   : > { %v8219_v61 = vadd.f32 %v12465_v17, %v8151_v26 }
 0x6ce   : > { %v6941_v62 = vadd.f32 %v6863_v47, %v6071_v12  ;;  %v6873_v45 = vpop.f32.mrf.mxu0 }
 0x6cf   : > { %v8283_v5 = vmax.f32 %v8219_v61, 0.0 }
 0x6d0   : > { %v7319_v2 = vadd.f32 %v7241_v63, %v6941_v62  ;;  %v7251_v13 = vpop.f32.mrf.mxu1  ;;  %v13066_v63 = vld [vmem:[#allocation69_spill] sm:$0xff] }
 0x6d1   : > { %v8347_v16 = vpack.c.bf16 %v8283_v5, %v8283_v5  ;;  %v13067_v5 = vld [vmem:[#allocation72_spill] sm:$0xff] }
 0x6d2   : > { %v8073_v54 = vpop.f32.mrf.mxu2 }
 0x6d3   : > { %v5996_v31 = vpop.f32.mrf.mxu3  ;;  %8411 = vst.msk [vmem:[%s12207_s29 + $0xd4] sm:$0xf] %vm1897_vm2, %v8347_v16  ;;  %v8152_v52 = vadd.f32 %v8073_v54, %v7318_v59 }
 0x6d4   : > { %v6072_v58 = vadd.f32 %v5996_v31, %v13064_v40 }
 0x6d5   : > { %v8220_v9 = vadd.f32 %v12465_v17, %v8152_v52 }
 0x6d6   : > { %v6942_v22 = vadd.f32 %v6866_v34, %v6072_v58  ;;  %v6876_v30 = vpop.f32.mrf.mxu0 }
 0x6d7   : > { %v8284_v7 = vmax.f32 %v8220_v9, 0.0 }
 0x6d8   : > { %v7320_v36 = vadd.f32 %v7244_v60, %v6942_v22  ;;  %v7254_v61 = vpop.f32.mrf.mxu1 }
 0x6d9   : > { %v8348_v38 = vpack.c.bf16 %v8284_v7, %v8284_v7 }
 0x6da   : > { %v8075_v4 = vpop.f32.mrf.mxu2 }
 0x6db   : > { %v5998_v53 = vpop.f32.mrf.mxu3  ;;  %8412 = vst.msk [vmem:[%s12207_s29 + $0xd8] sm:$0xf] %vm1897_vm2, %v8348_v38  ;;  %v8153_v29 = vadd.f32 %v8075_v4, %v7319_v2 }
 0x6dc   : > { %v6073_v18 = vadd.f32 %v5998_v53, %v13065_v39 }
 0x6dd   : > { %v8221_v14 = vadd.f32 %v12465_v17, %v8153_v29 }
 0x6de   : > { %v6943_v23 = vadd.f32 %v6868_v46, %v6073_v18  ;;  %v6878_v52 = vpop.f32.mrf.mxu0 }
 0x6df   : > { %v8285_v56 = vmax.f32 %v8221_v14, 0.0 }
 0x6e0   : > { %v7321_v1 = vadd.f32 %v7246_v35, %v6943_v23  ;;  %v7256_v40 = vpop.f32.mrf.mxu1 }
 0x6e1   : > { %v8349_v49 = vpack.c.bf16 %v8285_v56, %v8285_v56 }
 0x6e2   : > { %v8078_v24 = vpop.f32.mrf.mxu2 }
 0x6e3   : > { %v6001_v55 = vpop.f32.mrf.mxu3  ;;  %8413 = vst.msk [vmem:[%s12207_s29 + $0xdc] sm:$0xf] %vm1897_vm2, %v8349_v49  ;;  %v8154_v33 = vadd.f32 %v8078_v24, %v7320_v36 }
 0x6e4   : > { %v6074_v19 = vadd.f32 %v6001_v55, %v12146_v3 }
 0x6e5   : > { %v8222_v37 = vadd.f32 %v12465_v17, %v8154_v33 }
 0x6e6   : > { %v6944_v44 = vadd.f32 %v6871_v42, %v6074_v19  ;;  %v6881_v35 = vpop.f32.mrf.mxu0  ;;  %v10747_v19 = vld [vmem:[%s12746_s4] ss:$0 sm:$0xff] }
 0x6e7   : > { %v8286_v32 = vmax.f32 %v8222_v37, 0.0 }
 0x6e8   : > { %v7322_v48 = vadd.f32 %v7249_v50, %v6944_v44  ;;  %v7259_v18 = vpop.f32.mrf.mxu1 }
 0x6e9   : > { %v8350_v20 = vpack.c.bf16 %v8286_v32, %v8286_v32 }
 0x6ea   : > { %v8080_v10 = vpop.f32.mrf.mxu2 }
 0x6eb   : > { %v6003_v15 = vpop.f32.mrf.mxu3  ;;  %8414 = vst.msk [vmem:[%s12207_s29 + $0xe0] sm:$0xf] %vm1897_vm2, %v8350_v20  ;;  %v8155_v51 = vadd.f32 %v8080_v10, %v7321_v1 }
 0x6ec   : > { %v6075_v8 = vadd.f32 %v6003_v15, %v13066_v63 }
 0x6ed   : > { %v8223_v47 = vadd.f32 %v12465_v17, %v8155_v51 }
 0x6ee   : > { %v6945_v28 = vadd.f32 %v6873_v45, %v6075_v8  ;;  %v6883_v23 = vpop.f32.mrf.mxu0 }
 0x6ef   : > { %v8287_v21 = vmax.f32 %v8223_v47, 0.0 }
 0x6f0   : > { %v7323_v34 = vadd.f32 %v7251_v13, %v6945_v28 }
 0x6f1   : > { %v8351_v43 = vpack.c.bf16 %v8287_v21, %v8287_v21 }
 0x6f2   : > { %v8083_v27 = vpop.f32.mrf.mxu2 }
 0x6f3   : > { %v6006_v3 = vpop.f32.mrf.mxu3  ;;  %8415 = vst.msk [vmem:[%s12207_s29 + $0xe4] sm:$0xf] %vm1897_vm2, %v8351_v43  ;;  %v8156_v11 = vadd.f32 %v8083_v27, %v7322_v48 }
 0x6f4   : > { %v6076_v0 = vadd.f32 %v6006_v3, %v13067_v5 }
 0x6f5   : > { %v8224_v26 = vadd.f32 %v12465_v17, %v8156_v11 }
 0x6f6   : > { %v6946_v60 = vadd.f32 %v6876_v30, %v6076_v0 }
 0x6f7   : > { %v8288_v57 = vmax.f32 %v8224_v26, 0.0 }
 0x6f8   : > { %v7324_v9 = vadd.f32 %v7254_v61, %v6946_v60 }
 0x6f9   : > { %v8352_v12 = vpack.c.bf16 %v8288_v57, %v8288_v57 }
 0x6fa   : > { %v8085_v31 = vpop.f32.mrf.mxu2 }
 0x6fb   : > { %v6008_v16 = vpop.f32.mrf.mxu3  ;;  %8416 = vst.msk [vmem:[%s12207_s29 + $0xe8] sm:$0xf] %vm1897_vm2, %v8352_v12  ;;  %v8157_v59 = vadd.f32 %v8085_v31, %v7323_v34 }
 0x6fc   : > { %v6077_v7 = vadd.f32 %v6008_v16, %v12167_v6 }
 0x6fd   : > { %v8225_v54 = vadd.f32 %v12465_v17, %v8157_v59 }
 0x6fe   : > { %v6947_v2 = vadd.f32 %v6878_v52, %v6077_v7 }
 0x6ff   : > { %v8289_v62 = vmax.f32 %v8225_v54, 0.0 }
 0x700   : > { %v7325_v22 = vadd.f32 %v7256_v40, %v6947_v2 }
 0x701   : > { %v8353_v46 = vpack.c.bf16 %v8289_v62, %v8289_v62 }
 0x702   : > { %v8088_v58 = vpop.f32.mrf.mxu2 }
 0x703   : > { %8417 = vst.msk [vmem:[%s12207_s29 + $0xec] sm:$0xf] %vm1897_vm2, %v8353_v46  ;;  %v8158_v38 = vadd.f32 %v8088_v58, %v7324_v9  ;;  %v6011_v53 = vpop.f32.mrf.mxu3 }
 0x704   : > { %v6078_v14 = vadd.f32 %v6011_v53, %v12177_v41 }
 0x705   : > { %v8226_v4 = vadd.f32 %v12465_v17, %v8158_v38 }
 0x706   : > { %v6948_v49 = vadd.f32 %v6881_v35, %v6078_v14 }
 0x707   : > { %v8290_v29 = vmax.f32 %v8226_v4, 0.0 }
 0x708   : > { %v7326_v24 = vadd.f32 %v7259_v18, %v6948_v49 }
 0x709   : > { %v8354_v56 = vpack.c.bf16 %v8290_v29, %v8290_v29 }
 0x70a   : > { %v8090_v39 = vpop.f32.mrf.mxu2 }
 0x70b   : > { %8418 = vst.msk [vmem:[%s12207_s29 + $0xf0] sm:$0xf] %vm1897_vm2, %v8354_v56  ;;  %v8159_v6 = vadd.f32 %v8090_v39, %v7325_v22  ;;  %v6013_v36 = vpop.f32.mrf.mxu3 }
 0x70c   : > { %v6079_v33 = vadd.f32 %v6013_v36, %v12183_v25 }
 0x70d   : > { %v8227_v55 = vadd.f32 %v12465_v17, %v8159_v6  ;;  %v7261_v17 = vpop.f32.mrf.mxu1 }
 0x70e   : > { %v6949_v32 = vadd.f32 %v6883_v23, %v6079_v33 }
 0x70f   : > { %v8291_v42 = vmax.f32 %v8227_v55, 0.0 }
 0x710   : > { %v7327_v1 = vadd.f32 %v7261_v17, %v6949_v32 }
 0x711   : > { %v8355_v50 = vpack.c.bf16 %v8291_v42, %v8291_v42 }
 0x712   : > { %v8093_v37 = vpop.f32.mrf.mxu2 }
 0x713   : > { %8419 = vst.msk [vmem:[%s12207_s29 + $0xf4] sm:$0xf] %vm1897_vm2, %v8355_v50  ;;  %v8160_v41 = vadd.f32 %v8093_v37, %v7326_v24 }
 0x715   : > { %v8228_v20 = vadd.f32 %v10747_v19, %v8160_v41 }
 0x717   : > { %v8292_v15 = vmax.f32 %v8228_v20, 0.0 }
 0x719   : > { %v8356_v10 = vpack.c.bf16 %v8292_v15, %v8292_v15 }
 0x71a   : > { %v8095_v51 = vpop.f32.mrf.mxu2 }
 0x71b   : > { %8420 = vst.msk [vmem:[%s12207_s29 + $0xf8] sm:$0xf] %vm1897_vm2, %v8356_v10  ;;  %v8161_v25 = vadd.f32 %v8095_v51, %v7327_v1 }
 0x71d   : > { %v8229_v45 = vadd.f32 %v10747_v19, %v8161_v25 }
 0x71f   : > { %v8293_v44 = vmax.f32 %v8229_v45, 0.0 }
 0x721   : > { %v8357_v47 = vpack.c.bf16 %v8293_v44, %v8293_v44 }
 0x723   : > { %8421 = vst.msk [vmem:[%s12207_s29 + $0xfc] sm:$0xf] %vm1897_vm2, %v8357_v47 }
 0x724 PF: > { %s15_s18 = sadd.s32 1, %s10754_s18  }
 0x725   : > { %p12_p4 = scmp.ge.s32.totalorder %s15_s18, 4  }
 0x727   :  { %14 = sbr.rel (!%p12_p4) target bundleno = 1 (0x1), region = 78 }

</bundles_post_ra>
